<compile_context>
chip_gen: v7x
topology: tpu7x:2x2x1
jax: 0.10.0
libtpu: 0.0.40
codegen_flags: <defaults>
</compile_context>

<pallas_src>
import jax
import jax.numpy as jnp
from jax.experimental import pallas as pl
from jax.experimental.pallas import tpu as pltpu


def _cam_head_kernel(x_ref, w_ref, b_ref, heads_ref, pooled_ref):
    # x_ref: (BB, C, HW) float32 backbone feature tile.
    x = x_ref[...]
    # AdaptiveAvgPool2d((1,1)) + flatten == mean over the spatial axis.
    pooled = jnp.mean(x, axis=-1)                      # (BB, C) f32
    pooled_ref[...] = pooled

    # Fused heads: y = pooled @ [Wv|Wp|Wr] + [bv|bp|br]
    # Weights pre-transposed/concatenated to (C, 3*OUT) bf16; f32 accumulation
    # on the MXU.
    heads_ref[...] = (
        jnp.dot(pooled.astype(jnp.bfloat16), w_ref[...],
                preferred_element_type=jnp.float32)
        + b_ref[...]
    )


def _pick_batch_tile(B):
    """Largest power-of-two divisor of B, capped at 128 (keeps the MXU M-dim
    as full as possible without breaking divisibility)."""
    for bb in (128, 64, 32, 16, 8, 4, 2):
        if B % bb == 0:
            return bb
    return B


def camera_regressor_head(feats_nchw, fused_params):
    """feats_nchw: (B, C, H, W) backbone feature map (float32).
    fused_params: dict with
        w_heads: (C, 3*OUT) bfloat16  (concat of vfov|pitch|roll, transposed)
        b_heads: (1, 3*OUT) float32
    Returns ([vfov, pitch, roll], pooled)."""
    B, C, H, W = feats_nchw.shape
    HW = H * W
    OUT3 = fused_params["w_heads"].shape[1]
    OUT = OUT3 // 3
    x = feats_nchw.reshape(B, C, HW).astype(jnp.float32)

    # Batch tile: weights stay resident across grid steps (constant index_map).
    BB = _pick_batch_tile(B)
    grid = (B // BB,)

    heads, pooled = pl.pallas_call(
        _cam_head_kernel,
        grid=grid,
        in_specs=[
            pl.BlockSpec((BB, C, HW), lambda i: (i, 0, 0)),   # activations
            pl.BlockSpec((C, OUT3), lambda i: (0, 0)),        # fused W (resident)
            pl.BlockSpec((1, OUT3), lambda i: (0, 0)),        # fused bias (resident)
        ],
        out_specs=[
            pl.BlockSpec((BB, OUT3), lambda i: (i, 0)),       # fused heads
            pl.BlockSpec((BB, C), lambda i: (i, 0)),          # pooled features
        ],
        out_shape=[
            jax.ShapeDtypeStruct((B, OUT3), jnp.float32),
            jax.ShapeDtypeStruct((B, C), jnp.float32),
        ],
        compiler_params=pltpu.CompilerParams(
            dimension_semantics=("parallel",)),
    )(x, fused_params["w_heads"], fused_params["b_heads"])

    vfov = heads[:, :OUT]
    pitch = heads[:, OUT:2 * OUT]
    roll = heads[:, 2 * OUT:]
    return [vfov, pitch, roll], pooled


def init_params(key, in_channels, num_out_channels):
    """Matches PyTorch init: weight ~ N(0, 0.01), bias = 0.
    Weights stored transposed: (in_channels, num_out_channels)."""
    kv, kp, kr = jax.random.split(key, 3)
    std = 0.01
    mk_w = lambda k: (std * jax.random.normal(
        k, (in_channels, num_out_channels))).astype(jnp.float32)
    zero_b = jnp.zeros((1, num_out_channels), jnp.float32)
    return {
        "w_vfov": mk_w(kv), "b_vfov": zero_b,
        "w_pitch": mk_w(kp), "b_pitch": zero_b,
        "w_roll": mk_w(kr), "b_roll": zero_b,
    }


def fuse_head_params(params):
    """One-time (init/wrapper-time) fusion of the three heads:
    concat weights -> (C, 3*OUT) bf16, biases -> (1, 3*OUT) f32."""
    w = jnp.concatenate(
        [params["w_vfov"], params["w_pitch"], params["w_roll"]], axis=1)
    b = jnp.concatenate(
        [params["b_vfov"], params["b_pitch"], params["b_roll"]], axis=1)
    return {"w_heads": w.astype(jnp.bfloat16),
            "b_heads": b.astype(jnp.float32)}


def _reference(feats_nchw, params):
    B, C, H, W = feats_nchw.shape
    pooled = feats_nchw.reshape(B, C, H * W).mean(axis=-1)
    heads = [pooled @ params[f"w_{n}"] + params[f"b_{n}"]
             for n in ("vfov", "pitch", "roll")]
    return heads, pooled


if __name__ == "__main__":
    key = jax.random.PRNGKey(0)
    k_feat, k_param = jax.random.split(key)

    # Small shapes consistent with the forward pass:
    # backbone feature map (B, C, H, W); heads map C -> num_out_channels.
    B, C, H, W = 2, 512, 8, 8
    NUM_OUT = 256

    feats = jax.random.normal(k_feat, (B, C, H, W), dtype=jnp.float32)
    params = init_params(k_param, C, NUM_OUT)
    fused = fuse_head_params(params)

    (vfov, pitch, roll), pooled = camera_regressor_head(feats, fused)
    jax.block_until_ready((vfov, pitch, roll, pooled))

    # Sanity check vs. plain-JAX f32 reference (bf16 weights => looser head tol).
    (rv, rp, rr), rpooled = _reference(feats, params)
    assert jnp.allclose(pooled, rpooled, atol=1e-5, rtol=1e-5)
    assert jnp.allclose(vfov, rv, atol=5e-3, rtol=5e-2)
    assert jnp.allclose(pitch, rp, atol=5e-3, rtol=5e-2)
    assert jnp.allclose(roll, rr, atol=5e-3, rtol=5e-2)

    print("KERNEL_OK")
</pallas_src>

<mosaic_0001>
module attributes {stable_mosaic.version = 11 : i64} {
  func.func @_cam_head_kernel(%arg0: i32, %arg1: memref<2x512x64xf32, #tpu.memory_space<vmem>>, %arg2: memref<512x768xbf16, #tpu.memory_space<vmem>>, %arg3: memref<1x768xf32, #tpu.memory_space<vmem>>, %arg4: memref<2x768xf32, #tpu.memory_space<vmem>>, %arg5: memref<2x512xf32, #tpu.memory_space<vmem>>) attributes {dimension_semantics = [#tpu.dimension_semantics<parallel>], iteration_bounds = array<i64: 1>, scalar_prefetch = 0 : i64, scratch_operands = 0 : i64, tpu.core_type = #tpu.core_type<tc>, window_params = [{transform_indices = @transform_0, window_bounds = array<i64: 2, 512, 64>}, {pipeline_mode = #tpu.pipeline_mode<synchronous>, transform_indices = @transform_1, window_bounds = array<i64: 512, 768>}, {pipeline_mode = #tpu.pipeline_mode<synchronous>, transform_indices = @transform_2, window_bounds = array<i64: 1, 768>}, {transform_indices = @transform_3, window_bounds = array<i64: 2, 768>}, {transform_indices = @transform_4, window_bounds = array<i64: 2, 512>}]} {
    %c0 = arith.constant 0 : index
    %c0_0 = arith.constant 0 : index
    %c0_1 = arith.constant 0 : index
    %0 = vector.load %arg1[%c0, %c0_0, %c0_1] : memref<2x512x64xf32, #tpu.memory_space<vmem>>, vector<2x512x64xf32>
    %cst = arith.constant dense<0.000000e+00> : vector<2x512xf32>
    %1 = vector.multi_reduction <add>, %0, %cst [2] : vector<2x512x64xf32> to vector<2x512xf32>
    %cst_2 = arith.constant 6.400000e+01 : f32
    %2 = vector.broadcast %cst_2 : f32 to vector<2x512xf32>
    %3 = arith.divf %1, %2 : vector<2x512xf32>
    %c0_3 = arith.constant 0 : index
    %c0_4 = arith.constant 0 : index
    %4 = vector.load %arg5[%c0_3, %c0_4] : memref<2x512xf32, #tpu.memory_space<vmem>>, vector<2x512xf32>
    tpu.vector_store %arg5[%c0_3, %c0_4], %3 {strides = array<i32>} : memref<2x512xf32, #tpu.memory_space<vmem>>, vector<2x512xf32>,
    %5 = arith.truncf %3 : vector<2x512xf32> to vector<2x512xbf16>
    %c0_5 = arith.constant 0 : index
    %c0_6 = arith.constant 0 : index
    %6 = vector.load %arg2[%c0_5, %c0_6] : memref<512x768xbf16, #tpu.memory_space<vmem>>, vector<512x768xbf16>
    %cst_7 = arith.constant dense<0.000000e+00> : vector<2x768xf32>
    %7 = tpu.matmul %5, %6, %cst_7 {dimension_numbers = #tpu.dot_dimension_numbers<[1], [0], [0], [1], [0, 0, 1, 1], [], []>} : vector<2x512xbf16>, vector<512x768xbf16>, vector<2x768xf32> -> vector<2x768xf32>
    %c0_8 = arith.constant 0 : index
    %c0_9 = arith.constant 0 : index
    %8 = vector.load %arg3[%c0_8, %c0_9] : memref<1x768xf32, #tpu.memory_space<vmem>>, vector<1x768xf32>
    %9 = vector.broadcast %8 : vector<1x768xf32> to vector<2x768xf32>
    %10 = arith.addf %7, %9 : vector<2x768xf32>
    %c0_10 = arith.constant 0 : index
    %c0_11 = arith.constant 0 : index
    %11 = vector.load %arg4[%c0_10, %c0_11] : memref<2x768xf32, #tpu.memory_space<vmem>>, vector<2x768xf32>
    tpu.vector_store %arg4[%c0_10, %c0_11], %10 {strides = array<i32>} : memref<2x768xf32, #tpu.memory_space<vmem>>, vector<2x768xf32>,
    return
  }
  func.func @transform_0(%arg0: i32) -> (i32, i32, i32) {
    %c0_i32 = arith.constant 0 : i32
    %c0_i32_0 = arith.constant 0 : i32
    %c0_i32_1 = arith.constant 0 : i32
    return %arg0, %c0_i32, %c0_i32_0 : i32, i32, i32
  }
  func.func @transform_1(%arg0: i32) -> (i32, i32) {
    %c0_i32 = arith.constant 0 : i32
    %c0_i32_0 = arith.constant 0 : i32
    %c0_i32_1 = arith.constant 0 : i32
    return %c0_i32, %c0_i32_0 : i32, i32
  }
  func.func @transform_2(%arg0: i32) -> (i32, i32) {
    %c0_i32 = arith.constant 0 : i32
    %c0_i32_0 = arith.constant 0 : i32
    %c0_i32_1 = arith.constant 0 : i32
    return %c0_i32, %c0_i32_0 : i32, i32
  }
  func.func @transform_3(%arg0: i32) -> (i32, i32) {
    %c0_i32 = arith.constant 0 : i32
    %c0_i32_0 = arith.constant 0 : i32
    return %arg0, %c0_i32 : i32, i32
  }
  func.func @transform_4(%arg0: i32) -> (i32, i32) {
    %c0_i32 = arith.constant 0 : i32
    %c0_i32_0 = arith.constant 0 : i32
    return %arg0, %c0_i32 : i32, i32
  }
}

</mosaic_0001>

<bundles_post_ra>
// kernel: tpu_custom_call.1
= control target key start
LH: loop header
LB: loop body
LE: loop exit
PB: predicated region body
PF: predicated region fallthrough
CT: control target
= control target key end

     0   :  { %10 = vsyncpa [#allocation3], 0  ;;  %s15050_s0 = inlined_call_operand.vmem [shape: f32[2,512,64], index: 0, kind: input, shape index: {}]   ;;  %s15051_s1 = inlined_call_operand.vmem [shape: bf16[512,768], index: 1, kind: input, shape index: {}]   ;;  %s15052_s2 = inlined_call_operand.hbm [shape: f32[1,768], index: 2, kind: input, shape index: {}]   ;;  %s15053_s3 = inlined_call_operand.hbm [shape: f32[2,768], index: 3, kind: output, shape index: {0}]   ;;  %s15054_s4 = inlined_call_operand.hbm [shape: f32[2,512], index: 4, kind: output, shape index: {1}]  }
   0x1   :  { %11 = vsyncpa [#allocation4], 0 }
   0x2   :  { %12 = vsyncpa [#allocation7], 0  ;;  %s10606_s15 = smov [#allocation2]   ;;  %s10534_s19 = scalar_lea.hbm %s15052_s2, 96 }
   0x3   :  { %s23_s16 = sshll.u32 %s10606_s15, 4  ;;  %p10535_p0 = scmp.ne.s32.totalorder %s15052_s2, %s10534_s19  ;;  %s24_s16 = int_to_ptr.vmem [resolvable:$true] %s23_s16 }
   0x4   :  { %p10538_p1 = scmp.lt.u32.totalorder %s10534_s19, %s15052_s2 }
   0x6   :  { %p10540_p2 = pnand %p10538_p1, %p10535_p0 }
   0x8   :  { %10543 = shalt.err (!%p10540_p2)
}
   0x9   :  { %s10544_s24 = scalar_lea.vmem %s24_s16, 96  ;;  %p10549_p4 = scmp.lt.s32.totalorder %s24_s16, %s24_s16 }
   0xa   :  { %p10545_p3 = scmp.ne.s32.totalorder %s24_s16, %s10544_s24  ;;  %p10550_p5 = scmp.lt.s32.totalorder %s10544_s24, %s10544_s24 }
   0xc   :  { %p10551_p6 = por %p10550_p5, %p10549_p4 }
   0xe   :  { %p10552_p7 = pnand %p10551_p6, %p10545_p3 }
  0x10   :  { %10555 = shalt.err (!%p10552_p7)
}
  0x11   :  { %26 = dma.hbm_to_vmem [thread:$0]  %s15052_s2, 96, %s24_s16, [#allocation3]  }
  0x12   :  { %10600 = dma.done.wait [#allocation3], 96  }
  0x13   :  { %10601 = vsyncadd [#allocation3], 4294967200  ;;  %vm158_vm0 = vcmask 523264   ;;  %v32_v0 = vld [vmem:[%s15050_s0 + $0x10] sm:$0xff]  ;;  %v30_v1 = vld [vmem:[%s15050_s0] sm:$0xff]  ;;  %vm6955_vm1 = vcmask 130112  }
  0x14   :  { %v33_v2 = vld [vmem:[%s15050_s0 + $0x18] sm:$0xff]  ;;  %v165_v3 = vsel %vm158_vm0, %v32_v0, 0.0  ;;  %v159_v4 = vsel %vm158_vm0, %v30_v1, 0.0  ;;  %v31_v5 = vld [vmem:[%s15050_s0 + $0x8] sm:$0xff]  ;;  %v34_v9 = vld [vmem:[%s15050_s0 + $0x20] sm:$0xff]  ;;  %vm6962_vm2 = vcmask 195712  }
  0x15   :  { %166 = vadd.xlane.f32.xlu1 %v165_v3  ;;  %160 = vadd.xlane.f32.xlu0 %v159_v4  ;;  %v168_v6 = vsel %vm158_vm0, %v33_v2, 0.0  ;;  %v162_v7 = vsel %vm158_vm0, %v31_v5, 0.0  ;;  %v35_v8 = vld [vmem:[%s15050_s0 + $0x28] sm:$0xff]  ;;  %v171_v11 = vsel %vm158_vm0, %v34_v9, 0.0  ;;  %v37_v12 = vld [vmem:[%s15050_s0 + $0x38] sm:$0xff]  ;;  %v36_v13 = vld [vmem:[%s15050_s0 + $0x30] sm:$0xff] }
  0x16   :  { %v174_v10 = vsel %vm158_vm0, %v35_v8, 0.0  ;;  %v180_v14 = vsel %vm158_vm0, %v37_v12, 0.0  ;;  %v177_v15 = vsel %vm158_vm0, %v36_v13, 0.0  ;;  %v39_v16 = vld [vmem:[%s15050_s0 + $0x48] sm:$0xff]  ;;  %v38_v17 = vld [vmem:[%s15050_s0 + $0x40] sm:$0xff]  ;;  %v41_v20 = vld [vmem:[%s15050_s0 + $0x58] sm:$0xff] }
  0x17   :  { %v186_v18 = vsel %vm158_vm0, %v39_v16, 0.0  ;;  %v183_v19 = vsel %vm158_vm0, %v38_v17, 0.0  ;;  %v40_v21 = vld [vmem:[%s15050_s0 + $0x50] sm:$0xff]  ;;  %v192_v22 = vsel %vm158_vm0, %v41_v20, 0.0  ;;  %v43_v24 = vld [vmem:[%s15050_s0 + $0x68] sm:$0xff]  ;;  %v42_v25 = vld [vmem:[%s15050_s0 + $0x60] sm:$0xff] }
  0x18   :  { %v189_v23 = vsel %vm158_vm0, %v40_v21, 0.0  ;;  %v198_v26 = vsel %vm158_vm0, %v43_v24, 0.0  ;;  %v195_v27 = vsel %vm158_vm0, %v42_v25, 0.0  ;;  %v45_v28 = vld [vmem:[%s15050_s0 + $0x78] sm:$0xff]  ;;  %v44_v29 = vld [vmem:[%s15050_s0 + $0x70] sm:$0xff]  ;;  %v47_v30 = vld [vmem:[%s15050_s0 + $0x88] sm:$0xff] }
  0x19   :  { %169 = vadd.xlane.f32.xlu1 %v168_v6  ;;  %163 = vadd.xlane.f32.xlu0 %v162_v7  ;;  %v204_v31 = vsel %vm158_vm0, %v45_v28, 0.0  ;;  %v201_v32 = vsel %vm158_vm0, %v44_v29, 0.0  ;;  %v46_v33 = vld [vmem:[%s15050_s0 + $0x80] sm:$0xff]  ;;  %v210_v34 = vsel %vm158_vm0, %v47_v30, 0.0  ;;  %v49_v36 = vld [vmem:[%s15050_s0 + $0x98] sm:$0xff]  ;;  %v48_v37 = vld [vmem:[%s15050_s0 + $0x90] sm:$0xff] }
  0x1a   :  { %v207_v35 = vsel %vm158_vm0, %v46_v33, 0.0  ;;  %v51_v38 = vld [vmem:[%s15050_s0 + $0xa8] sm:$0xff]  ;;  %v216_v39 = vsel %vm158_vm0, %v49_v36, 0.0  ;;  %v213_v40 = vsel %vm158_vm0, %v48_v37, 0.0  ;;  %v50_v41 = vld [vmem:[%s15050_s0 + $0xa0] sm:$0xff]  ;;  %v53_v42 = vld [vmem:[%s15050_s0 + $0xb8] sm:$0xff] }
  0x1b   :  { %v52_v43 = vld [vmem:[%s15050_s0 + $0xb0] sm:$0xff]  ;;  %v222_v44 = vsel %vm158_vm0, %v51_v38, 0.0  ;;  %v219_v45 = vsel %vm158_vm0, %v50_v41, 0.0  ;;  %v55_v46 = vld [vmem:[%s15050_s0 + $0xc8] sm:$0xff]  ;;  %v54_v47 = vld [vmem:[%s15050_s0 + $0xc0] sm:$0xff]  ;;  %v228_v48 = vsel %vm158_vm0, %v53_v42, 0.0 }
  0x1c   :  { %v225_v49 = vsel %vm158_vm0, %v52_v43, 0.0  ;;  %v57_v50 = vld [vmem:[%s15050_s0 + $0xd8] sm:$0xff]  ;;  %v56_v51 = vld [vmem:[%s15050_s0 + $0xd0] sm:$0xff]  ;;  %v234_v52 = vsel %vm158_vm0, %v55_v46, 0.0  ;;  %v231_v53 = vsel %vm158_vm0, %v54_v47, 0.0  ;;  %v59_v54 = vld [vmem:[%s15050_s0 + $0xe8] sm:$0xff] }
  0x1d   :  { %175 = vadd.xlane.f32.xlu1 %v174_v10  ;;  %172 = vadd.xlane.f32.xlu0 %v171_v11  ;;  %v58_v55 = vld [vmem:[%s15050_s0 + $0xe0] sm:$0xff]  ;;  %v240_v56 = vsel %vm158_vm0, %v57_v50, 0.0  ;;  %v237_v57 = vsel %vm158_vm0, %v56_v51, 0.0  ;;  %v61_v58 = vld [vmem:[%s15050_s0 + $0xf8] sm:$0xff]  ;;  %v60_v59 = vld [vmem:[%s15050_s0 + $0xf0] sm:$0xff]  ;;  %v246_v60 = vsel %vm158_vm0, %v59_v54, 0.0 }
  0x1e   :  { %v243_v61 = vsel %vm158_vm0, %v58_v55, 0.0  ;;  %v63_v62 = vld [vmem:[%s15050_s0 + $0x108] sm:$0xff]  ;;  %v62_v63 = vld [vmem:[%s15050_s0 + $0x100] sm:$0xff]  ;;  %v252_v0 = vsel %vm158_vm0, %v61_v58, 0.0  ;;  %v249_v1 = vsel %vm158_vm0, %v60_v59, 0.0  ;;  %v65_v2 = vld [vmem:[%s15050_s0 + $0x118] sm:$0xff] }
  0x1f   :  { %v64_v3 = vld [vmem:[%s15050_s0 + $0x110] sm:$0xff]  ;;  %v258_v4 = vsel %vm158_vm0, %v63_v62, 0.0  ;;  %v255_v5 = vsel %vm158_vm0, %v62_v63, 0.0  ;;  %v67_v6 = vld [vmem:[%s15050_s0 + $0x128] sm:$0xff]  ;;  %v66_v7 = vld [vmem:[%s15050_s0 + $0x120] sm:$0xff]  ;;  %v264_v8 = vsel %vm158_vm0, %v65_v2, 0.0 }
  0x20   :  { %v261_v9 = vsel %vm158_vm0, %v64_v3, 0.0  ;;  %v69_v10 = vld [vmem:[%s15050_s0 + $0x138] sm:$0xff]  ;;  %v68_v11 = vld [vmem:[%s15050_s0 + $0x130] sm:$0xff]  ;;  %v270_v12 = vsel %vm158_vm0, %v67_v6, 0.0  ;;  %v267_v13 = vsel %vm158_vm0, %v66_v7, 0.0  ;;  %v79_v30 = vld [vmem:[%s15050_s0 + $0x188] sm:$0xff] }
  0x21   :  { %181 = vadd.xlane.f32.xlu1 %v180_v14  ;;  %178 = vadd.xlane.f32.xlu0 %v177_v15  ;;  %v71_v14 = vld [vmem:[%s15050_s0 + $0x148] sm:$0xff]  ;;  %v70_v15 = vld [vmem:[%s15050_s0 + $0x140] sm:$0xff]  ;;  %v276_v16 = vsel %vm158_vm0, %v69_v10, 0.0  ;;  %v273_v17 = vsel %vm158_vm0, %v68_v11, 0.0  ;;  %v306_v36 = vsel %vm158_vm0, %v79_v30, 0.0  ;;  %v85_v42 = vld [vmem:[%s15050_s0 + $0x1b8] sm:$0xff] }
  0x22   :  { %v282_v20 = vsel %vm158_vm0, %v71_v14, 0.0  ;;  %v279_v21 = vsel %vm158_vm0, %v70_v15, 0.0  ;;  %v83_v38 = vld [vmem:[%s15050_s0 + $0x1a8] sm:$0xff]  ;;  %v84_v43 = vld [vmem:[%s15050_s0 + $0x1b0] sm:$0xff]  ;;  %v324_v46 = vsel %vm158_vm0, %v85_v42, 0.0  ;;  %v90_v55 = vld [vmem:[%s15050_s0 + $0x1e0] sm:$0xff] }
  0x23   :  { %v321_v47 = vsel %vm158_vm0, %v84_v43, 0.0  ;;  %v91_v54 = vld [vmem:[%s15050_s0 + $0x1e8] sm:$0xff]  ;;  %v93_v58 = vld [vmem:[%s15050_s0 + $0x1f8] sm:$0xff]  ;;  %v92_v59 = vld [vmem:[%s15050_s0 + $0x1f0] sm:$0xff]  ;;  %v339_v2 = vsel %vm158_vm0, %v90_v55, 0.0  ;;  %vm6969_vm3 = vcmask 261312  }
  0x24   :  { %v97_v62 = vld [vmem:[%s15050_s0 + $0x218] sm:$0xff]  ;;  %v96_v63 = vld [vmem:[%s15050_s0 + $0x210] sm:$0xff]  ;;  %v99_v3 = vld [vmem:[%s15050_s0 + $0x228] sm:$0xff]  ;;  %vm6976_vm4 = vcmask 326912   ;;  %vm6983_vm5 = vcmask 392512   ;;  %vm6990_vm6 = vcmask 458112  }
  0x25   :  { %187 = vadd.xlane.f32.xlu1 %v186_v18  ;;  %184 = vadd.xlane.f32.xlu0 %v183_v19  ;;  %v73_v18 = vld [vmem:[%s15050_s0 + $0x158] sm:$0xff]  ;;  %v72_v19 = vld [vmem:[%s15050_s0 + $0x150] sm:$0xff]  ;;  %v98_v6 = vld [vmem:[%s15050_s0 + $0x220] sm:$0xff]  ;;  %v10943_v14 = vsel %vm158_vm0, %v99_v3, 0.0  ;;  %vm6997_vm7 = vcmask 523712   ;;  %vm7004_vm8 = vcmask 589312  }
  0x26   :  { %v288_v24 = vsel %vm158_vm0, %v73_v18, 0.0  ;;  %v285_v25 = vsel %vm158_vm0, %v72_v19, 0.0  ;;  %v101_v7 = vld [vmem:[%s15050_s0 + $0x238] sm:$0xff]  ;;  %v103_v15 = vld [vmem:[%s15050_s0 + $0x248] sm:$0xff]  ;;  %v10955_v18 = vsel %vm158_vm0, %v98_v6, 0.0  ;;  %v108_v43 = vld [vmem:[%s15050_s0 + $0x270] sm:$0xff] }
  0x27   :  { %v10958_v19 = vsel %vm158_vm0, %v101_v7, 0.0  ;;  %v109_v42 = vld [vmem:[%s15050_s0 + $0x278] sm:$0xff]  ;;  %v11033_v55 = vsel %vm158_vm0, %v108_v43, 0.0  ;;  %v116_v3 = vld [vmem:[%s15050_s0 + $0x2b0] sm:$0xff]  ;;  %vm7011_vm9 = vcmask 654912   ;;  %vm7018_vm10 = vcmask 720512  }
  0x28   :  { %v11131_v43 = vsel %vm158_vm0, %v116_v3, 0.0  ;;  %vm7025_vm11 = vcmask 786112   ;;  %vm7032_vm12 = vcmask 851712   ;;  %vm7039_vm13 = vcmask 917312  }
  0x29   :  { %193 = vadd.xlane.f32.xlu1 %v192_v22  ;;  %190 = vadd.xlane.f32.xlu0 %v189_v23  ;;  %v75_v22 = vld [vmem:[%s15050_s0 + $0x168] sm:$0xff]  ;;  %v74_v23 = vld [vmem:[%s15050_s0 + $0x160] sm:$0xff]  ;;  %vm7046_vm14 = vcmask 982912   ;;  %vm7053_vm15 = vcmask 1048512  }
  0x2a   :  { %v294_v28 = vsel %vm158_vm0, %v75_v22, 0.0  ;;  %v291_v29 = vsel %vm158_vm0, %v74_v23, 0.0 }
  0x2d   :  { %199 = vadd.xlane.f32.xlu1 %v198_v26  ;;  %196 = vadd.xlane.f32.xlu0 %v195_v27  ;;  %v77_v26 = vld [vmem:[%s15050_s0 + $0x178] sm:$0xff]  ;;  %v76_v27 = vld [vmem:[%s15050_s0 + $0x170] sm:$0xff] }
  0x2e   :  { %v297_v33 = vsel %vm158_vm0, %v76_v27, 0.0  ;;  %v106_v27 = vld [vmem:[%s15050_s0 + $0x260] sm:$0xff] }
  0x31   :  { %205 = vadd.xlane.f32.xlu1 %v204_v31  ;;  %202 = vadd.xlane.f32.xlu0 %v201_v32  ;;  %v78_v31 = vld [vmem:[%s15050_s0 + $0x180] sm:$0xff]  ;;  %v300_v32 = vsel %vm158_vm0, %v77_v26, 0.0  ;;  %v107_v26 = vld [vmem:[%s15050_s0 + $0x268] sm:$0xff] }
  0x32   :  { %v303_v37 = vsel %vm158_vm0, %v78_v31, 0.0  ;;  %v10607_v31 = vmov 269488144  }
  0x35   :  { %211 = vadd.xlane.f32.xlu1 %v210_v34  ;;  %208 = vadd.xlane.f32.xlu0 %v207_v35  ;;  %v81_v34 = vld [vmem:[%s15050_s0 + $0x198] sm:$0xff]  ;;  %v80_v35 = vld [vmem:[%s15050_s0 + $0x190] sm:$0xff] }
  0x36   :  { %v309_v41 = vsel %vm158_vm0, %v80_v35, 0.0 }
  0x39   :  { %217 = vadd.xlane.f32.xlu1 %v216_v39  ;;  %214 = vadd.xlane.f32.xlu0 %v213_v40  ;;  %v82_v39 = vld [vmem:[%s15050_s0 + $0x1a0] sm:$0xff]  ;;  %v312_v40 = vsel %vm158_vm0, %v81_v34, 0.0 }
  0x3d   :  { %223 = vadd.xlane.f32.xlu1 %v222_v44  ;;  %220 = vadd.xlane.f32.xlu0 %v219_v45  ;;  %v318_v44 = vsel %vm158_vm0, %v83_v38, 0.0  ;;  %v315_v45 = vsel %vm158_vm0, %v82_v39, 0.0  ;;  %v10996_v39 = vsel %vm158_vm0, %v107_v26, 0.0  ;;  %v122_v26 = vld [vmem:[%s15050_s0 + $0x2e0] sm:$0xff] }
  0x41   :  { %229 = vadd.xlane.f32.xlu1 %v228_v48  ;;  %226 = vadd.xlane.f32.xlu0 %v225_v49  ;;  %v87_v48 = vld [vmem:[%s15050_s0 + $0x1c8] sm:$0xff]  ;;  %v86_v49 = vld [vmem:[%s15050_s0 + $0x1c0] sm:$0xff] }
  0x42   :  { %v330_v50 = vsel %vm158_vm0, %v87_v48, 0.0  ;;  %v327_v51 = vsel %vm158_vm0, %v86_v49, 0.0  ;;  %v111_v48 = vld [vmem:[%s15050_s0 + $0x288] sm:$0xff] }
  0x45   :  { %235 = vadd.xlane.f32.xlu1 %v234_v52  ;;  %232 = vadd.xlane.f32.xlu0 %v231_v53  ;;  %v89_v52 = vld [vmem:[%s15050_s0 + $0x1d8] sm:$0xff]  ;;  %v88_v53 = vld [vmem:[%s15050_s0 + $0x1d0] sm:$0xff] }
  0x49   :  { %241 = vadd.xlane.f32.xlu1 %v240_v56  ;;  %238 = vadd.xlane.f32.xlu0 %v237_v57  ;;  %v336_v56 = vsel %vm158_vm0, %v89_v52, 0.0  ;;  %v333_v57 = vsel %vm158_vm0, %v88_v53, 0.0 }
  0x4d   :  { %247 = vadd.xlane.f32.xlu1 %v246_v60  ;;  %244 = vadd.xlane.f32.xlu0 %v243_v61  ;;  %v95_v60 = vld [vmem:[%s15050_s0 + $0x208] sm:$0xff]  ;;  %v94_v61 = vld [vmem:[%s15050_s0 + $0x200] sm:$0xff] }
  0x4e   :  { %v354_v10 = vsel %vm158_vm0, %v95_v60, 0.0  ;;  %v351_v11 = vsel %vm158_vm0, %v94_v61, 0.0  ;;  %v113_v60 = vld [vmem:[%s15050_s0 + $0x298] sm:$0xff]  ;;  %v112_v61 = vld [vmem:[%s15050_s0 + $0x290] sm:$0xff] }
  0x51   :  { %253 = vadd.xlane.f32.xlu1 %v252_v0  ;;  %250 = vadd.xlane.f32.xlu0 %v249_v1  ;;  %v803_v0 = vlaneseq  ;;  %v342_v1 = vsel %vm158_vm0, %v91_v54, 0.0  ;;  %v11030_v54 = vsel %vm158_vm0, %v109_v42, 0.0 }
  0x53   :  { %v10966_v22 = vshrl.u32 %v803_v0, 7 }
  0x55   :  { %259 = vadd.xlane.f32.xlu1 %v258_v4  ;;  %256 = vadd.xlane.f32.xlu0 %v255_v5  ;;  %v348_v4 = vsel %vm158_vm0, %v93_v58, 0.0  ;;  %v345_v5 = vsel %vm158_vm0, %v92_v59, 0.0  ;;  %15270 = vst [vmem:[#allocation11_spill] sm:$0xff] %v10966_v22  ;;  %v11042_v59 = vsel %vm158_vm0, %v111_v48, 0.0 }
  0x59   :  { %265 = vadd.xlane.f32.xlu1 %v264_v8  ;;  %262 = vadd.xlane.f32.xlu0 %v261_v9  ;;  %v100_v8 = vld [vmem:[%s15050_s0 + $0x230] sm:$0xff]  ;;  %v10932_v9 = vand.u32 127, %v803_v0 }
  0x5b   :  { %v6957_v23 = vadd.s32 4294967280, %v10932_v9  ;;  %v6971_v35 = vadd.s32 4294967264, %v10932_v9  ;;  %v6978_v38 = vadd.s32 4294967256, %v10932_v9  ;;  %v6999_v49 = vadd.s32 4294967232, %v10932_v9 }
  0x5d   :  { %271 = vadd.xlane.f32.xlu1 %v270_v12  ;;  %268 = vadd.xlane.f32.xlu0 %v267_v13  ;;  %v10937_v12 = vsel %vm158_vm0, %v97_v62, 0.0  ;;  %v10940_v13 = vsel %vm158_vm0, %v96_v63, 0.0  ;;  %v11027_v53 = vsub.s32 %v6971_v35, %v10966_v22  ;;  %v115_v62 = vld [vmem:[%s15050_s0 + $0x2a8] sm:$0xff]  ;;  %v11071_v6 = vsub.s32 %v6999_v49, %v10966_v22  ;;  %v126_v49 = vld [vmem:[%s15050_s0 + $0x300] sm:$0xff] }
  0x5f   :  { %15274 = vst [vmem:[#allocation15_spill] sm:$0xff] %v11027_v53 }
  0x61   :  { %277 = vadd.xlane.f32.xlu1 %v276_v16  ;;  %274 = vadd.xlane.f32.xlu0 %v273_v17  ;;  %v102_v16 = vld [vmem:[%s15050_s0 + $0x240] sm:$0xff]  ;;  %v105_v17 = vld [vmem:[%s15050_s0 + $0x258] sm:$0xff] }
  0x62   :  { %v10984_v30 = vsel %vm158_vm0, %v105_v17, 0.0  ;;  %v7020_v17 = vadd.s32 4294967208, %v10932_v9 }
  0x65   :  { %283 = vadd.xlane.f32.xlu1 %v282_v20  ;;  %280 = vadd.xlane.f32.xlu0 %v279_v21  ;;  %v10961_v20 = vsel %vm158_vm0, %v100_v8, 0.0  ;;  %v104_v21 = vld [vmem:[%s15050_s0 + $0x250] sm:$0xff]  ;;  %v7013_v8 = vadd.s32 4294967216, %v10932_v9 }
  0x66   :  { %v10991_v34 = vsel %vm158_vm0, %v104_v21, 0.0  ;;  %v11091_v21 = vsel %vm158_vm0, %v113_v60, 0.0 }
  0x67   :  { %v11170_v3 = vsub.s32 %v7013_v8, %v10966_v22  ;;  %v134_v8 = vld [vmem:[%s15050_s0 + $0x340] sm:$0xff] }
  0x69   :  { %289 = vadd.xlane.f32.xlu1 %v288_v24  ;;  %286 = vadd.xlane.f32.xlu0 %v285_v25  ;;  %v6964_v24 = vadd.s32 4294967272, %v10932_v9  ;;  %v6950_v25 = vadd.s32 4294967288, %v10932_v9  ;;  %15280 = vst [vmem:[#allocation21_spill] sm:$0xff] %v11170_v3 }
  0x6d   :  { %295 = vadd.xlane.f32.xlu1 %v294_v28  ;;  %292 = vadd.xlane.f32.xlu0 %v291_v29  ;;  %v10978_v28 = vsel %vm158_vm0, %v103_v15, 0.0  ;;  %v10981_v29 = vsel %vm158_vm0, %v102_v16, 0.0  ;;  %v121_v15 = vld [vmem:[%s15050_s0 + $0x2d8] sm:$0xff] }
  0x71   :  { %301 = vadd.xlane.f32.xlu1 %v300_v32  ;;  %298 = vadd.xlane.f32.xlu0 %v297_v33  ;;  %v801_v32 = vunpack.c.l.s4 %v10607_v31  ;;  %v10988_v33 = vsub.s32 %v10932_v9, %v10966_v22  ;;  %v11109_v31 = vsel %vm158_vm0, %v115_v62, 0.0  ;;  %v130_v62 = vld [vmem:[%s15050_s0 + $0x320] sm:$0xff] }
  0x73   :  { %15271 = vst [vmem:[#allocation12_spill] sm:$0xff] %v10988_v33  ;;  %v802_v52 = vunpack.c.0.s8 %v801_v32 }
  0x75   :  { %307 = vadd.xlane.f32.xlu1 %v306_v36  ;;  %304 = vadd.xlane.f32.xlu0 %v303_v37  ;;  %v10608_v36 = vmov 842150450   ;;  %v11087_v16 = vsub.s32 %v802_v52, %v10966_v22  ;;  %v11151_v52 = vsel %vm158_vm0, %v121_v15, 0.0  ;;  %v132_v15 = vld [vmem:[%s15050_s0 + $0x330] sm:$0xff] }
  0x76   :  { %v808_v37 = vunpack.c.l.s4 %v10608_v36  ;;  %v125_v36 = vld [vmem:[%s15050_s0 + $0x2f8] sm:$0xff] }
  0x79   :  { %313 = vadd.xlane.f32.xlu1 %v312_v40  ;;  %310 = vadd.xlane.f32.xlu0 %v309_v41  ;;  %v10999_v40 = vsel %vm158_vm0, %v106_v27, 0.0  ;;  %v6985_v41 = vadd.s32 4294967248, %v10932_v9 }
  0x7b   :  { %v11039_v58 = vsub.s32 %v6985_v41, %v10966_v22  ;;  %v10610_v41 = vmov 1987475062  }
  0x7c   :  { %v11126_v42 = vunpack.c.l.s4 %v10610_v41  ;;  %v139_v41 = vld [vmem:[%s15050_s0 + $0x368] sm:$0xff] }
  0x7d   :  { %319 = vadd.xlane.f32.xlu1 %v318_v44  ;;  %316 = vadd.xlane.f32.xlu0 %v315_v45  ;;  %v11009_v44 = vsub.s32 %v6957_v23, %v10966_v22  ;;  %v11012_v45 = vsub.s32 %v6964_v24, %v10966_v22  ;;  %15276 = vst [vmem:[#allocation17_spill] sm:$0xff] %v11039_v58  ;;  %v11094_v23 = vsel %vm158_vm0, %v112_v61, 0.0  ;;  %v120_v24 = vld [vmem:[%s15050_s0 + $0x2d0] sm:$0xff]  ;;  %v131_v61 = vld [vmem:[%s15050_s0 + $0x328] sm:$0xff] }
  0x7f   :  { %15272 = vst [vmem:[#allocation13_spill] sm:$0xff] %v11009_v44 }
  0x81   :  { %325 = vadd.xlane.f32.xlu1 %v324_v46  ;;  %322 = vadd.xlane.f32.xlu0 %v321_v47  ;;  %v11015_v46 = vsub.s32 %v6950_v25, %v10966_v22  ;;  %v6992_v47 = vadd.s32 4294967240, %v10932_v9  ;;  %v123_v25 = vld [vmem:[%s15050_s0 + $0x2e8] sm:$0xff] }
  0x82   :  { %v11157_v60 = vsel %vm158_vm0, %v123_v25, 0.0  ;;  %v11194_v25 = vsel %vm158_vm0, %v126_v49, 0.0 }
  0x83   :  { %15273 = vst [vmem:[#allocation14_spill] sm:$0xff] %v11015_v46  ;;  %v11054_v63 = vsub.s32 %v6992_v47, %v10966_v22  ;;  %15279 = vst [vmem:[#allocation20_spill] sm:$0xff] %v11157_v60 }
  0x84   :  { %15285 = vst [vmem:[#allocation26_spill] sm:$0xff] %v11194_v25  ;;  %v157_v25 = vld [vmem:[%s15050_s0 + $0x3f8] sm:$0xff] }
  0x85   :  { %331 = vadd.xlane.f32.xlu1 %v330_v50  ;;  %328 = vadd.xlane.f32.xlu0 %v327_v51  ;;  %v7006_v50 = vadd.s32 4294967224, %v10932_v9  ;;  %v110_v51 = vld [vmem:[%s15050_s0 + $0x280] sm:$0xff] }
  0x86   :  { %v11057_v0 = vsel %vm158_vm0, %v110_v51, 0.0 }
  0x87   :  { %v11074_v7 = vsub.s32 %v7006_v50, %v10966_v22  ;;  %v129_v50 = vld [vmem:[%s15050_s0 + $0x318] sm:$0xff] }
  0x89   :  { %337 = vadd.xlane.f32.xlu1 %v336_v56  ;;  %334 = vadd.xlane.f32.xlu0 %v333_v57  ;;  %v809_v56 = vunpack.c.0.s8 %v808_v37  ;;  %v11036_v57 = vsub.s32 %v6978_v38, %v10966_v22  ;;  %15277 = vst [vmem:[#allocation18_spill] sm:$0xff] %v11074_v7  ;;  %v124_v37 = vld [vmem:[%s15050_s0 + $0x2f0] sm:$0xff]  ;;  %v127_v38 = vld [vmem:[%s15050_s0 + $0x308] sm:$0xff] }
  0x8b   :  { %15275 = vst [vmem:[#allocation16_spill] sm:$0xff] %v11036_v57  ;;  %v11106_v27 = vsub.s32 %v809_v56, %v10966_v22  ;;  %v11154_v56 = vsel %vm158_vm0, %v120_v24, 0.0  ;;  %v11191_v24 = vsel %vm158_vm0, %v127_v38, 0.0  ;;  %v823_v38 = vunpack.c.0.s8 %v11126_v42  ;;  %v141_v42 = vld [vmem:[%s15050_s0 + $0x378] sm:$0xff] }
  0x8c   :  { %15278 = vst [vmem:[#allocation19_spill] sm:$0xff] %v11154_v56  ;;  %15284 = vst [vmem:[#allocation25_spill] sm:$0xff] %v11191_v24 }
  0x8d   :  { %343 = vadd.xlane.f32.xlu1 %v342_v1  ;;  %340 = vadd.xlane.f32.xlu0 %v339_v2  ;;  %v114_v1 = vld [vmem:[%s15050_s0 + $0x2a0] sm:$0xff]  ;;  %v117_v2 = vld [vmem:[%s15050_s0 + $0x2b8] sm:$0xff] }
  0x8e   :  { %v11112_v32 = vsel %vm158_vm0, %v114_v1, 0.0  ;;  %v11115_v35 = vsel %vm158_vm0, %v117_v2, 0.0  ;;  %v133_v1 = vld [vmem:[%s15050_s0 + $0x338] sm:$0xff] }
  0x91   :  { %349 = vadd.xlane.f32.xlu1 %v348_v4  ;;  %346 = vadd.xlane.f32.xlu0 %v345_v5  ;;  %v10609_v4 = vmov 1414812756  }
  0x92   :  { %v11068_v5 = vunpack.c.l.s4 %v10609_v4  ;;  %v11173_v4 = vsel %vm158_vm0, %v122_v26, 0.0  ;;  %v11197_v26 = vsel %vm158_vm0, %v129_v50, 0.0  ;;  %v11215_v50 = vsel %vm158_vm0, %v131_v61, 0.0 }
  0x93   :  { %15281 = vst [vmem:[#allocation22_spill] sm:$0xff] %v11173_v4  ;;  %15286 = vst [vmem:[#allocation27_spill] sm:$0xff] %v11197_v26  ;;  %v138_v26 = vld [vmem:[%s15050_s0 + $0x360] sm:$0xff]  ;;  %v11234_v61 = vsel %vm158_vm0, %v132_v15, 0.0 }
  0x94   :  { %v816_v2 = vunpack.c.0.s8 %v11068_v5  ;;  %v135_v5 = vld [vmem:[%s15050_s0 + $0x348] sm:$0xff]  ;;  %15288 = vst [vmem:[#allocation29_spill] sm:$0xff] %v11215_v50  ;;  %15291 = vst [vmem:[#allocation32_spill] sm:$0xff] %v11234_v61  ;;  %v10612_v61 = vmov 0  }
  0x95   :  { %355 = vadd.xlane.f32.xlu1 %v354_v10  ;;  %352 = vadd.xlane.f32.xlu0 %v351_v11  ;;  %v119_v10 = vld [vmem:[%s15050_s0 + $0x2c8] sm:$0xff]  ;;  %v118_v11 = vld [vmem:[%s15050_s0 + $0x2c0] sm:$0xff] }
  0x96   :  { %v11134_v47 = vsel %vm158_vm0, %v119_v10, 0.0  ;;  %v11137_v48 = vsel %vm158_vm0, %v118_v11, 0.0  ;;  %v11176_v10 = vsel %vm158_vm0, %v125_v36, 0.0  ;;  %v11179_v11 = vsel %vm158_vm0, %v124_v37, 0.0  ;;  %v137_v36 = vld [vmem:[%s15050_s0 + $0x358] sm:$0xff]  ;;  %v136_v37 = vld [vmem:[%s15050_s0 + $0x350] sm:$0xff]  ;;  %10245 = vset.pattern.permute.xlu1 %v10612_v61  ;;  %10244 = vset.pattern.permute.xlu0 %v10612_v61 }
  0x97   :  { %15282 = vst [vmem:[#allocation23_spill] sm:$0xff] %v11176_v10  ;;  %15283 = vst [vmem:[#allocation24_spill] sm:$0xff] %v11179_v11  ;;  %v143_v50 = vld [vmem:[%s15050_s0 + $0x388] sm:$0xff]  ;;  %v11252_v15 = vsel %vm158_vm0, %v137_v36, 0.0  ;;  %v11270_v36 = vsel %vm158_vm0, %v138_v26, 0.0  ;;  %v11288_v26 = vsub.s32 %v816_v2, %v10966_v22 }
  0x98   :  { %15295 = vst [vmem:[#allocation36_spill] sm:$0xff] %v11252_v15  ;;  %15298 = vst [vmem:[#allocation39_spill] sm:$0xff] %v11270_v36  ;;  %v148_v15 = vld [vmem:[%s15050_s0 + $0x3b0] sm:$0xff]  ;;  %v155_v36 = vld [vmem:[%s15050_s0 + $0x3e8] sm:$0xff] }
  0x99   :  { %361 = vadd.xlane.f32.xlu1 %v10937_v12  ;;  %358 = vadd.xlane.f32.xlu0 %v10940_v13  ;;  %v128_v12 = vld [vmem:[%s15050_s0 + $0x310] sm:$0xff]  ;;  %v10611_v13 = vmov 1983009808  }
  0x9a   :  { %v11148_v51 = vunpack.c.l.s4 %v10611_v13  ;;  %v11212_v49 = vsel %vm158_vm0, %v128_v12, 0.0  ;;  %v11218_v13 = vsel %vm158_vm0, %v130_v62, 0.0  ;;  %v11231_v12 = vsel %vm158_vm0, %v133_v1, 0.0 }
  0x9b   :  { %15287 = vst [vmem:[#allocation28_spill] sm:$0xff] %v11212_v49  ;;  %15289 = vst [vmem:[#allocation30_spill] sm:$0xff] %v11218_v13  ;;  %v11237_v62 = vsel %vm158_vm0, %v135_v5, 0.0  ;;  %v11240_v13 = vsel %vm158_vm0, %v134_v8, 0.0  ;;  %v11249_v1 = vsub.s32 %v7020_v17, %v10966_v22  ;;  %v11255_v5 = vsel %vm158_vm0, %v136_v37, 0.0  ;;  %v147_v17 = vld [vmem:[%s15050_s0 + $0x3a8] sm:$0xff] }
  0x9c   :  { %15290 = vst [vmem:[#allocation31_spill] sm:$0xff] %v11231_v12  ;;  %15292 = vst [vmem:[#allocation33_spill] sm:$0xff] %v11237_v62  ;;  %v11258_v8 = vsel %vm158_vm0, %v139_v41, 0.0  ;;  %v144_v62 = vld [vmem:[%s15050_s0 + $0x390] sm:$0xff]  ;;  %v11273_v37 = vsel %vm158_vm0, %v141_v42, 0.0  ;;  %v11293_v42 = vsel %vm158_vm0, %v143_v50, 0.0 }
  0x9d   :  { %367 = vadd.xlane.f32.xlu1 %v10943_v14  ;;  %364 = vadd.xlane.f32.xlu0 %v10955_v18  ;;  %v140_v14 = vld [vmem:[%s15050_s0 + $0x370] sm:$0xff]  ;;  %v4388_v18 = vunpack.c.0.s8 %v11148_v51  ;;  %15293 = vst [vmem:[#allocation34_spill] sm:$0xff] %v11240_v13  ;;  %v142_v51 = vld [vmem:[%s15050_s0 + $0x380] sm:$0xff]  ;;  %15294 = vst [vmem:[#allocation35_spill] sm:$0xff] %v11249_v1 }
  0x9e   :  { %15296 = vst [vmem:[#allocation37_spill] sm:$0xff] %v11255_v5  ;;  %15297 = vst [vmem:[#allocation38_spill] sm:$0xff] %v11258_v8  ;;  %v145_v13 = vld [vmem:[%s15050_s0 + $0x398] sm:$0xff]  ;;  %v11276_v41 = vsel %vm158_vm0, %v140_v14, 0.0  ;;  %v146_v8 = vld [vmem:[%s15050_s0 + $0x3a0] sm:$0xff]  ;;  %v11296_v14 = vsel %vm158_vm0, %v142_v51, 0.0 }
  0x9f   :  { %15299 = vst [vmem:[#allocation40_spill] sm:$0xff] %v11273_v37  ;;  %15300 = vst [vmem:[#allocation41_spill] sm:$0xff] %v11276_v41  ;;  %v149_v5 = vld [vmem:[%s15050_s0 + $0x3b8] sm:$0xff]  ;;  %v151_v41 = vld [vmem:[%s15050_s0 + $0x3c8] sm:$0xff]  ;;  %v11311_v51 = vsel %vm158_vm0, %v145_v13, 0.0  ;;  %v11326_v13 = vsub.s32 %v4388_v18, %v10966_v22  ;;  %v11335_v12 = vsel %vm158_vm0, %v146_v8, 0.0 }
  0xa0   :  { %15301 = vst [vmem:[#allocation42_spill] sm:$0xff] %v11293_v42  ;;  %15302 = vst [vmem:[#allocation43_spill] sm:$0xff] %v11296_v14  ;;  %v150_v37 = vld [vmem:[%s15050_s0 + $0x3c0] sm:$0xff]  ;;  %v11314_v14 = vsel %vm158_vm0, %v144_v62, 0.0  ;;  %v152_v42 = vld [vmem:[%s15050_s0 + $0x3d0] sm:$0xff]  ;;  %v7027_v62 = vadd.s32 4294967200, %v10932_v9 }
  0xa1   :  { %373 = vadd.xlane.f32.xlu1 %v10958_v19  ;;  %370 = vadd.xlane.f32.xlu0 %v10961_v20  ;;  %v153_v19 = vld [vmem:[%s15050_s0 + $0x3d8] sm:$0xff]  ;;  %v11308_v20 = vsub.s32 %v823_v38, %v10966_v22  ;;  %15303 = vst [vmem:[#allocation44_spill] sm:$0xff] %v11311_v51  ;;  %15304 = vst [vmem:[#allocation45_spill] sm:$0xff] %v11314_v14  ;;  %v154_v38 = vld [vmem:[%s15050_s0 + $0x3e0] sm:$0xff]  ;;  %v11332_v51 = vsel %vm158_vm0, %v147_v17, 0.0  ;;  %v11338_v49 = vsel %vm158_vm0, %v149_v5, 0.0 }
  0xa2   :  { %v167_v2 = vpop.xlane.xlu1 %166  ;;  %v161_v50 = vpop.xlane.xlu0 %160  ;;  %15305 = vst [vmem:[#allocation46_spill] sm:$0xff] %v11332_v51  ;;  %15306 = vst [vmem:[#allocation47_spill] sm:$0xff] %v11335_v12  ;;  %v156_v18 = vld [vmem:[%s15050_s0 + $0x3f0] sm:$0xff]  ;;  %v11349_v17 = vsel %vm158_vm0, %v148_v15, 0.0  ;;  %v11352_v8 = vsel %vm158_vm0, %v151_v41, 0.0  ;;  %v11355_v5 = vsel %vm158_vm0, %v150_v37, 0.0 }
  0xa3   :  { %v11329_v14 = vmul.f32 0.015625, %v167_v2  ;;  %15307 = vst [vmem:[#allocation48_spill] sm:$0xff] %v11338_v49  ;;  %v11346_v61 = vmul.f32 0.015625, %v161_v50  ;;  %15308 = vst [vmem:[#allocation49_spill] sm:$0xff] %v11349_v17  ;;  %v11360_v2 = vsel %vm158_vm0, %v153_v19, 0.0  ;;  %v11363_v50 = vsel %vm158_vm0, %v152_v42, 0.0 }
  0xa4   :  { %15309 = vst [vmem:[#allocation50_spill] sm:$0xff] %v11352_v8  ;;  %15310 = vst [vmem:[#allocation51_spill] sm:$0xff] %v11355_v5  ;;  %v11366_v15 = vsel %vm158_vm0, %v155_v36, 0.0  ;;  %v11369_v41 = vsel %vm158_vm0, %v154_v38, 0.0  ;;  %v11378_v19 = vsub.s32 %v7027_v62, %v10966_v22  ;;  %v11381_v42 = vadd.s32 4294967192, %v10932_v9 }
  0xa5   :  { %379 = vadd.xlane.f32.xlu1 %v10978_v28  ;;  %376 = vadd.xlane.f32.xlu0 %v10981_v29  ;;  %15311 = vst [vmem:[#allocation52_spill] sm:$0xff] %v11360_v2  ;;  %15312 = vst [vmem:[#allocation53_spill] sm:$0xff] %v11363_v50  ;;  %v11372_v28 = vsel %vm158_vm0, %v157_v25, 0.0  ;;  %v11375_v29 = vsel %vm158_vm0, %v156_v18, 0.0  ;;  %v862_v38 = vrot.slane %v11329_v14, %v11087_v16  ;;  %vm7608_vm0 = vcmask 1041409  }
  0xa6   :  { %15313 = vst [vmem:[#allocation54_spill] sm:$0xff] %v11366_v15  ;;  %15314 = vst [vmem:[#allocation55_spill] sm:$0xff] %v11369_v41  ;;  %v170_v8 = vpop.xlane.xlu1 %169  ;;  %v164_v37 = vpop.xlane.xlu0 %163  ;;  %v11388_v41 = vadd.s32 4294967184, %v10932_v9  ;;  %v869_v25 = vrot.slane %v11329_v14, %v11106_v27  ;;  %v876_v18 = vrot.slane %v11329_v14, %v11288_v26  ;;  %v883_v62 = vrot.slane %v11329_v14, %v11308_v20 }
  0xa7   :  { %15315 = vst [vmem:[#allocation56_spill] sm:$0xff] %v11372_v28  ;;  %15316 = vst [vmem:[#allocation57_spill] sm:$0xff] %v11375_v29  ;;  %v11383_v36 = vmul.f32 0.015625, %v170_v8  ;;  %v545_v15 = vmul.f32 0.015625, %v164_v37  ;;  %v806_v8 = vrot.slane %v11346_v61, %v11087_v16  ;;  %v11405_v28 = vadd.s32 4294967176, %v10932_v9 }
  0xa8   :  { %15317 = vst [vmem:[#allocation58_spill] sm:$0xff] %v11378_v19  ;;  %v11416_v11 = vcombine.low %v862_v38, %v869_v25  ;;  %v820_v10 = vrot.slane %v11346_v61, %v11288_v26 }
  0xa9   :  { %v7633_v37 = vpack.c.bf16 %v11383_v36, %v11329_v14  ;;  %v7632_v19 = vpack.c.bf16 %v545_v15, %v11346_v61  ;;  %385 = vadd.xlane.f32.xlu1 %v10984_v30  ;;  %382 = vadd.xlane.f32.xlu0 %v10991_v34  ;;  %v834_v29 = vrot.slane %v545_v15, %v11087_v16 }
  0xaa   :  { %v176_v50 = vpop.xlane.xlu1 %175  ;;  %v173_v2 = vpop.xlane.xlu0 %172  ;;  %v841_v5 = vrot.slane %v545_v15, %v11106_v27  ;;  %v848_v17 = vrot.slane %v545_v15, %v11288_v26  ;;  %v855_v14 = vrot.slane %v545_v15, %v11308_v20  ;;  %v813_v30 = vrot.slane %v11346_v61, %v11106_v27 }
  0xab   :  { %v7986_v49 = vunpack.c.l.b16 %v7633_v37  ;;  %v7987_v34 = vunpack.c.h.b16 %v7633_v37  ;;  %v7984_v12 = vunpack.c.l.b16 %v7632_v19  ;;  %v7985_v51 = vunpack.c.h.b16 %v7632_v19 }
  0xac   :  { %v11412_v24 = vmul.f32 0.015625, %v176_v50  ;;  %v11414_v9 = vmul.f32 0.015625, %v173_v2  ;;  %v11424_v19 = vcombine.low %v834_v29, %v841_v5  ;;  %v4402_v25 = vcombine.low %v848_v17, %v855_v14 }
  0xad   :  { %v8124_v4 = vrot.slane %v7986_v49, %v11009_v44  ;;  %v8115_v15 = vrot.slane %v7984_v12, %v10988_v33  ;;  %v8119_v60 = vrot.slane %v7985_v51, %v11015_v46  ;;  %391 = vadd.xlane.f32.xlu1 %v10996_v39  ;;  %388 = vadd.xlane.f32.xlu0 %v10999_v40 }
  0xae   :  { %v7634_v2 = vpack.c.bf16 %v11412_v24, %v11414_v9  ;;  %v182_v50 = vpop.xlane.xlu1 %181  ;;  %v179_v38 = vpop.xlane.xlu0 %178  ;;  %v4419_v37 = vcombine.low %v876_v18, %v883_v62  ;;  %v827_v49 = vrot.slane %v11346_v61, %v11308_v20  ;;  %v8129_v12 = vrot.slane %v7987_v34, %v11012_v45 }
  0xaf   :  { %v8120_v51 = vsel %vm6955_vm1, %v8119_v60, %v8115_v15  ;;  %v11433_v39 = vmul.f32 0.015625, %v182_v50  ;;  %v11435_v5 = vmul.f32 0.015625, %v179_v38  ;;  %v11438_v40 = vcombine.low %v806_v8, %v813_v30 }
  0xb0   :  { %v8125_v29 = vsel %vm6962_vm2, %v8124_v4, %v8120_v51  ;;  %v7988_v44 = vunpack.c.l.b16 %v7634_v2  ;;  %v7989_v56 = vunpack.c.h.b16 %v7634_v2  ;;  %v4409_v60 = vrot.slane %v11424_v19, %v11326_v13 }
  0xb1   :  { %v8130_v17 = vsel %vm6969_vm3, %v8129_v12, %v8125_v29  ;;  %v7635_v18 = vpack.c.bf16 %v11433_v39, %v11435_v5  ;;  %397 = vadd.xlane.f32.xlu1 %v11030_v54  ;;  %v4426_v61 = vrot.slane %v11416_v11, %v11326_v13  ;;  %394 = vadd.xlane.f32.xlu0 %v11033_v55 }
  0xb2   :  { %v8134_v62 = vrot.slane %v7988_v44, %v11027_v53  ;;  %v8139_v4 = vrot.slane %v7989_v56, %v11036_v57  ;;  %v188_v8 = vpop.xlane.xlu1 %187  ;;  %v185_v14 = vpop.xlane.xlu0 %184  ;;  %v4416_v30 = vrot.slane %v4402_v25, %v11326_v13  ;;  %v4433_v34 = vrot.slane %v4419_v37, %v11326_v13 }
  0xb3   :  { %v7990_v15 = vunpack.c.l.b16 %v7635_v18  ;;  %v7991_v54 = vunpack.c.h.b16 %v7635_v18  ;;  %v11453_v2 = vmul.f32 0.015625, %v188_v8  ;;  %v11455_v19 = vmul.f32 0.015625, %v185_v14 }
  0xb4   :  { %v8135_v11 = vsel %vm6976_vm4, %v8134_v62, %v8130_v17  ;;  %v4385_v50 = vcombine.low %v820_v10, %v827_v49  ;;  %v890_v44 = vrot.slane %v11383_v36, %v11087_v16  ;;  %v897_v55 = vrot.slane %v11383_v36, %v11106_v27  ;;  %v10246_v10 = vld [vmem:[%s15051_s1 + $0x4] ss:$24 sps:$4 sm:$0xff]   ;;  %v10248_v49 = vld [vmem:[%s15051_s1] ss:$24 sps:$4 sm:$0xff]  }
  0xb5   :  { %v8140_v56 = vsel %vm6983_vm5, %v8139_v4, %v8135_v11  ;;  %v8144_v38 = vrot.slane %v7990_v15, %v11039_v58  ;;  %v8149_v25 = vrot.slane %v7991_v54, %v11054_v63  ;;  %v7636_v37 = vpack.c.bf16 %v11453_v2, %v11455_v19  ;;  %403 = vadd.xlane.f32.xlu1 %v11042_v59  ;;  %v10249_v15 = vld [vmem:[%s15051_s1 + $0x34] ss:$24 sps:$4 sm:$0xff]  }
  0xb6   :  { %400 = vadd.xlane.f32.xlu0 %v11057_v0  ;;  %v194_v12 = vpop.xlane.xlu1 %193  ;;  %v191_v51 = vpop.xlane.xlu0 %190  ;;  %v904_v29 = vrot.slane %v11383_v36, %v11288_v26  ;;  %v911_v17 = vrot.slane %v11383_v36, %v11308_v20  ;;  %v11481_v59 = vsub.s32 %v11381_v42, %v10966_v22  ;;  %v11485_v18 = vsub.s32 %v11388_v41, %v10966_v22 }
  0xb7   :  { %v8145_v62 = vsel %vm6990_vm6, %v8144_v38, %v8140_v56  ;;  %v11488_v4 = vmul.f32 0.015625, %v194_v12  ;;  %v4392_v0 = vrot.slane %v11438_v40, %v11326_v13  ;;  %9716 = vmatprep.subr.bf16.mxu1 %v10246_v10  ;;  %v11494_v8 = vsub.s32 %v11405_v28, %v10966_v22  ;;  %v10251_v40 = vld [vmem:[%s15051_s1 + $0x30] ss:$24 sps:$4 sm:$0xff]  }
  0xb8   :  { %15318 = vst [vmem:[#allocation59_spill] sm:$0xff] %v11481_v59  ;;  %15319 = vst [vmem:[#allocation60_spill] sm:$0xff] %v11485_v18  ;;  %v11497_v36 = vsel %vm6997_vm7, %v8149_v25, %v8145_v62  ;;  %v11499_v42 = vmul.f32 0.015625, %v191_v51  ;;  %v4399_v41 = vrot.slane %v4385_v50, %v11326_v13  ;;  %v4435_v14 = vcombine.low %v890_v44, %v897_v55 }
  0xb9   :  { %15320 = vst [vmem:[#allocation61_spill] sm:$0xff] %v11494_v8  ;;  %15321 = vst [vmem:[#allocation62_spill] sm:$0xff] %v11497_v36  ;;  %9717 = vmatpush1.bf16.msra.mxu1 %v10248_v49  ;;  %v7992_v54 = vunpack.c.l.b16 %v7636_v37  ;;  %409 = vadd.xlane.f32.xlu1 %v11091_v21  ;;  %v11509_v28 = vcombine.low %v4409_v60, %v4416_v30  ;;  %v11511_v11 = vcombine.low %v4426_v61, %v4433_v34 }
  0xba   :  { %v1058_v50 = vrot.slane %v11453_v2, %v11087_v16  ;;  %v7993_v44 = vunpack.c.h.b16 %v7636_v37  ;;  %v7637_v55 = vpack.c.bf16 %v11488_v4, %v11499_v42  ;;  %406 = vadd.xlane.f32.xlu0 %v11094_v23  ;;  %v200_v56 = vpop.xlane.xlu1 %199  ;;  %v197_v38 = vpop.xlane.xlu0 %196  ;;  %v4436_v25 = vcombine.low %v904_v29, %v911_v17  ;;  %9718 = vmatprep.subr.bf16.mxu1 %v10249_v15  ;;  %v10252_v23 = vld [vmem:[%s15051_s1 + $0x64] ss:$24 sps:$4 sm:$0xff]  }
  0xbb   :  { %v1065_v10 = vrot.slane %v11453_v2, %v11106_v27  ;;  %v11520_v21 = vmul.f32 0.015625, %v200_v56  ;;  %v11522_v60 = vmul.f32 0.015625, %v197_v38  ;;  %v1072_v61 = vrot.slane %v11453_v2, %v11288_v26 }
  0xbc   :  { %v1079_v30 = vrot.slane %v11453_v2, %v11308_v20  ;;  %v11531_v34 = vcombine.low %v4392_v0, %v4399_v41  ;;  %v4443_v37 = vrot.slane %v4435_v14, %v11326_v13  ;;  %v918_v49 = vrot.slane %v11414_v9, %v11087_v16  ;;  %v10254_v2 = vld [vmem:[%s15051_s1 + $0x60] ss:$24 sps:$4 sm:$0xff]  }
  0xbd   :  { %v925_v12 = vrot.slane %v11414_v9, %v11106_v27  ;;  %9719 = vmatpush1.bf16.msra.mxu1 %v10251_v40  ;;  %v11542_v51 = vrot.slane %v7992_v54, %v11071_v6  ;;  %v11546_v29 = vpack.c.bf16 %v11520_v21, %v11522_v60  ;;  %415 = vadd.xlane.f32.xlu1 %v11109_v31  ;;  %v7994_v31 = vunpack.c.l.b16 %v7637_v55 }
  0xbe   :  { %15322 = vst [vmem:[#allocation63_spill] sm:$0xff] %v11531_v34  ;;  %v932_v17 = vrot.slane %v11414_v9, %v11288_v26  ;;  %v939_v62 = vrot.slane %v11414_v9, %v11308_v20  ;;  %v11554_v0 = vrot.slane %v7993_v44, %v11074_v7  ;;  %412 = vadd.xlane.f32.xlu0 %v11112_v32  ;;  %v206_v41 = vpop.xlane.xlu1 %205  ;;  %v203_v14 = vpop.xlane.xlu0 %202  ;;  %v10255_v9 = vld [vmem:[%s15051_s1 + $0x94] ss:$24 sps:$4 sm:$0xff]   ;;  %v7995_v32 = vunpack.c.h.b16 %v7637_v55 }
  0xbf   :  { %15323 = vst [vmem:[#allocation64_spill] sm:$0xff] %v11542_v51  ;;  %15324 = vst [vmem:[#allocation65_spill] sm:$0xff] %v11546_v29  ;;  %v4450_v15 = vrot.slane %v4436_v25, %v11326_v13  ;;  %v4537_v40 = vcombine.low %v1058_v50, %v1065_v10  ;;  %v1114_v54 = vrot.slane %v11488_v4, %v11087_v16  ;;  %v11560_v56 = vmul.f32 0.015625, %v206_v41  ;;  %v10257_v25 = vld [vmem:[%s15051_s1 + $0x90] ss:$24 sps:$4 sm:$0xff]  }
  0xc0   :  { %15325 = vst [vmem:[#allocation66_spill] sm:$0xff] %v11554_v0  ;;  %v11562_v38 = vmul.f32 0.015625, %v203_v14  ;;  %v4538_v22 = vcombine.low %v1072_v61, %v1079_v30  ;;  %9720 = vmatprep.subr.bf16.mxu1 %v10252_v23  ;;  %v4452_v44 = vcombine.low %v918_v49, %v925_v12  ;;  %v4453_v0 = vcombine.low %v932_v17, %v939_v62  ;;  %v15336_v29 = vld [vmem:[#allocation22_spill] sm:$0xff] }
  0xc1   :  { %v1121_v50 = vrot.slane %v11488_v4, %v11106_v27  ;;  %9721 = vmatpush1.bf16.msra.mxu1 %v10254_v2  ;;  %421 = vadd.xlane.f32.xlu1 %v11115_v35  ;;  %v1128_v61 = vrot.slane %v11488_v4, %v11288_v26  ;;  %v1135_v55 = vrot.slane %v11488_v4, %v11308_v20 }
  0xc2   :  { %v11574_v10 = vpack.c.bf16 %v11560_v56, %v11562_v38  ;;  %v946_v30 = vrot.slane %v11412_v24, %v11087_v16  ;;  %418 = vadd.xlane.f32.xlu0 %v11131_v43  ;;  %v212_v23 = vpop.xlane.xlu1 %211  ;;  %v209_v49 = vpop.xlane.xlu0 %208  ;;  %v11584_v12 = vcombine.low %v4443_v37, %v4450_v15  ;;  %v4545_v2 = vrot.slane %v4537_v40, %v11326_v13  ;;  %v10258_v43 = vld [vmem:[%s15051_s1 + $0xc4] ss:$24 sps:$4 sm:$0xff]  }
  0xc3   :  { %v4571_v17 = vcombine.low %v1114_v54, %v1121_v50  ;;  %v953_v35 = vrot.slane %v11412_v24, %v11106_v27  ;;  %v11589_v62 = vmul.f32 0.015625, %v212_v23  ;;  %v11591_v41 = vmul.f32 0.015625, %v209_v49  ;;  %9722 = vmatprep.subr.bf16.mxu1 %v10255_v9 }
  0xc4   :  { %15326 = vst [vmem:[#allocation67_spill] sm:$0xff] %v11574_v10  ;;  %15327 = vst [vmem:[#allocation68_spill] sm:$0xff] %v11584_v12  ;;  %v4552_v4 = vrot.slane %v4538_v22, %v11326_v13  ;;  %v4572_v14 = vcombine.low %v1128_v61, %v1135_v55  ;;  %v11598_v37 = vrot.slane %v7994_v31, %v11170_v3  ;;  %v10260_v22 = vld [vmem:[%s15051_s1 + $0xc0] ss:$24 sps:$4 sm:$0xff]  }
  0xc5   :  { %v11601_v15 = vrot.slane %v7995_v32, %v11249_v1  ;;  %v960_v40 = vrot.slane %v11412_v24, %v11288_v26  ;;  %v967_v54 = vrot.slane %v11412_v24, %v11308_v20  ;;  %9723 = vmatpush1.bf16.msra.mxu1 %v10257_v25  ;;  %v7640_v9 = vpack.c.bf16 %v11589_v62, %v11591_v41 }
  0xc6   :  { %15328 = vst [vmem:[#allocation69_spill] sm:$0xff] %v11598_v37  ;;  %427 = vadd.xlane.f32.xlu1 %v11134_v47  ;;  %v4460_v31 = vrot.slane %v4452_v44, %v11326_v13  ;;  %v4467_v32 = vrot.slane %v4453_v0, %v11326_v13  ;;  %v11615_v50 = vcombine.low %v946_v30, %v953_v35  ;;  %v218_v25 = vpop.xlane.xlu1 %217  ;;  %v215_v55 = vpop.xlane.xlu0 %214  ;;  %v10261_v0 = vld [vmem:[%s15051_s1 + $0xf4] ss:$24 sps:$4 sm:$0xff]  }
  0xc7   :  { %15329 = vst [vmem:[#allocation70_spill] sm:$0xff] %v11601_v15  ;;  %424 = vadd.xlane.f32.xlu0 %v11137_v48  ;;  %v4579_v23 = vrot.slane %v4571_v17, %v11326_v13  ;;  %v4586_v49 = vrot.slane %v4572_v14, %v11326_v13  ;;  %v8000_v15 = vunpack.c.l.b16 %v7640_v9  ;;  %v8001_v47 = vunpack.c.h.b16 %v7640_v9  ;;  %9724 = vmatprep.subr.bf16.mxu1 %v10258_v43  ;;  %v10263_v14 = vld [vmem:[%s15051_s1 + $0xf0] ss:$24 sps:$4 sm:$0xff]   ;;  %v15332_v9 = vld [vmem:[#allocation19_spill] sm:$0xff] }
  0xc8   :  { %v11622_v37 = vmul.f32 0.015625, %v218_v25  ;;  %v11624_v44 = vmul.f32 0.015625, %v215_v55  ;;  %v11629_v30 = vcombine.low %v4545_v2, %v4552_v4  ;;  %v11631_v48 = vcombine.low %v960_v40, %v967_v54 }
  0xc9   :  { %v1170_v17 = vrot.slane %v11520_v21, %v11087_v16  ;;  %v1177_v35 = vrot.slane %v11520_v21, %v11106_v27  ;;  %9725 = vmatpush1.bf16.msra.mxu1 %v10260_v22  ;;  %v11643_v2 = vcombine.low %v4460_v31, %v4467_v32  ;;  %v1184_v40 = vrot.slane %v11520_v21, %v11288_v26 }
  0xca   :  { %15330 = vst [vmem:[#allocation71_spill] sm:$0xff] %v11629_v30  ;;  %v7641_v43 = vpack.c.bf16 %v11622_v37, %v11624_v44  ;;  %433 = vadd.xlane.f32.xlu1 %v11151_v52  ;;  %v8194_v54 = vrot.slane %v8000_v15, %v10988_v33  ;;  %v8198_v22 = vrot.slane %v8001_v47, %v11015_v46  ;;  %v224_v25 = vpop.xlane.xlu1 %223  ;;  %v221_v55 = vpop.xlane.xlu0 %220 }
  0xcb   :  { %15331 = vst [vmem:[#allocation72_spill] sm:$0xff] %v11643_v2  ;;  %430 = vadd.xlane.f32.xlu0 %v15332_v9  ;;  %v1191_v24 = vrot.slane %v11520_v21, %v11308_v20  ;;  %v974_v52 = vrot.slane %v11435_v5, %v11087_v16  ;;  %v11656_v61 = vmul.f32 0.015625, %v224_v25  ;;  %v11658_v4 = vcombine.low %v4579_v23, %v4586_v49  ;;  %v10266_v23 = vld [vmem:[%s15051_s1 + $0x120] ss:$24 sps:$4 sm:$0xff]   ;;  %v15334_v49 = vld [vmem:[#allocation13_spill] sm:$0xff] }
  0xcc   :  { %v8002_v31 = vunpack.c.l.b16 %v7641_v43  ;;  %v8003_v32 = vunpack.c.h.b16 %v7641_v43  ;;  %9726 = vmatprep.subr.bf16.mxu1 %v10261_v0  ;;  %v11660_v15 = vmul.f32 0.015625, %v221_v55  ;;  %v11664_v9 = vcombine.low %v1170_v17, %v1177_v35  ;;  %v10264_v43 = vld [vmem:[%s15051_s1 + $0x124] ss:$24 sps:$4 sm:$0xff]  }
  0xcd   :  { %15333 = vst [vmem:[#allocation19_spill] sm:$0xff] %v11658_v4  ;;  %v981_v21 = vrot.slane %v11435_v5, %v11106_v27  ;;  %9727 = vmatpush1.bf16.msra.mxu1 %v10263_v14  ;;  %v15335_v55 = vld [vmem:[#allocation20_spill] sm:$0xff]  ;;  %v988_v17 = vrot.slane %v11435_v5, %v11288_v26  ;;  %v995_v35 = vrot.slane %v11435_v5, %v11308_v20 }
  0xce   :  { %v8203_v0 = vrot.slane %v8002_v31, %v15334_v49  ;;  %v8208_v25 = vrot.slane %v8003_v32, %v11012_v45  ;;  %439 = vadd.xlane.f32.xlu1 %v15335_v55  ;;  %v8199_v14 = vsel %vm6955_vm1, %v8198_v22, %v8194_v54  ;;  %v7642_v47 = vpack.c.bf16 %v11656_v61, %v11660_v15  ;;  %v230_v8 = vpop.xlane.xlu1 %229  ;;  %v227_v51 = vpop.xlane.xlu0 %226 }
  0xcf   :  { %436 = vadd.xlane.f32.xlu0 %v15336_v29  ;;  %v1226_v31 = vrot.slane %v11560_v56, %v11087_v16  ;;  %v1233_v32 = vrot.slane %v11560_v56, %v11106_v27  ;;  %v11690_v36 = vmul.f32 0.015625, %v230_v8  ;;  %v11692_v5 = vmul.f32 0.015625, %v227_v51  ;;  %9728 = vmatprep.subr.bf16.mxu1 %v10264_v43  ;;  %v10267_v43 = vld [vmem:[%s15051_s1 + $0x154] ss:$24 sps:$4 sm:$0xff]  }
  0xd0   :  { %v8204_v55 = vsel %vm6962_vm2, %v8203_v0, %v8199_v14  ;;  %v1240_v54 = vrot.slane %v11560_v56, %v11288_v26  ;;  %v8004_v22 = vunpack.c.l.b16 %v7642_v47  ;;  %v8005_v10 = vunpack.c.h.b16 %v7642_v47  ;;  %v15337_v0 = vld [vmem:[#allocation23_spill] sm:$0xff] }
  0xd1   :  { %v8209_v29 = vsel %vm6969_vm3, %v8208_v25, %v8204_v55  ;;  %v1247_v18 = vrot.slane %v11560_v56, %v11308_v20  ;;  %9729 = vmatpush1.bf16.msra.mxu1 %v10266_v23  ;;  %v7643_v59 = vpack.c.bf16 %v11690_v36, %v11692_v5  ;;  %v11702_v8 = vcombine.low %v1184_v40, %v1191_v24  ;;  %v10269_v56 = vld [vmem:[%s15051_s1 + $0x150] ss:$24 sps:$4 sm:$0xff]  }
  0xd2   :  { %445 = vadd.xlane.f32.xlu1 %v15337_v0  ;;  %v11704_v51 = vcombine.low %v974_v52, %v981_v21  ;;  %v11706_v14 = vcombine.low %v988_v17, %v995_v35  ;;  %v8213_v47 = vrot.slane %v8004_v22, %v11027_v53  ;;  %v8218_v23 = vrot.slane %v8005_v10, %v11036_v57  ;;  %v15338_v25 = vld [vmem:[#allocation24_spill] sm:$0xff]  ;;  %v236_v24 = vpop.xlane.xlu1 %235  ;;  %v233_v40 = vpop.xlane.xlu0 %232 }
  0xd3   :  { %442 = vadd.xlane.f32.xlu0 %v15338_v25  ;;  %v1002_v52 = vrot.slane %v11433_v39, %v11087_v16  ;;  %v1009_v21 = vrot.slane %v11433_v39, %v11106_v27  ;;  %v8006_v17 = vunpack.c.l.b16 %v7643_v59  ;;  %v8007_v35 = vunpack.c.h.b16 %v7643_v59  ;;  %9730 = vmatprep.subr.bf16.mxu1 %v10267_v43  ;;  %v15339_v43 = vld [vmem:[#allocation25_spill] sm:$0xff] }
  0xd4   :  { %v11721_v55 = vmul.f32 0.015625, %v236_v24  ;;  %v11723_v0 = vmul.f32 0.015625, %v233_v40  ;;  %v8214_v22 = vsel %vm6976_vm4, %v8213_v47, %v8209_v29  ;;  %v11726_v10 = vcombine.low %v1226_v31, %v1233_v32  ;;  %v10272_v31 = vld [vmem:[%s15051_s1 + $0x180] ss:$24 sps:$4 sm:$0xff]  }
  0xd5   :  { %v11728_v25 = vcombine.low %v1240_v54, %v1247_v18  ;;  %v1016_v4 = vrot.slane %v11433_v39, %v11288_v26  ;;  %9731 = vmatpush1.bf16.msra.mxu1 %v10269_v56  ;;  %v8219_v2 = vsel %vm6983_vm5, %v8218_v23, %v8214_v22  ;;  %v8223_v30 = vrot.slane %v8006_v17, %v11039_v58  ;;  %v10270_v18 = vld [vmem:[%s15051_s1 + $0x184] ss:$24 sps:$4 sm:$0xff]   ;;  %v15340_v32 = vld [vmem:[#allocation26_spill] sm:$0xff] }
  0xd6   :  { %v8228_v59 = vrot.slane %v8007_v35, %v11054_v63  ;;  %v7644_v24 = vpack.c.bf16 %v11721_v55, %v11723_v0  ;;  %451 = vadd.xlane.f32.xlu1 %v15339_v43  ;;  %v242_v54 = vpop.xlane.xlu1 %241  ;;  %v239_v29 = vpop.xlane.xlu0 %238  ;;  %v4613_v56 = vrot.slane %v11664_v9, %v11326_v13  ;;  %v4620_v47 = vrot.slane %v11702_v8, %v11326_v13 }
  0xd7   :  { %448 = vadd.xlane.f32.xlu0 %v15340_v32  ;;  %v1023_v23 = vrot.slane %v11433_v39, %v11308_v20  ;;  %v4503_v40 = vcombine.low %v1002_v52, %v1009_v21  ;;  %v8224_v17 = vsel %vm6990_vm6, %v8223_v30, %v8219_v2  ;;  %v11752_v35 = vmul.f32 0.015625, %v242_v54  ;;  %9732 = vmatprep.subr.bf16.mxu1 %v10270_v18  ;;  %v15342_v2 = vld [vmem:[#allocation27_spill] sm:$0xff]  ;;  %v10275_v21 = vld [vmem:[%s15051_s1 + $0x1b0] ss:$24 sps:$4 sm:$0xff]  }
  0xd8   :  { %v4494_v22 = vrot.slane %v11704_v51, %v11326_v13  ;;  %v4501_v43 = vrot.slane %v11706_v14, %v11326_v13  ;;  %v11759_v9 = vsel %vm6997_vm7, %v8228_v59, %v8224_v17  ;;  %v11761_v32 = vmul.f32 0.015625, %v239_v29 }
  0xd9   :  { %15341 = vst [vmem:[#allocation20_spill] sm:$0xff] %v11759_v9  ;;  %v4504_v8 = vcombine.low %v1016_v4, %v1023_v23  ;;  %v1282_v39 = vrot.slane %v11589_v62, %v11087_v16  ;;  %9733 = vmatpush1.bf16.msra.mxu1 %v10272_v31  ;;  %v8008_v30 = vunpack.c.l.b16 %v7644_v24  ;;  %v4647_v51 = vrot.slane %v11726_v10, %v11326_v13  ;;  %v10273_v4 = vld [vmem:[%s15051_s1 + $0x1b4] ss:$24 sps:$4 sm:$0xff]   ;;  %v15343_v31 = vld [vmem:[#allocation28_spill] sm:$0xff] }
  0xda   :  { %457 = vadd.xlane.f32.xlu1 %v15342_v2  ;;  %v4654_v14 = vrot.slane %v11728_v25, %v11326_v13  ;;  %v1289_v52 = vrot.slane %v11589_v62, %v11106_v27  ;;  %v8009_v59 = vunpack.c.h.b16 %v7644_v24  ;;  %v7645_v18 = vpack.c.bf16 %v11752_v35, %v11761_v32  ;;  %v248_v10 = vpop.xlane.xlu1 %247  ;;  %v245_v54 = vpop.xlane.xlu0 %244  ;;  %9734 = vmatprep.subr.bf16.mxu1 %v10273_v4  ;;  %v15349_v4 = vld [vmem:[#allocation29_spill] sm:$0xff] }
  0xdb   :  { %454 = vadd.xlane.f32.xlu0 %v15343_v31  ;;  %v4511_v25 = vrot.slane %v4503_v40, %v11326_v13  ;;  %v1296_v29 = vrot.slane %v11589_v62, %v11288_v26  ;;  %v11784_v23 = vmul.f32 0.015625, %v248_v10  ;;  %v11786_v17 = vmul.f32 0.015625, %v245_v54  ;;  %v10276_v31 = vld [vmem:[%s15051_s1 + $0x1e4] ss:$24 sps:$4 sm:$0xff]  }
  0xdc   :  { %v4518_v2 = vrot.slane %v4504_v8, %v11326_v13  ;;  %v1303_v24 = vrot.slane %v11589_v62, %v11308_v20  ;;  %v8010_v9 = vunpack.c.l.b16 %v7645_v18  ;;  %v8011_v12 = vunpack.c.h.b16 %v7645_v18  ;;  %v10278_v62 = vld [vmem:[%s15051_s1 + $0x1e0] ss:$24 sps:$4 sm:$0xff]  }
  0xdd   :  { %15344 = vst [vmem:[#allocation22_spill] sm:$0xff] %v11786_v17  ;;  %v15345_v40 = vrot.slane %v11631_v48, %v11326_v13  ;;  %v15346_v10 = vrot.slane %v11615_v50, %v11326_v13  ;;  %v11802_v34 = vcombine.low %v1282_v39, %v1289_v52  ;;  %9735 = vmatpush1.bf16.msra.mxu1 %v10275_v21  ;;  %v15351_v39 = vld [vmem:[#allocation30_spill] sm:$0xff] }
  0xde   :  { %v11809_v8 = vpack.c.bf16 %v11784_v23, %v11786_v17  ;;  %463 = vadd.xlane.f32.xlu1 %v15349_v4  ;;  %v11812_v18 = vcombine.low %v4613_v56, %v4620_v47  ;;  %v1030_v50 = vrot.slane %v11455_v19, %v11087_v16  ;;  %v1037_v48 = vrot.slane %v11455_v19, %v11106_v27  ;;  %v254_v52 = vpop.xlane.xlu1 %253  ;;  %v251_v21 = vpop.xlane.xlu0 %250 }
  0xdf   :  { %v11800_v54 = vcombine.low %v15346_v10, %v15345_v40  ;;  %460 = vadd.xlane.f32.xlu0 %v15351_v39  ;;  %v11819_v40 = vcombine.low %v4494_v22, %v4501_v43  ;;  %v11821_v10 = vcombine.low %v4647_v51, %v4654_v14  ;;  %v1051_v56 = vrot.slane %v11455_v19, %v11308_v20  ;;  %v10279_v22 = vld [vmem:[%s15051_s1 + $0x214] ss:$24 sps:$4 sm:$0xff]   ;;  %v10281_v14 = vld [vmem:[%s15051_s1 + $0x210] ss:$24 sps:$4 sm:$0xff]  }
  0xe0   :  { %15348 = vst [vmem:[#allocation24_spill] sm:$0xff] %v11809_v8  ;;  %15350 = vst [vmem:[#allocation25_spill] sm:$0xff] %v11812_v18  ;;  %v11828_v47 = vrot.slane %v8008_v30, %v11071_v6  ;;  %v11831_v4 = vrot.slane %v8009_v59, %v11074_v7  ;;  %v11833_v18 = vcombine.low %v4511_v25, %v4518_v2  ;;  %9736 = vmatprep.subr.bf16.mxu1 %v10276_v31  ;;  %v15359_v59 = vld [vmem:[#allocation31_spill] sm:$0xff]  ;;  %v15360_v2 = vld [vmem:[#allocation32_spill] sm:$0xff] }
  0xe1   :  { %15347 = vst [vmem:[#allocation23_spill] sm:$0xff] %v11800_v54  ;;  %15352 = vst [vmem:[#allocation26_spill] sm:$0xff] %v11819_v40  ;;  %v1044_v54 = vrot.slane %v11455_v19, %v11288_v26  ;;  %v11835_v39 = vcombine.low %v1296_v29, %v1303_v24  ;;  %v11841_v43 = vrot.slane %v8010_v9, %v11170_v3  ;;  %9737 = vmatpush1.bf16.msra.mxu1 %v10278_v62 }
  0xe2   :  { %15353 = vst [vmem:[#allocation27_spill] sm:$0xff] %v11821_v10  ;;  %15354 = vst [vmem:[#allocation28_spill] sm:$0xff] %v11828_v47  ;;  %v11844_v19 = vrot.slane %v8011_v12, %v11249_v1  ;;  %v1338_v51 = vrot.slane %v11622_v37, %v11087_v16  ;;  %469 = vadd.xlane.f32.xlu1 %v15359_v59  ;;  %v11854_v25 = vcombine.low %v1030_v50, %v1037_v48  ;;  %v260_v24 = vpop.xlane.xlu1 %259  ;;  %v257_v31 = vpop.xlane.xlu0 %256 }
  0xe3   :  { %15355 = vst [vmem:[#allocation29_spill] sm:$0xff] %v11831_v4  ;;  %15356 = vst [vmem:[#allocation30_spill] sm:$0xff] %v11833_v18  ;;  %v1345_v9 = vrot.slane %v11622_v37, %v11106_v27  ;;  %v1352_v12 = vrot.slane %v11622_v37, %v11288_v26  ;;  %v1359_v29 = vrot.slane %v11622_v37, %v11308_v20  ;;  %466 = vadd.xlane.f32.xlu0 %v15360_v2 }
  0xe4   :  { %15357 = vst [vmem:[#allocation73_spill] sm:$0xff] %v11841_v43  ;;  %15358 = vst [vmem:[#allocation74_spill] sm:$0xff] %v11844_v19  ;;  %v4521_v62 = vcombine.low %v1044_v54, %v1051_v56  ;;  %v1086_v30 = vrot.slane %v11499_v42, %v11087_v16  ;;  %v1093_v50 = vrot.slane %v11499_v42, %v11106_v27  ;;  %v11869_v59 = vmul.f32 0.015625, %v260_v24  ;;  %v10282_v54 = vld [vmem:[%s15051_s1 + $0x244] ss:$24 sps:$4 sm:$0xff]  }
  0xe5   :  { %v1100_v48 = vrot.slane %v11499_v42, %v11288_v26  ;;  %v11871_v19 = vmul.f32 0.015625, %v257_v31  ;;  %v4688_v37 = vrot.slane %v11835_v39, %v11326_v13  ;;  %v4707_v2 = vcombine.low %v1338_v51, %v1345_v9  ;;  %9738 = vmatprep.subr.bf16.mxu1 %v10279_v22  ;;  %v10284_v31 = vld [vmem:[%s15051_s1 + $0x240] ss:$24 sps:$4 sm:$0xff]   ;;  %v15363_v51 = vld [vmem:[#allocation33_spill] sm:$0xff] }
  0xe6   :  { %v11879_v43 = vmul.f32 0.015625, %v254_v52  ;;  %v4708_v4 = vcombine.low %v1352_v12, %v1359_v29  ;;  %v1107_v24 = vrot.slane %v11499_v42, %v11308_v20  ;;  %9739 = vmatpush1.bf16.msra.mxu1 %v10281_v14  ;;  %v11886_v39 = vmul.f32 0.015625, %v251_v21  ;;  %475 = vadd.xlane.f32.xlu1 %v15363_v51  ;;  %v15364_v12 = vld [vmem:[#allocation34_spill] sm:$0xff]  ;;  %v266_v29 = vpop.xlane.xlu1 %265  ;;  %v263_v42 = vpop.xlane.xlu0 %262 }
  0xe7   :  { %15361 = vst [vmem:[#allocation31_spill] sm:$0xff] %v11871_v19  ;;  %v7648_v22 = vpack.c.bf16 %v11869_v59, %v11871_v19  ;;  %v4528_v52 = vrot.slane %v11854_v25, %v11326_v13  ;;  %v4554_v9 = vcombine.low %v1086_v30, %v1093_v50  ;;  %472 = vadd.xlane.f32.xlu0 %v15364_v12  ;;  %v11898_v10 = vmul.f32 0.015625, %v266_v29  ;;  %v10285_v30 = vld [vmem:[%s15051_s1 + $0x274] ss:$24 sps:$4 sm:$0xff]  }
  0xe8   :  { %15362 = vst [vmem:[#allocation32_spill] sm:$0xff] %v11886_v39  ;;  %v4535_v14 = vrot.slane %v4521_v62, %v11326_v13  ;;  %v4715_v56 = vrot.slane %v4707_v2, %v11326_v13  ;;  %v4555_v47 = vcombine.low %v1100_v48, %v1107_v24  ;;  %v1394_v21 = vrot.slane %v11656_v61, %v11087_v16  ;;  %v10287_v2 = vld [vmem:[%s15051_s1 + $0x270] ss:$24 sps:$4 sm:$0xff]  }
  0xe9   :  { %v8016_v18 = vunpack.c.l.b16 %v7648_v22  ;;  %v8017_v19 = vunpack.c.h.b16 %v7648_v22  ;;  %v11900_v51 = vmul.f32 0.015625, %v263_v42  ;;  %9740 = vmatprep.subr.bf16.mxu1 %v10282_v54  ;;  %v4722_v25 = vrot.slane %v4708_v4, %v11326_v13  ;;  %v15366_v4 = vld [vmem:[#allocation36_spill] sm:$0xff]  ;;  %v15368_v42 = vld [vmem:[#allocation37_spill] sm:$0xff] }
  0xea   :  { %v1401_v62 = vrot.slane %v11656_v61, %v11106_v27  ;;  %v1408_v50 = vrot.slane %v11656_v61, %v11288_v26  ;;  %v1415_v48 = vrot.slane %v11656_v61, %v11308_v20  ;;  %9741 = vmatpush1.bf16.msra.mxu1 %v10284_v31  ;;  %481 = vadd.xlane.f32.xlu1 %v15366_v4  ;;  %v272_v54 = vpop.xlane.xlu1 %271  ;;  %v269_v8 = vpop.xlane.xlu0 %268 }
  0xeb   :  { %15365 = vst [vmem:[#allocation33_spill] sm:$0xff] %v11900_v51  ;;  %v7649_v24 = vpack.c.bf16 %v11898_v10, %v11900_v51  ;;  %v4562_v22 = vrot.slane %v4554_v9, %v11326_v13  ;;  %v4569_v12 = vrot.slane %v4555_v47, %v11326_v13  ;;  %v11923_v29 = vpack.c.bf16 %v11879_v43, %v11886_v39 }
  0xec   :  { %v8273_v61 = vrot.slane %v8016_v18, %v10988_v33  ;;  %v8277_v31 = vrot.slane %v8017_v19, %v11015_v46  ;;  %478 = vadd.xlane.f32.xlu0 %v15368_v42  ;;  %v15369_v51 = vrot.slane %v11802_v34, %v11326_v13  ;;  %v11933_v47 = vmul.f32 0.015625, %v272_v54  ;;  %9742 = vmatprep.subr.bf16.mxu1 %v10285_v30  ;;  %v10288_v34 = vld [vmem:[%s15051_s1 + $0x2a4] ss:$24 sps:$4 sm:$0xff]  }
  0xed   :  { %15367 = vst [vmem:[#allocation34_spill] sm:$0xff] %v11923_v29  ;;  %v8018_v9 = vunpack.c.l.b16 %v7649_v24  ;;  %v8019_v40 = vunpack.c.h.b16 %v7649_v24  ;;  %v11935_v17 = vcombine.low %v4528_v52, %v4535_v14  ;;  %v11937_v29 = vmul.f32 0.015625, %v269_v8  ;;  %v15374_v14 = vld [vmem:[#allocation38_spill] sm:$0xff] }
  0xee   :  { %v11931_v4 = vcombine.low %v15369_v51, %v4688_v37  ;;  %v11939_v18 = vcombine.low %v4715_v56, %v4722_v25  ;;  %v11941_v19 = vcombine.low %v1394_v21, %v1401_v62  ;;  %v11943_v42 = vcombine.low %v1408_v50, %v1415_v48  ;;  %9743 = vmatpush1.bf16.msra.mxu1 %v10287_v2  ;;  %v10290_v37 = vld [vmem:[%s15051_s1 + $0x2a0] ss:$24 sps:$4 sm:$0xff]   ;;  %v278_v62 = vpop.xlane.xlu1 %277  ;;  %v275_v50 = vpop.xlane.xlu0 %274 }
  0xef   :  { %15371 = vst [vmem:[#allocation37_spill] sm:$0xff] %v11935_v17  ;;  %15372 = vst [vmem:[#allocation75_spill] sm:$0xff] %v11937_v29  ;;  %v8282_v52 = vrot.slane %v8018_v9, %v15334_v49  ;;  %v8287_v8 = vrot.slane %v8019_v40, %v11012_v45  ;;  %487 = vadd.xlane.f32.xlu1 %v15374_v14  ;;  %v11954_v56 = vcombine.low %v4562_v22, %v4569_v12  ;;  %v15376_v25 = vld [vmem:[#allocation39_spill] sm:$0xff] }
  0xf0   :  { %15370 = vst [vmem:[#allocation36_spill] sm:$0xff] %v11931_v4  ;;  %15373 = vst [vmem:[#allocation76_spill] sm:$0xff] %v11939_v18  ;;  %v1142_v21 = vrot.slane %v11522_v60, %v11087_v16  ;;  %v8278_v51 = vsel %vm6955_vm1, %v8277_v31, %v8273_v61  ;;  %v7650_v30 = vpack.c.bf16 %v11933_v47, %v11937_v29  ;;  %484 = vadd.xlane.f32.xlu0 %v15376_v25 }
  0xf1   :  { %15375 = vst [vmem:[#allocation38_spill] sm:$0xff] %v11954_v56  ;;  %v1149_v48 = vrot.slane %v11522_v60, %v11106_v27  ;;  %v1156_v40 = vrot.slane %v11522_v60, %v11288_v26  ;;  %v8283_v2 = vsel %vm6962_vm2, %v8282_v52, %v8278_v51  ;;  %v11967_v54 = vmul.f32 0.015625, %v278_v62  ;;  %9744 = vmatprep.subr.bf16.mxu1 %v10288_v34  ;;  %v15378_v52 = vld [vmem:[#allocation40_spill] sm:$0xff]  ;;  %v15379_v62 = vld [vmem:[#allocation41_spill] sm:$0xff] }
  0xf2   :  { %v11969_v24 = vmul.f32 0.015625, %v275_v50  ;;  %v1163_v22 = vrot.slane %v11522_v60, %v11308_v20  ;;  %v8288_v12 = vsel %vm6969_vm3, %v8287_v8, %v8283_v2  ;;  %v8020_v61 = vunpack.c.l.b16 %v7650_v30  ;;  %9745 = vmatpush1.bf16.msra.mxu1 %v10290_v37  ;;  %v10291_v8 = vld [vmem:[%s15051_s1 + $0x2d4] ss:$24 sps:$4 sm:$0xff]   ;;  %v10293_v37 = vld [vmem:[%s15051_s1 + $0x2d0] ss:$24 sps:$4 sm:$0xff]   ;;  %v284_v50 = vpop.xlane.xlu1 %283  ;;  %v281_v2 = vpop.xlane.xlu0 %280 }
  0xf3   :  { %v8021_v31 = vunpack.c.h.b16 %v7650_v30  ;;  %v1450_v9 = vrot.slane %v11690_v36, %v11087_v16  ;;  %493 = vadd.xlane.f32.xlu1 %v15378_v52  ;;  %v1457_v51 = vrot.slane %v11690_v36, %v11106_v27  ;;  %v1464_v60 = vrot.slane %v11690_v36, %v11288_v26  ;;  %9746 = vmatprep.subr.bf16.mxu1 %v10291_v8  ;;  %v10299_v8 = vld [vmem:[%s15051_s1 + $0x300] ss:$24 sps:$4 sm:$0xff]  }
  0xf4   :  { %15377 = vst [vmem:[#allocation39_spill] sm:$0xff] %v11969_v24  ;;  %v7651_v14 = vpack.c.bf16 %v11967_v54, %v11969_v24  ;;  %v1471_v34 = vrot.slane %v11690_v36, %v11308_v20  ;;  %v8292_v30 = vrot.slane %v8020_v61, %v11027_v53  ;;  %490 = vadd.xlane.f32.xlu0 %v15379_v62  ;;  %v11998_v56 = vmul.f32 0.015625, %v284_v50  ;;  %v15381_v50 = vld [vmem:[#allocation42_spill] sm:$0xff] }
  0xf5   :  { %v8297_v25 = vrot.slane %v8021_v31, %v11036_v57  ;;  %v1198_v52 = vrot.slane %v11562_v38, %v11087_v16  ;;  %v1205_v36 = vrot.slane %v11562_v38, %v11106_v27  ;;  %v12000_v18 = vmul.f32 0.015625, %v281_v2 }
  0xf6   :  { %v8022_v24 = vunpack.c.l.b16 %v7651_v14  ;;  %v8023_v29 = vunpack.c.h.b16 %v7651_v14  ;;  %v8293_v61 = vsel %vm6976_vm4, %v8292_v30, %v8288_v12  ;;  %v12003_v31 = vcombine.low %v1142_v21, %v1149_v48  ;;  %9747 = vmatpush1.bf16.msra.mxu1 %v10293_v37  ;;  %v10294_v21 = vld [vmem:[%s15051_s1 + $0x304] ss:$24 sps:$4 sm:$0xff]   ;;  %v287_v12 = vpop.xlane.xlu0 %286 }
  0xf7   :  { %15380 = vst [vmem:[#allocation40_spill] sm:$0xff] %v12000_v18  ;;  %v12005_v62 = vcombine.low %v1156_v40, %v1163_v22  ;;  %v1212_v17 = vrot.slane %v11562_v38, %v11288_v26  ;;  %v8298_v4 = vsel %vm6983_vm5, %v8297_v25, %v8293_v61  ;;  %499 = vadd.xlane.f32.xlu1 %v15381_v50  ;;  %v10298_v48 = vld [vmem:[%s15051_s1 + $0xc] ss:$24 sps:$4 sm:$0xff]   ;;  %v15382_v40 = vld [vmem:[#allocation43_spill] sm:$0xff]  ;;  %v290_v22 = vpop.xlane.xlu1 %289 }
  0xf8   :  { %v8302_v39 = vrot.slane %v8022_v24, %v11039_v58  ;;  %v8307_v14 = vrot.slane %v8023_v29, %v11054_v63  ;;  %v12013_v2 = vcombine.low %v1450_v9, %v1457_v51  ;;  %496 = vadd.xlane.f32.xlu0 %v15382_v40  ;;  %v4749_v24 = vrot.slane %v11941_v19, %v11326_v13  ;;  %v15387_v50 = vld [vmem:[#allocation45_spill] sm:$0xff] }
  0xf9   :  { %v4756_v29 = vrot.slane %v11943_v42, %v11326_v13  ;;  %v4776_v9 = vcombine.low %v1464_v60, %v1471_v34  ;;  %v1219_v51 = vrot.slane %v11562_v38, %v11308_v20  ;;  %v7652_v30 = vpack.c.bf16 %v11998_v56, %v12000_v18  ;;  %9757 = vmatprep.subr.bf16.mxu0 %v10294_v21  ;;  %v15386_v34 = vld [vmem:[#allocation44_spill] sm:$0xff] }
  0xfa   :  { %v8303_v37 = vsel %vm6990_vm6, %v8302_v39, %v8298_v4  ;;  %v12034_v25 = vmul.f32 0.015625, %v290_v22  ;;  %v4622_v61 = vcombine.low %v1198_v52, %v1205_v36  ;;  %9798 = vmatprep.subr.bf16.mxu1 %v10298_v48  ;;  %v12039_v42 = vmul.f32 0.015625, %v287_v12  ;;  %9758 = vmatpush1.bf16.msra.mxu0 %v10299_v8  ;;  %v10305_v40 = vld [vmem:[%s15051_s1 + $0x330] ss:$24 sps:$4 sm:$0xff]  }
  0xfb   :  { %v12037_v19 = vsel %vm6997_vm7, %v8307_v14, %v8303_v37  ;;  %v4623_v38 = vcombine.low %v1212_v17, %v1219_v51  ;;  %v1506_v60 = vrot.slane %v11721_v55, %v11087_v16  ;;  %505 = vadd.xlane.f32.xlu1 %v15386_v34  ;;  %v4596_v39 = vrot.slane %v12003_v31, %v11326_v13  ;;  %v10300_v17 = vld [vmem:[%s15051_s1 + $0x334] ss:$24 sps:$4 sm:$0xff]   ;;  %v296_v21 = vpop.xlane.xlu1 %295  ;;  %v293_v31 = vpop.xlane.xlu0 %292 }
  0xfc   :  { %15383 = vst [vmem:[#allocation41_spill] sm:$0xff] %v12034_v25  ;;  %15384 = vst [vmem:[#allocation42_spill] sm:$0xff] %v12037_v19  ;;  %v4603_v4 = vrot.slane %v12005_v62, %v11326_v13  ;;  %v4783_v52 = vrot.slane %v12013_v2, %v11326_v13  ;;  %v1513_v36 = vrot.slane %v11721_v55, %v11106_v27  ;;  %502 = vadd.xlane.f32.xlu0 %v15387_v50 }
  0xfd   :  { %15385 = vst [vmem:[#allocation43_spill] sm:$0xff] %v12039_v42  ;;  %v7653_v14 = vpack.c.bf16 %v12034_v25, %v12039_v42  ;;  %v4790_v48 = vrot.slane %v4776_v9, %v11326_v13  ;;  %v1520_v62 = vrot.slane %v11721_v55, %v11288_v26  ;;  %v1527_v2 = vrot.slane %v11721_v55, %v11308_v20  ;;  %v10306_v9 = vld [vmem:[%s15051_s1 + $0x364] ss:$24 sps:$4 sm:$0xff]  }
  0xfe   :  { %v8024_v22 = vunpack.c.l.b16 %v7652_v30  ;;  %v8025_v12 = vunpack.c.h.b16 %v7652_v30  ;;  %v12066_v51 = vmul.f32 0.015625, %v296_v21  ;;  %v12068_v8 = vmul.f32 0.015625, %v293_v31  ;;  %9759 = vmatprep.subr.bf16.mxu0 %v10300_v17  ;;  %v10311_v30 = vld [vmem:[%s15051_s1 + $0x360] ss:$24 sps:$4 sm:$0xff]  }
  0xff   :  { %v8026_v37 = vunpack.c.l.b16 %v7653_v14  ;;  %v4630_v34 = vrot.slane %v4622_v61, %v11326_v13  ;;  %v4637_v55 = vrot.slane %v4623_v38, %v11326_v13  ;;  %v12075_v50 = vcombine.low %v1506_v60, %v1513_v36  ;;  %9760 = vmatpush1.bf16.msra.mxu0 %v10305_v40  ;;  %v15390_v31 = vld [vmem:[#allocation46_spill] sm:$0xff]  ;;  %v15392_v38 = vld [vmem:[#allocation47_spill] sm:$0xff]  ;;  %v302_v60 = vpop.xlane.xlu1 %301  ;;  %v299_v36 = vpop.xlane.xlu0 %298 }
 0x100   :  { %15388 = vst [vmem:[#allocation44_spill] sm:$0xff] %v12066_v51  ;;  %15389 = vst [vmem:[#allocation45_spill] sm:$0xff] %v12068_v8  ;;  %v8027_v21 = vunpack.c.h.b16 %v7653_v14  ;;  %511 = vadd.xlane.f32.xlu1 %v15390_v31  ;;  %v12081_v17 = vcombine.low %v4749_v24, %v4756_v29  ;;  %v12083_v19 = vcombine.low %v1520_v62, %v1527_v2  ;;  %508 = vadd.xlane.f32.xlu0 %v15392_v38  ;;  %v10312_v38 = vld [vmem:[%s15051_s1 + $0x394] ss:$24 sps:$4 sm:$0xff]  }
 0x101   :  { %v1254_v42 = vrot.slane %v11591_v41, %v11087_v16  ;;  %v12089_v61 = vpack.c.bf16 %v12066_v51, %v12068_v8  ;;  %v1261_v14 = vrot.slane %v11591_v41, %v11106_v27  ;;  %v1268_v24 = vrot.slane %v11591_v41, %v11288_v26  ;;  %9761 = vmatprep.subr.bf16.mxu0 %v10306_v9 }
 0x102   :  { %v1275_v29 = vrot.slane %v11591_v41, %v11308_v20  ;;  %v12099_v62 = vrot.slane %v8024_v22, %v11071_v6  ;;  %v12102_v2 = vrot.slane %v8025_v12, %v11074_v7  ;;  %v12104_v40 = vcombine.low %v4596_v39, %v4603_v4  ;;  %v10317_v39 = vld [vmem:[%s15051_s1 + $0x390] ss:$24 sps:$4 sm:$0xff]  }
 0x103   :  { %15391 = vst [vmem:[#allocation46_spill] sm:$0xff] %v12089_v61  ;;  %v12106_v31 = vcombine.low %v4783_v52, %v4790_v48  ;;  %v12112_v8 = vrot.slane %v8026_v37, %v11170_v3  ;;  %v12114_v18 = vcombine.low %v4630_v34, %v4637_v55  ;;  %v4817_v41 = vrot.slane %v12075_v50, %v11326_v13  ;;  %v15397_v52 = vld [vmem:[#allocation48_spill] sm:$0xff]  ;;  %v15398_v34 = vld [vmem:[#allocation49_spill] sm:$0xff]  ;;  %v308_v55 = vpop.xlane.xlu1 %307  ;;  %v305_v50 = vpop.xlane.xlu0 %304 }
 0x104   :  { %15393 = vst [vmem:[#allocation47_spill] sm:$0xff] %v12099_v62  ;;  %15394 = vst [vmem:[#allocation77_spill] sm:$0xff] %v12102_v2  ;;  %v1562_v22 = vrot.slane %v11752_v35, %v11087_v16  ;;  %9762 = vmatpush1.bf16.msra.mxu0 %v10311_v30  ;;  %v12124_v4 = vrot.slane %v8027_v21, %v11249_v1  ;;  %517 = vadd.xlane.f32.xlu1 %v15397_v52 }
 0x105   :  { %15395 = vst [vmem:[#allocation78_spill] sm:$0xff] %v12112_v8  ;;  %v1569_v48 = vrot.slane %v11752_v35, %v11106_v27  ;;  %v1576_v12 = vrot.slane %v11752_v35, %v11288_v26  ;;  %v1583_v9 = vrot.slane %v11752_v35, %v11308_v20  ;;  %514 = vadd.xlane.f32.xlu0 %v15398_v34  ;;  %v12139_v8 = vmul.f32 0.015625, %v305_v50  ;;  %v10318_v34 = vld [vmem:[%s15051_s1 + $0x3c4] ss:$24 sps:$4 sm:$0xff]  }
 0x106   :  { %15396 = vst [vmem:[#allocation79_spill] sm:$0xff] %v12124_v4  ;;  %v4824_v30 = vrot.slane %v12083_v19, %v11326_v13  ;;  %v4656_v21 = vcombine.low %v1254_v42, %v1261_v14  ;;  %v4657_v52 = vcombine.low %v1268_v24, %v1275_v29  ;;  %v12137_v4 = vmul.f32 0.015625, %v308_v55  ;;  %9763 = vmatprep.subr.bf16.mxu0 %v10312_v38  ;;  %v10323_v14 = vld [vmem:[%s15051_s1 + $0x3c0] ss:$24 sps:$4 sm:$0xff]  }
 0x107   :  { %15400 = vst [vmem:[#allocation49_spill] sm:$0xff] %v12139_v8  ;;  %v1310_v2 = vrot.slane %v11624_v44, %v11087_v16  ;;  %v1317_v35 = vrot.slane %v11624_v44, %v11106_v27  ;;  %v4843_v37 = vcombine.low %v1562_v22, %v1569_v48  ;;  %v4844_v62 = vcombine.low %v1576_v12, %v1583_v9  ;;  %v15402_v22 = vld [vmem:[#allocation50_spill] sm:$0xff]  ;;  %v311_v9 = vpop.xlane.xlu0 %310 }
 0x108   :  { %15399 = vst [vmem:[#allocation48_spill] sm:$0xff] %v12137_v4  ;;  %v1324_v19 = vrot.slane %v11624_v44, %v11288_v26  ;;  %v1331_v42 = vrot.slane %v11624_v44, %v11308_v20  ;;  %9764 = vmatpush1.bf16.msra.mxu0 %v10317_v39  ;;  %v12156_v29 = vmul.f32 0.015625, %v302_v60  ;;  %v7656_v38 = vpack.c.bf16 %v12137_v4, %v12139_v8  ;;  %v15404_v44 = vld [vmem:[#allocation51_spill] sm:$0xff]  ;;  %v314_v39 = vpop.xlane.xlu1 %313 }
 0x109   :  { %523 = vadd.xlane.f32.xlu1 %v15402_v22  ;;  %v1618_v48 = vrot.slane %v11784_v23, %v11087_v16  ;;  %v12163_v12 = vmul.f32 0.015625, %v299_v36  ;;  %520 = vadd.xlane.f32.xlu0 %v15404_v44  ;;  %v4664_v55 = vrot.slane %v4656_v21, %v11326_v13  ;;  %v4671_v50 = vrot.slane %v4657_v52, %v11326_v13  ;;  %v10324_v36 = vld [vmem:[%s15051_s1 + $0x3f4] ss:$24 sps:$4 sm:$0xff]  }
 0x10a   :  { %15401 = vst [vmem:[#allocation80_spill] sm:$0xff] %v12156_v29  ;;  %v1625_v60 = vrot.slane %v11784_v23, %v11106_v27  ;;  %v8032_v24 = vunpack.c.l.b16 %v7656_v38  ;;  %v8033_v61 = vunpack.c.h.b16 %v7656_v38  ;;  %v12170_v8 = vmul.f32 0.015625, %v314_v39  ;;  %9765 = vmatprep.subr.bf16.mxu0 %v10318_v34  ;;  %v10329_v38 = vld [vmem:[%s15051_s1 + $0x3f0] ss:$24 sps:$4 sm:$0xff]  }
 0x10b   :  { %15403 = vst [vmem:[#allocation50_spill] sm:$0xff] %v12163_v12  ;;  %v12172_v22 = vmul.f32 0.015625, %v311_v9  ;;  %v4851_v44 = vrot.slane %v4843_v37, %v11326_v13  ;;  %v4858_v21 = vrot.slane %v4844_v62, %v11326_v13  ;;  %v12179_v4 = vcombine.low %v1310_v2, %v1317_v35  ;;  %v15407_v39 = vld [vmem:[#allocation52_spill] sm:$0xff] }
 0x10c   :  { %15405 = vst [vmem:[#allocation51_spill] sm:$0xff] %v12170_v8  ;;  %v12181_v52 = vcombine.low %v1324_v19, %v1331_v42  ;;  %9766 = vmatpush1.bf16.msra.mxu0 %v10323_v14  ;;  %v1632_v9 = vrot.slane %v11784_v23, %v11288_v26  ;;  %v1639_v62 = vrot.slane %v11784_v23, %v11308_v20  ;;  %v15409_v19 = vld [vmem:[#allocation53_spill] sm:$0xff]  ;;  %v320_v42 = vpop.xlane.xlu1 %319  ;;  %v317_v14 = vpop.xlane.xlu0 %316 }
 0x10d   :  { %15406 = vst [vmem:[#allocation81_spill] sm:$0xff] %v12172_v22  ;;  %v7657_v34 = vpack.c.bf16 %v12170_v8, %v12172_v22  ;;  %529 = vadd.xlane.f32.xlu1 %v15407_v39  ;;  %v12193_v2 = vcombine.low %v1618_v48, %v1625_v60  ;;  %v12197_v37 = vpack.c.bf16 %v12156_v29, %v12163_v12  ;;  %v12206_v48 = vmul.f32 0.015625, %v320_v42 }
 0x10e   :  { %v8352_v35 = vrot.slane %v8032_v24, %v10988_v33  ;;  %526 = vadd.xlane.f32.xlu0 %v15409_v19  ;;  %v12201_v22 = vcombine.low %v4817_v41, %v4824_v30  ;;  %v12203_v39 = vcombine.low %v4664_v55, %v4671_v50  ;;  %v8356_v8 = vrot.slane %v8033_v61, %v11015_v46  ;;  %v15412_v55 = vld [vmem:[#allocation54_spill] sm:$0xff] }
 0x10f   :  { %15408 = vst [vmem:[#allocation52_spill] sm:$0xff] %v12197_v37  ;;  %v8034_v51 = vunpack.c.l.b16 %v7657_v34  ;;  %v8035_v23 = vunpack.c.h.b16 %v7657_v34  ;;  %15410 = vst [vmem:[#allocation53_spill] sm:$0xff] %v12206_v48  ;;  %9767 = vmatprep.subr.bf16.mxu0 %v10324_v36  ;;  %v12208_v60 = vmul.f32 0.015625, %v317_v14  ;;  %v12210_v37 = vcombine.low %v4851_v44, %v4858_v21  ;;  %v10330_v44 = vld [vmem:[%s15051_s1 + $0x424] ss:$24 sps:$4 sm:$0xff]  }
 0x110   :  { %v4698_v24 = vrot.slane %v12179_v4, %v11326_v13  ;;  %v4705_v41 = vrot.slane %v12181_v52, %v11326_v13  ;;  %9768 = vmatpush1.bf16.msra.mxu0 %v10329_v38  ;;  %v4878_v61 = vcombine.low %v1632_v9, %v1639_v62  ;;  %v4885_v50 = vrot.slane %v12193_v2, %v11326_v13  ;;  %v15413_v21 = vld [vmem:[#allocation55_spill] sm:$0xff]  ;;  %v326_v52 = vpop.xlane.xlu1 %325 }
 0x111   :  { %15411 = vst [vmem:[#allocation82_spill] sm:$0xff] %v12208_v60  ;;  %v8361_v30 = vrot.slane %v8034_v51, %v15334_v49  ;;  %535 = vadd.xlane.f32.xlu1 %v15412_v55  ;;  %v1366_v36 = vrot.slane %v11660_v15, %v11087_v16  ;;  %v7658_v4 = vpack.c.bf16 %v12206_v48, %v12208_v60  ;;  %v323_v51 = vpop.xlane.xlu0 %322  ;;  %v10335_v62 = vld [vmem:[%s15051_s1 + $0x420] ss:$24 sps:$4 sm:$0xff]   ;;  %v12239_v42 = vmul.f32 0.015625, %v326_v52  ;;  %v15417_v52 = vld [vmem:[#allocation57_spill] sm:$0xff] }
 0x112   :  { %532 = vadd.xlane.f32.xlu0 %v15413_v21  ;;  %v1373_v38 = vrot.slane %v11660_v15, %v11106_v27  ;;  %v1380_v34 = vrot.slane %v11660_v15, %v11288_v26  ;;  %v1387_v9 = vrot.slane %v11660_v15, %v11308_v20  ;;  %v8357_v2 = vsel %vm6955_vm1, %v8356_v8, %v8352_v35  ;;  %v15416_v35 = vld [vmem:[#allocation56_spill] sm:$0xff] }
 0x113   :  { %v8366_v19 = vrot.slane %v8035_v23, %v11012_v45  ;;  %15414 = vst [vmem:[#allocation54_spill] sm:$0xff] %v12239_v42  ;;  %v12241_v14 = vmul.f32 0.015625, %v323_v51  ;;  %9769 = vmatprep.subr.bf16.mxu0 %v10330_v44  ;;  %v8036_v55 = vunpack.c.l.b16 %v7658_v4  ;;  %v8037_v21 = vunpack.c.h.b16 %v7658_v4 }
 0x114   :  { %v1674_v60 = vrot.slane %v11879_v43, %v11087_v16  ;;  %v1681_v15 = vrot.slane %v11879_v43, %v11106_v27  ;;  %9770 = vmatpush1.bf16.msra.mxu0 %v10335_v62  ;;  %v8362_v12 = vsel %vm6962_vm2, %v8361_v30, %v8357_v2  ;;  %v1688_v23 = vrot.slane %v11879_v43, %v11288_v26  ;;  %v332_v51 = vpop.xlane.xlu1 %331 }
 0x115   :  { %15415 = vst [vmem:[#allocation55_spill] sm:$0xff] %v12241_v14  ;;  %v7659_v8 = vpack.c.bf16 %v12239_v42, %v12241_v14  ;;  %541 = vadd.xlane.f32.xlu1 %v15416_v35  ;;  %v1695_v44 = vrot.slane %v11879_v43, %v11308_v20  ;;  %v8371_v4 = vrot.slane %v8036_v55, %v11027_v53  ;;  %v329_v48 = vpop.xlane.xlu0 %328  ;;  %v12258_v14 = vmul.f32 0.015625, %v332_v51 }
 0x116   :  { %538 = vadd.xlane.f32.xlu0 %v15417_v52  ;;  %v4892_v62 = vrot.slane %v4878_v61, %v11326_v13  ;;  %v4724_v30 = vcombine.low %v1366_v36, %v1373_v38  ;;  %v4725_v2 = vcombine.low %v1380_v34, %v1387_v9  ;;  %v12260_v35 = vmul.f32 0.015625, %v329_v48  ;;  %v10336_v61 = vld [vmem:[%s15051_s1 + $0x454] ss:$24 sps:$4 sm:$0xff]  }
 0x117   :  { %v8038_v29 = vunpack.c.l.b16 %v7659_v8  ;;  %15418 = vst [vmem:[#allocation56_spill] sm:$0xff] %v12258_v14  ;;  %v1422_v42 = vrot.slane %v11692_v5, %v11087_v16  ;;  %v8367_v43 = vsel %vm6969_vm3, %v8366_v19, %v8362_v12  ;;  %v8376_v55 = vrot.slane %v8037_v21, %v11036_v57  ;;  %v10341_v12 = vld [vmem:[%s15051_s1 + $0x450] ss:$24 sps:$4 sm:$0xff]   ;;  %9771 = vmatprep.subr.bf16.mxu0 %v10336_v61 }
 0x118   :  { %15419 = vst [vmem:[#allocation57_spill] sm:$0xff] %v12260_v35  ;;  %v4911_v25 = vcombine.low %v1674_v60, %v1681_v15  ;;  %v1429_v52 = vrot.slane %v11692_v5, %v11106_v27  ;;  %v8372_v36 = vsel %vm6976_vm4, %v8371_v4, %v8367_v43  ;;  %v8039_v38 = vunpack.c.h.b16 %v7659_v8  ;;  %v338_v9 = vpop.xlane.xlu1 %337  ;;  %9772 = vmatpush1.bf16.msra.mxu0 %v10341_v12 }
 0x119   :  { %v8381_v48 = vrot.slane %v8038_v29, %v11039_v58  ;;  %v4912_v34 = vcombine.low %v1688_v23, %v1695_v44  ;;  %v7660_v60 = vpack.c.bf16 %v12258_v14, %v12260_v35  ;;  %v335_v19 = vpop.xlane.xlu0 %334  ;;  %v12278_v21 = vcombine.low %v4698_v24, %v4705_v41 }
 0x11a   :  { %v1436_v15 = vrot.slane %v11692_v5, %v11288_v26  ;;  %v1443_v8 = vrot.slane %v11692_v5, %v11308_v20  ;;  %v12284_v29 = vmul.f32 0.015625, %v338_v9  ;;  %v12286_v23 = vcombine.low %v4885_v50, %v4892_v62 }
 0x11b   :  { %v4732_v44 = vrot.slane %v4724_v30, %v11326_v13  ;;  %v4758_v4 = vcombine.low %v1422_v42, %v1429_v52  ;;  %v8377_v51 = vsel %vm6983_vm5, %v8376_v55, %v8372_v36  ;;  %v12290_v43 = vmul.f32 0.015625, %v335_v19 }
 0x11c   :  { %15420 = vst [vmem:[#allocation83_spill] sm:$0xff] %v12284_v29  ;;  %v4739_v24 = vrot.slane %v4725_v2, %v11326_v13  ;;  %v4759_v41 = vcombine.low %v1436_v15, %v1443_v8  ;;  %v8382_v35 = vsel %vm6990_vm6, %v8381_v48, %v8377_v51  ;;  %v8386_v5 = vrot.slane %v8039_v38, %v11054_v63  ;;  %v344_v30 = vpop.xlane.xlu1 %343  ;;  %v10347_v15 = vld [vmem:[%s15051_s1 + $0x480] ss:$24 sps:$4 sm:$0xff]  }
 0x11d   :  { %15421 = vst [vmem:[#allocation84_spill] sm:$0xff] %v12290_v43  ;;  %v4919_v61 = vrot.slane %v4911_v25, %v11326_v13  ;;  %v4926_v50 = vrot.slane %v4912_v34, %v11326_v13  ;;  %v8040_v62 = vunpack.c.l.b16 %v7660_v60  ;;  %v12299_v42 = vpack.c.bf16 %v12284_v29, %v12290_v43  ;;  %v341_v55 = vpop.xlane.xlu0 %340  ;;  %v10342_v34 = vld [vmem:[%s15051_s1 + $0x484] ss:$24 sps:$4 sm:$0xff]  }
 0x11e   :  { %v1730_v52 = vrot.slane %v11869_v59, %v11087_v16  ;;  %v1737_v2 = vrot.slane %v11869_v59, %v11106_v27  ;;  %v8041_v36 = vunpack.c.h.b16 %v7660_v60  ;;  %v4766_v38 = vrot.slane %v4758_v4, %v11326_v13  ;;  %9773 = vmatprep.subr.bf16.mxu0 %v10342_v34 }
 0x11f   :  { %15422 = vst [vmem:[#allocation85_spill] sm:$0xff] %v12299_v42  ;;  %v4773_v25 = vrot.slane %v4759_v41, %v11326_v13  ;;  %v1744_v48 = vrot.slane %v11869_v59, %v11288_v26  ;;  %v12312_v12 = vmul.f32 0.015625, %v344_v30  ;;  %v12314_v9 = vmul.f32 0.015625, %v341_v55  ;;  %9774 = vmatpush1.bf16.msra.mxu0 %v10347_v15 }
 0x120   :  { %v1751_v19 = vrot.slane %v11869_v59, %v11308_v20  ;;  %v1478_v60 = vrot.slane %v11723_v0, %v11087_v16  ;;  %v12324_v8 = vsel %vm6997_vm7, %v8386_v5, %v8382_v35  ;;  %v12326_v4 = vcombine.low %v4732_v44, %v4739_v24  ;;  %v350_v30 = vpop.xlane.xlu1 %349 }
 0x121   :  { %15423 = vst [vmem:[#allocation86_spill] sm:$0xff] %v12312_v12  ;;  %15424 = vst [vmem:[#allocation87_spill] sm:$0xff] %v12314_v9  ;;  %v1485_v51 = vrot.slane %v11723_v0, %v11106_v27  ;;  %v1492_v41 = vrot.slane %v11723_v0, %v11288_v26  ;;  %v8042_v59 = vunpack.c.l.b16 %v12299_v42  ;;  %v12333_v55 = vpop.xlane.xlu0 %346  ;;  %v12335_v43 = vcombine.low %v4919_v61, %v4926_v50 }
 0x122   :  { %15425 = vst [vmem:[#allocation88_spill] sm:$0xff] %v12324_v8  ;;  %15426 = vst [vmem:[#allocation89_spill] sm:$0xff] %v12333_v55  ;;  %v4945_v29 = vcombine.low %v1730_v52, %v1737_v2  ;;  %v1499_v35 = vrot.slane %v11723_v0, %v11308_v20  ;;  %v12340_v44 = vrot.slane %v8040_v62, %v11071_v6  ;;  %v15480_v55 = vld [vmem:[#allocation73_spill] sm:$0xff] }
 0x123   :  { %v12343_v24 = vrot.slane %v8041_v36, %v11074_v7  ;;  %v12346_v34 = vcombine.low %v4766_v38, %v4773_v25  ;;  %v12350_v8 = vpack.c.bf16 %v12312_v12, %v12314_v9  ;;  %v4946_v61 = vcombine.low %v1744_v48, %v1751_v19  ;;  %v10348_v38 = vld [vmem:[%s15051_s1 + $0x4b4] ss:$24 sps:$4 sm:$0xff]  }
 0x124   :  { %15427 = vst [vmem:[#allocation90_spill] sm:$0xff] %v12340_v44  ;;  %v4792_v50 = vcombine.low %v1478_v60, %v1485_v51  ;;  %v1786_v0 = vrot.slane %v11898_v10, %v11087_v16  ;;  %v4793_v52 = vcombine.low %v1492_v41, %v1499_v35  ;;  %v1793_v62 = vrot.slane %v11898_v10, %v11106_v27  ;;  %v356_v19 = vpop.xlane.xlu1 %355 }
 0x125   :  { %15428 = vst [vmem:[#allocation91_spill] sm:$0xff] %v12343_v24  ;;  %15429 = vst [vmem:[#allocation92_spill] sm:$0xff] %v12346_v34  ;;  %v1800_v2 = vrot.slane %v11898_v10, %v11288_v26  ;;  %v1807_v36 = vrot.slane %v11898_v10, %v11308_v20  ;;  %v12364_v25 = vrot.slane %v8042_v59, %v11170_v3  ;;  %v12366_v48 = vmul.f32 0.015625, %v350_v30  ;;  %v353_v60 = vpop.xlane.xlu0 %352  ;;  %v10353_v10 = vld [vmem:[%s15051_s1 + $0x4b0] ss:$24 sps:$4 sm:$0xff]  }
 0x126   :  { %15430 = vst [vmem:[#allocation93_spill] sm:$0xff] %v12350_v8  ;;  %6564 = vperm.xlu1 %10245, %v11509_v28   ;;  %v4953_v15 = vrot.slane %v4945_v29, %v11326_v13  ;;  %v1534_v51 = vrot.slane %v11761_v32, %v11087_v16  ;;  %v12375_v41 = vmul.f32 0.015625, %v356_v19  ;;  %v12377_v35 = vmul.f32 0.015625, %v353_v60  ;;  %9775 = vmatprep.subr.bf16.mxu0 %v10348_v38  ;;  %v15454_v8 = vld [vmem:[#allocation32_spill] sm:$0xff] }
 0x127   :  { %15431 = vst [vmem:[#allocation94_spill] sm:$0xff] %v12364_v25  ;;  %15432 = vst [vmem:[#allocation95_spill] sm:$0xff] %v12366_v48  ;;  %v4979_v59 = vcombine.low %v1786_v0, %v1793_v62  ;;  %v4980_v30 = vcombine.low %v1800_v2, %v1807_v36  ;;  %v4960_v5 = vrot.slane %v4946_v61, %v11326_v13  ;;  %9776 = vmatpush1.bf16.msra.mxu0 %v10353_v10 }
 0x128   :  { %15433 = vst [vmem:[#allocation96_spill] sm:$0xff] %v12375_v41  ;;  %15434 = vst [vmem:[#allocation97_spill] sm:$0xff] %v12377_v35  ;;  %v1541_v28 = vrot.slane %v11761_v32, %v11106_v27  ;;  %v1548_v29 = vrot.slane %v11761_v32, %v11288_v26  ;;  %v1555_v25 = vrot.slane %v11761_v32, %v11308_v20  ;;  %v362_v61 = vpop.xlane.xlu1 %361 }
 0x129   :  { %v7664_v19 = vpack.c.bf16 %v12375_v41, %v12377_v35  ;;  %v4800_v60 = vrot.slane %v4792_v50, %v11326_v13  ;;  %v4807_v0 = vrot.slane %v4793_v52, %v11326_v13  ;;  %v4987_v62 = vrot.slane %v4979_v59, %v11326_v13  ;;  %v359_v2 = vpop.xlane.xlu0 %358  ;;  %v15437_v59 = vld [vmem:[#allocation63_spill] sm:$0xff] }
 0x12a   :  { %6567 = vperm.xlu1 %10245, %v11511_v11   ;;  %v4994_v36 = vrot.slane %v4980_v30, %v11326_v13  ;;  %v12393_v38 = vcombine.low %v1534_v51, %v1541_v28  ;;  %v1842_v32 = vrot.slane %v11933_v47, %v11087_v16  ;;  %v1849_v10 = vrot.slane %v11933_v47, %v11106_v27  ;;  %v10354_v28 = vld [vmem:[%s15051_s1 + $0x4e4] ss:$24 sps:$4 sm:$0xff]  }
 0x12b   :  { %v8048_v35 = vunpack.c.l.b16 %v7664_v19  ;;  %v8049_v50 = vunpack.c.h.b16 %v7664_v19  ;;  %v12399_v24 = vmul.f32 0.015625, %v362_v61  ;;  %v12401_v52 = vmul.f32 0.015625, %v359_v2  ;;  %v15440_v2 = vld [vmem:[#allocation68_spill] sm:$0xff]  ;;  %9777 = vmatprep.subr.bf16.mxu0 %v10354_v28 }
 0x12c   :  { %6561 = vperm.xlu0 %10244, %v15437_v59   ;;  %v12404_v11 = vcombine.low %v4953_v15, %v4960_v5  ;;  %v12406_v44 = vcombine.low %v1548_v29, %v1555_v25  ;;  %v1856_v51 = vrot.slane %v11933_v47, %v11288_v26  ;;  %v1863_v30 = vrot.slane %v11933_v47, %v11308_v20  ;;  %v10359_v25 = vld [vmem:[%s15051_s1 + $0x4e0] ss:$24 sps:$4 sm:$0xff]   ;;  %v368_v29 = vpop.xlane.xlu1 %367 }
 0x12d   :  { %15435 = vst [vmem:[#allocation98_spill] sm:$0xff] %v12399_v24  ;;  %15436 = vst [vmem:[#allocation99_spill] sm:$0xff] %v12401_v52  ;;  %v8431_v19 = vrot.slane %v8048_v35, %v10988_v33  ;;  %v8435_v61 = vrot.slane %v8049_v50, %v11015_v46  ;;  %v7665_v5 = vpack.c.bf16 %v12399_v24, %v12401_v52  ;;  %v365_v47 = vpop.xlane.xlu0 %364  ;;  %v15442_v50 = vld [vmem:[#allocation22_spill] sm:$0xff]  ;;  %v12433_v24 = vmul.f32 0.015625, %v368_v29 }
 0x12e   :  { %15438 = vst [vmem:[#allocation63_spill] sm:$0xff] %v12404_v11  ;;  %v12419_v15 = vcombine.low %v4800_v60, %v4807_v0  ;;  %6570 = vperm.xlu1 %10245, %v15440_v2   ;;  %v12425_v59 = vcombine.low %v4987_v62, %v4994_v36  ;;  %v1590_v9 = vrot.slane %v15442_v50, %v11087_v16  ;;  %v12437_v2 = vmul.f32 0.015625, %v365_v47  ;;  %v15445_v62 = vld [vmem:[#allocation71_spill] sm:$0xff]  ;;  %v15496_v11 = vld [vmem:[#allocation70_spill] sm:$0xff] }
 0x12f   :  { %v1597_v60 = vrot.slane %v15442_v50, %v11106_v27  ;;  %v8050_v0 = vunpack.c.l.b16 %v7665_v5  ;;  %v8051_v52 = vunpack.c.h.b16 %v7665_v5  ;;  %15443 = vst [vmem:[#allocation22_spill] sm:$0xff] %v12433_v24  ;;  %v12435_v41 = vcombine.low %v1842_v32, %v1849_v10  ;;  %9778 = vmatpush1.bf16.msra.mxu0 %v10359_v25 }
 0x130   :  { %15439 = vst [vmem:[#allocation100_spill] sm:$0xff] %v12419_v15  ;;  %15441 = vst [vmem:[#allocation68_spill] sm:$0xff] %v12425_v59  ;;  %6588 = vperm.xlu0 %10244, %v15445_v62   ;;  %v12442_v35 = vcombine.low %v1856_v51, %v1863_v30  ;;  %v1604_v12 = vrot.slane %v15442_v50, %v11288_v26  ;;  %v8436_v5 = vsel %vm6955_vm1, %v8435_v61, %v8431_v19  ;;  %v374_v47 = vpop.xlane.xlu1 %373  ;;  %v15446_v62 = vld [vmem:[#allocation72_spill] sm:$0xff]  ;;  %v15486_v15 = vld [vmem:[#allocation67_spill] sm:$0xff] }
 0x131   :  { %15444 = vst [vmem:[#allocation101_spill] sm:$0xff] %v12437_v2  ;;  %v8440_v29 = vrot.slane %v8050_v0, %v15334_v49  ;;  %v8445_v32 = vrot.slane %v8051_v52, %v11012_v45  ;;  %v1611_v10 = vrot.slane %v15442_v50, %v11308_v20  ;;  %v7666_v28 = vpack.c.bf16 %v12433_v24, %v12437_v2  ;;  %v371_v51 = vpop.xlane.xlu0 %370  ;;  %v10360_v52 = vld [vmem:[%s15051_s1 + $0x514] ss:$24 sps:$4 sm:$0xff]   ;;  %v15449_v2 = vld [vmem:[#allocation19_spill] sm:$0xff]  ;;  %v15485_v59 = vld [vmem:[#allocation60_spill] sm:$0xff] }
 0x132   :  { %6573 = vperm.xlu1 %10245, %v15446_v62   ;;  %v4860_v30 = vcombine.low %v1590_v9, %v1597_v60  ;;  %v1898_v25 = vrot.slane %v11967_v54, %v11087_v16  ;;  %v1905_v19 = vrot.slane %v11967_v54, %v11106_v27  ;;  %v12462_v50 = vmul.f32 0.015625, %v374_v47  ;;  %v10365_v9 = vld [vmem:[%s15051_s1 + $0x510] ss:$24 sps:$4 sm:$0xff]   ;;  %9779 = vmatprep.subr.bf16.mxu0 %v10360_v52 }
 0x133   :  { %v8441_v61 = vsel %vm6962_vm2, %v8440_v29, %v8436_v5  ;;  %v12464_v0 = vmul.f32 0.015625, %v371_v51  ;;  %v5021_v62 = vrot.slane %v12435_v41, %v11326_v13  ;;  %v8052_v60 = vunpack.c.l.b16 %v7666_v28  ;;  %9780 = vmatpush1.bf16.msra.mxu0 %v10365_v9  ;;  %v15453_v9 = vld [vmem:[#allocation25_spill] sm:$0xff] }
 0x134   :  { %15447 = vst [vmem:[#allocation71_spill] sm:$0xff] %v12462_v50  ;;  %v8053_v36 = vunpack.c.h.b16 %v7666_v28  ;;  %6594 = vperm.xlu0 %10244, %v15449_v2   ;;  %v5028_v24 = vrot.slane %v12442_v35, %v11326_v13  ;;  %v4861_v14 = vcombine.low %v1604_v12, %v1611_v10  ;;  %v8446_v5 = vsel %vm6969_vm3, %v8445_v32, %v8441_v61  ;;  %v380_v51 = vpop.xlane.xlu1 %379  ;;  %v15450_v35 = vld [vmem:[#allocation23_spill] sm:$0xff] }
 0x135   :  { %15448 = vst [vmem:[#allocation72_spill] sm:$0xff] %v12464_v0  ;;  %v7667_v29 = vpack.c.bf16 %v12462_v50, %v12464_v0  ;;  %v1912_v41 = vrot.slane %v11967_v54, %v11288_v26  ;;  %v1919_v47 = vrot.slane %v11967_v54, %v11308_v20  ;;  %v8450_v28 = vrot.slane %v8052_v60, %v11027_v53  ;;  %v377_v12 = vpop.xlane.xlu0 %376 }
 0x136   :  { %v8455_v2 = vrot.slane %v8053_v36, %v11036_v57  ;;  %6576 = vperm.xlu1 %10245, %v15450_v35   ;;  %v4868_v32 = vrot.slane %v4860_v30, %v11326_v13  ;;  %v5047_v10 = vcombine.low %v1898_v25, %v1905_v19  ;;  %v12485_v0 = vmul.f32 0.015625, %v380_v51  ;;  %v10366_v30 = vld [vmem:[%s15051_s1 + $0x544] ss:$24 sps:$4 sm:$0xff]  }
 0x137   :  { %v8054_v52 = vunpack.c.l.b16 %v7667_v29  ;;  %v8055_v61 = vunpack.c.h.b16 %v7667_v29  ;;  %v12487_v50 = vmul.f32 0.015625, %v377_v12  ;;  %v8451_v54 = vsel %vm6976_vm4, %v8450_v28, %v8446_v5  ;;  %v15455_v28 = vld [vmem:[#allocation26_spill] sm:$0xff]  ;;  %9781 = vmatprep.subr.bf16.mxu0 %v10366_v30 }
 0x138   :  { %15451 = vst [vmem:[#allocation19_spill] sm:$0xff] %v12485_v0  ;;  %6600 = vperm.xlu0 %10244, %v15453_v9   ;;  %v4875_v60 = vrot.slane %v4861_v14, %v11326_v13  ;;  %v5048_v36 = vcombine.low %v1912_v41, %v1919_v47  ;;  %v1646_v35 = vrot.slane %v15454_v8, %v11087_v16  ;;  %v10371_v14 = vld [vmem:[%s15051_s1 + $0x540] ss:$24 sps:$4 sm:$0xff]   ;;  %v386_v47 = vpop.xlane.xlu1 %385 }
 0x139   :  { %15452 = vst [vmem:[#allocation23_spill] sm:$0xff] %v12487_v50  ;;  %v8456_v25 = vsel %vm6983_vm5, %v8455_v2, %v8451_v54  ;;  %v8460_v19 = vrot.slane %v8054_v52, %v11039_v58  ;;  %v7668_v29 = vpack.c.bf16 %v12485_v0, %v12487_v50  ;;  %v5055_v5 = vrot.slane %v5047_v10, %v11326_v13  ;;  %v383_v51 = vpop.xlane.xlu0 %382  ;;  %v15458_v50 = vld [vmem:[#allocation27_spill] sm:$0xff] }
 0x13a   :  { %v8465_v41 = vrot.slane %v8055_v61, %v11054_v63  ;;  %6579 = vperm.xlu1 %10245, %v15455_v28   ;;  %v1653_v2 = vrot.slane %v15454_v8, %v11106_v27  ;;  %v1660_v12 = vrot.slane %v15454_v8, %v11288_v26  ;;  %v1667_v52 = vrot.slane %v15454_v8, %v11308_v20 }
 0x13b   :  { %v8461_v10 = vsel %vm6990_vm6, %v8460_v19, %v8456_v25  ;;  %v8056_v54 = vunpack.c.l.b16 %v7668_v29  ;;  %v12514_v9 = vmul.f32 0.015625, %v386_v47  ;;  %v5062_v61 = vrot.slane %v5048_v36, %v11326_v13  ;;  %9782 = vmatpush1.bf16.msra.mxu0 %v10371_v14 }
 0x13c   :  { %v12517_v28 = vmul.f32 0.015625, %v383_v51  ;;  %6606 = vperm.xlu0 %10244, %v15458_v50   ;;  %v15459_v0 = vrot.slane %v12406_v44, %v11326_v13  ;;  %v15460_v8 = vrot.slane %v12393_v38, %v11326_v13  ;;  %v12528_v25 = vcombine.low %v5021_v62, %v5028_v24  ;;  %v10372_v44 = vld [vmem:[%s15051_s1 + $0x574] ss:$24 sps:$4 sm:$0xff]  }
 0x13d   :  { %15456 = vst [vmem:[#allocation25_spill] sm:$0xff] %v12514_v9  ;;  %v12530_v19 = vcombine.low %v4868_v32, %v4875_v60  ;;  %v8057_v36 = vunpack.c.h.b16 %v7668_v29  ;;  %v12532_v30 = vcombine.low %v1646_v35, %v1653_v2  ;;  %v12534_v47 = vcombine.low %v1660_v12, %v1667_v52  ;;  %v15464_v62 = vld [vmem:[#allocation30_spill] sm:$0xff]  ;;  %9783 = vmatprep.subr.bf16.mxu0 %v10372_v44 }
 0x13e   :  { %15457 = vst [vmem:[#allocation32_spill] sm:$0xff] %v12517_v28  ;;  %v12526_v48 = vcombine.low %v15460_v8, %v15459_v0  ;;  %15462 = vst [vmem:[#allocation27_spill] sm:$0xff] %v12528_v25  ;;  %v1954_v50 = vrot.slane %v11998_v56, %v11087_v16  ;;  %v12542_v24 = vsel %vm6997_vm7, %v8465_v41, %v8461_v10  ;;  %v392_v0 = vpop.xlane.xlu1 %391  ;;  %6582 = vperm.xlu1 %10245, %v15464_v62   ;;  %v10377_v35 = vld [vmem:[%s15051_s1 + $0x570] ss:$24 sps:$4 sm:$0xff]   ;;  %v389_v41 = vpop.xlane.xlu0 %388 }
 0x13f   :  { %15463 = vst [vmem:[#allocation102_spill] sm:$0xff] %v12530_v19  ;;  %v7669_v38 = vpack.c.bf16 %v12514_v9, %v12517_v28  ;;  %v1961_v32 = vrot.slane %v11998_v56, %v11106_v27  ;;  %v1968_v60 = vrot.slane %v11998_v56, %v11288_v26  ;;  %v12555_v29 = vrot.slane %v8056_v54, %v11071_v6  ;;  %v15468_v8 = vld [vmem:[#allocation36_spill] sm:$0xff]  ;;  %v15484_v25 = vld [vmem:[#allocation74_spill] sm:$0xff] }
 0x140   :  { %15461 = vst [vmem:[#allocation26_spill] sm:$0xff] %v12526_v48  ;;  %v12557_v14 = vmul.f32 0.015625, %v392_v0  ;;  %v12559_v51 = vcombine.low %v5055_v5, %v5062_v61  ;;  %v1975_v2 = vrot.slane %v11998_v56, %v11308_v20  ;;  %v12563_v10 = vmul.f32 0.015625, %v389_v41  ;;  %6612 = vperm.xlu0 %10244, %v15468_v8   ;;  %9784 = vmatpush1.bf16.msra.mxu0 %v10377_v35  ;;  %v15469_v0 = vld [vmem:[#allocation37_spill] sm:$0xff]  ;;  %v15472_v8 = vld [vmem:[#allocation20_spill] sm:$0xff]  ;;  %v15474_v56 = vld [vmem:[#allocation58_spill] sm:$0xff] }
 0x141   :  { %v8058_v12 = vunpack.c.l.b16 %v7669_v38  ;;  %v8059_v52 = vunpack.c.h.b16 %v7669_v38  ;;  %v12566_v62 = vcombine.low %v1954_v50, %v1961_v32  ;;  %v12569_v54 = vrot.slane %v8057_v36, %v11074_v7  ;;  %v15470_v36 = vld [vmem:[#allocation34_spill] sm:$0xff] }
 0x142   :  { %15465 = vst [vmem:[#allocation30_spill] sm:$0xff] %v12557_v14  ;;  %15466 = vst [vmem:[#allocation103_spill] sm:$0xff] %v12559_v51  ;;  %v12575_v61 = vcombine.low %v1968_v60, %v1975_v2  ;;  %v12582_v50 = vpack.c.bf16 %v12557_v14, %v12563_v10  ;;  %v398_v38 = vpop.xlane.xlu1 %397  ;;  %6585 = vperm.xlu1 %10245, %v15469_v0   ;;  %v8014_v32 = vunpack.c.l.b16 %v15470_v36  ;;  %v8015_v35 = vunpack.c.h.b16 %v15470_v36  ;;  %v395_v2 = vpop.xlane.xlu0 %394  ;;  %v10378_v0 = vld [vmem:[%s15051_s1 + $0x5a4] ss:$24 sps:$4 sm:$0xff]  }
 0x143   :  { %15467 = vst [vmem:[#allocation104_spill] sm:$0xff] %v12563_v10  ;;  %v12578_v44 = vrot.slane %v8058_v12, %v11170_v3  ;;  %v12588_v41 = vrot.slane %v8059_v52, %v11249_v1  ;;  %v12590_v60 = vmul.f32 0.015625, %v398_v38  ;;  %v15473_v12 = vld [vmem:[#allocation28_spill] sm:$0xff]  ;;  %v12601_v9 = vmul.f32 0.015625, %v395_v2  ;;  %v15481_v51 = vld [vmem:[#allocation59_spill] sm:$0xff]  ;;  %9785 = vmatprep.subr.bf16.mxu0 %v10378_v0 }
 0x144   :  { %v8234_v5 = vsel %vm7004_vm8, %v15473_v12, %v15472_v8  ;;  %v15475_v10 = vld [vmem:[#allocation24_spill] sm:$0xff]  ;;  %v15479_v8 = vld [vmem:[#allocation29_spill] sm:$0xff]  ;;  %v8060_v42 = vunpack.c.l.b16 %v12582_v50  ;;  %v8061_v2 = vunpack.c.h.b16 %v12582_v50  ;;  %v8263_v50 = vrot.slane %v8014_v32, %v15485_v59 }
 0x145   :  { %15471 = vst [vmem:[#allocation36_spill] sm:$0xff] %v12590_v60  ;;  %v15476_v28 = vunpack.c.l.b16 %v15475_v10  ;;  %15477 = vst [vmem:[#allocation37_spill] sm:$0xff] %v12601_v9  ;;  %v15478_v36 = vld [vmem:[#allocation76_spill] sm:$0xff]  ;;  %v8239_v12 = vsel %vm7011_vm9, %v15479_v8, %v8234_v5  ;;  %v15482_v52 = vunpack.c.h.b16 %v15475_v10  ;;  %v12622_v38 = vpack.c.bf16 %v12590_v60, %v12601_v9  ;;  %v15483_v8 = vld [vmem:[#allocation38_spill] sm:$0xff] }
 0x146   :  { %6618 = vperm.xlu0 %10244, %v15478_v36   ;;  %v8244_v36 = vsel %vm7018_vm10, %v15480_v55, %v8239_v12  ;;  %v404_v5 = vpop.xlane.xlu1 %403  ;;  %6591 = vperm.xlu1 %10245, %v15483_v8   ;;  %v7998_v1 = vunpack.c.l.b16 %v15486_v15  ;;  %v401_v10 = vpop.xlane.xlu0 %400  ;;  %v15487_v12 = vld [vmem:[#allocation62_spill] sm:$0xff]  ;;  %v15488_v9 = vld [vmem:[#allocation64_spill] sm:$0xff]  ;;  %v15490_v32 = vld [vmem:[#allocation61_spill] sm:$0xff] }
 0x147   :  { %v8253_v14 = vrot.slane %v15476_v28, %v15474_v56  ;;  %v10383_v28 = vld [vmem:[%s15051_s1 + $0x5a0] ss:$24 sps:$4 sm:$0xff]   ;;  %v8258_v19 = vrot.slane %v15482_v52, %v15481_v51  ;;  %v8249_v48 = vsel %vm7025_vm11, %v15484_v25, %v8244_v36  ;;  %v12629_v55 = vmul.f32 0.015625, %v404_v5  ;;  %v15492_v5 = vld [vmem:[#allocation65_spill] sm:$0xff] }
 0x148   :  { %9786 = vmatpush1.bf16.msra.mxu0 %v10383_v28  ;;  %v7999_v52 = vunpack.c.h.b16 %v15486_v15  ;;  %v8155_v60 = vsel %vm7004_vm8, %v15488_v9, %v15487_v12  ;;  %v12636_v8 = vmul.f32 0.015625, %v401_v10  ;;  %v12641_v36 = vrot.slane %v8015_v35, %v15490_v32 }
 0x149   :  { %v8254_v0 = vsel %vm7032_vm12, %v8253_v14, %v8249_v48  ;;  %v8062_v28 = vunpack.c.l.b16 %v12622_v38  ;;  %v10384_v48 = vld [vmem:[%s15051_s1 + $0x5d4] ss:$24 sps:$4 sm:$0xff]   ;;  %v8063_v15 = vunpack.c.h.b16 %v12622_v38  ;;  %v15493_v10 = vunpack.c.l.b16 %v15492_v5 }
 0x14a   :  { %15489 = vst [vmem:[#allocation34_spill] sm:$0xff] %v12636_v8  ;;  %6624 = vperm.xlu0 %10244, %v12081_v17   ;;  %v8259_v25 = vsel %vm7039_vm13, %v8258_v19, %v8254_v0  ;;  %v15491_v14 = vld [vmem:[#allocation66_spill] sm:$0xff]  ;;  %v15494_v19 = vunpack.c.h.b16 %v15492_v5  ;;  %v7672_v12 = vpack.c.bf16 %v12629_v55, %v12636_v8  ;;  %v410_v3 = vpop.xlane.xlu1 %409  ;;  %6597 = vperm.xlu1 %10245, %v12104_v40   ;;  %v15495_v38 = vld [vmem:[#allocation69_spill] sm:$0xff] }
 0x14b   :  { %v8160_v9 = vsel %vm7011_vm9, %v15491_v14, %v8155_v60  ;;  %v8174_v17 = vrot.slane %v15493_v10, %v15474_v56  ;;  %v10389_v0 = vld [vmem:[%s15051_s1 + $0x5d0] ss:$24 sps:$4 sm:$0xff]   ;;  %v12663_v60 = vsel %vm7046_vm14, %v8263_v50, %v8259_v25  ;;  %v8184_v10 = vrot.slane %v7998_v1, %v15485_v59  ;;  %9787 = vmatprep.subr.bf16.mxu0 %v10384_v48 }
 0x14c   :  { %v8179_v35 = vrot.slane %v15494_v19, %v15481_v51  ;;  %v8165_v14 = vsel %vm7018_vm10, %v15495_v38, %v8160_v9  ;;  %v12668_v5 = vmul.f32 0.015625, %v410_v3  ;;  %v407_v19 = vpop.xlane.xlu0 %406  ;;  %v8189_v34 = vrot.slane %v7999_v52, %v15490_v32  ;;  %9788 = vmatpush1.bf16.msra.mxu0 %v10389_v0 }
 0x14d   :  { %v8170_v7 = vsel %vm7025_vm11, %v15496_v11, %v8165_v14  ;;  %v8471_v40 = vsel %vm7004_vm8, %v12555_v29, %v12542_v24  ;;  %v8064_v50 = vunpack.c.l.b16 %v7672_v12  ;;  %v8065_v25 = vunpack.c.h.b16 %v7672_v12 }
 0x14e   :  { %v12676_v8 = vmul.f32 0.015625, %v407_v19  ;;  %6630 = vperm.xlu0 %10244, %v12106_v31   ;;  %v8175_v3 = vsel %vm7032_vm12, %v8174_v17, %v8170_v7  ;;  %v8476_v11 = vsel %vm7011_vm9, %v12569_v54, %v8471_v40  ;;  %v8490_v52 = vrot.slane %v8060_v42, %v15474_v56  ;;  %v416_v31 = vpop.xlane.xlu1 %415  ;;  %6603 = vperm.xlu1 %10245, %v12114_v18  }
 0x14f   :  { %v8180_v1 = vsel %vm7039_vm13, %v8179_v35, %v8175_v3  ;;  %v8495_v9 = vrot.slane %v8061_v2, %v15481_v51  ;;  %v8510_v24 = vrot.slane %v8064_v50, %v10988_v33  ;;  %v8514_v29 = vrot.slane %v8065_v25, %v11015_v46 }
 0x150   :  { %15497 = vst [vmem:[#allocation20_spill] sm:$0xff] %v12676_v8  ;;  %v7673_v48 = vpack.c.bf16 %v12668_v5, %v12676_v8  ;;  %v8185_v7 = vsel %vm7046_vm14, %v8184_v10, %v8180_v1  ;;  %v12691_v17 = vmul.f32 0.015625, %v416_v31  ;;  %v413_v54 = vpop.xlane.xlu0 %412  ;;  %v8481_v2 = vsel %vm7018_vm10, %v12578_v44, %v8476_v11 }
 0x151   :  { %v8190_v42 = vsel %vm7053_vm15, %v8189_v34, %v8185_v7  ;;  %v8500_v35 = vrot.slane %v8062_v28, %v15485_v59  ;;  %v8515_v0 = vsel %vm6955_vm1, %v8514_v29, %v8510_v24  ;;  %v12698_v14 = vmul.f32 0.015625, %v413_v54  ;;  %v15500_v34 = vld [vmem:[#allocation31_spill] sm:$0xff] }
 0x152   :  { %15498 = vst [vmem:[#allocation28_spill] sm:$0xff] %v12691_v17  ;;  %v8066_v12 = vunpack.c.l.b16 %v7673_v48  ;;  %v8067_v38 = vunpack.c.h.b16 %v7673_v48  ;;  %6636 = vperm.xlu0 %10244, %v12201_v22   ;;  %v8486_v18 = vsel %vm7025_vm11, %v12588_v41, %v8481_v2  ;;  %v8505_v10 = vrot.slane %v8063_v15, %v15490_v32  ;;  %v422_v25 = vpop.xlane.xlu1 %421  ;;  %6609 = vperm.xlu1 %10245, %v12203_v39  }
 0x153   :  { %15499 = vst [vmem:[#allocation58_spill] sm:$0xff] %v12698_v14  ;;  %v1702_v19 = vrot.slane %v15500_v34, %v11087_v16  ;;  %v1709_v44 = vrot.slane %v15500_v34, %v11106_v27  ;;  %v7674_v50 = vpack.c.bf16 %v12691_v17, %v12698_v14  ;;  %v8491_v22 = vsel %vm7032_vm12, %v8490_v52, %v8486_v18 }
 0x154   :  { %v8519_v28 = vrot.slane %v8066_v12, %v15334_v49  ;;  %v8524_v40 = vrot.slane %v8067_v38, %v11012_v45  ;;  %v12714_v41 = vmul.f32 0.015625, %v422_v25  ;;  %v419_v15 = vpop.xlane.xlu0 %418  ;;  %v8496_v3 = vsel %vm7039_vm13, %v8495_v9, %v8491_v22 }
 0x155   :  { %v1716_v1 = vrot.slane %v15500_v34, %v11288_v26  ;;  %v1723_v11 = vrot.slane %v15500_v34, %v11308_v20  ;;  %v8068_v29 = vunpack.c.l.b16 %v7674_v50  ;;  %v8069_v48 = vunpack.c.h.b16 %v7674_v50 }
 0x156   :  { %15501 = vst [vmem:[#allocation24_spill] sm:$0xff] %v12714_v41  ;;  %v8520_v24 = vsel %vm6962_vm2, %v8519_v28, %v8515_v0  ;;  %v12722_v31 = vmul.f32 0.015625, %v419_v15  ;;  %6642 = vperm.xlu0 %10244, %v12210_v37   ;;  %v15503_v39 = vrot.slane %v12534_v47, %v11326_v13  ;;  %v15504_v52 = vrot.slane %v12532_v30, %v11326_v13  ;;  %v428_v37 = vpop.xlane.xlu1 %427  ;;  %v10395_v30 = vld [vmem:[%s15051_s1 + $0x14] ss:$24 sps:$4 sm:$0xff]  }
 0x157   :  { %v8501_v7 = vsel %vm7046_vm14, %v8500_v35, %v8496_v3  ;;  %v4928_v54 = vcombine.low %v1702_v19, %v1709_v44  ;;  %v4929_v2 = vcombine.low %v1716_v1, %v1723_v11  ;;  %v8529_v0 = vrot.slane %v8068_v29, %v11027_v53  ;;  %6615 = vperm.xlu1 %10245, %v12278_v21   ;;  %v15509_v15 = vld [vmem:[#allocation41_spill] sm:$0xff] }
 0x158   :  { %15502 = vst [vmem:[#allocation76_spill] sm:$0xff] %v12722_v31  ;;  %v12731_v9 = vcombine.low %v15504_v52, %v15503_v39  ;;  %v8534_v12 = vrot.slane %v8069_v48, %v11036_v57  ;;  %v7675_v38 = vpack.c.bf16 %v12714_v41, %v12722_v31  ;;  %v8506_v47 = vsel %vm7053_vm15, %v8505_v10, %v8501_v7  ;;  %v425_v34 = vpop.xlane.xlu0 %424 }
 0x159   :  { %v8525_v35 = vsel %vm6969_vm3, %v8524_v40, %v8520_v24  ;;  %v12744_v18 = vmul.f32 0.015625, %v428_v37  ;;  %v15506_v19 = vrot.slane %v12575_v61, %v11326_v13  ;;  %v15507_v44 = vrot.slane %v12566_v62, %v11326_v13  ;;  %9880 = vmatprep.subr.bf16.mxu0 %v10395_v30 }
 0x15a   :  { %v12757_v21 = vsel %vm7053_vm15, %v12641_v36, %v12663_v60  ;;  %v8530_v10 = vsel %vm6976_vm4, %v8529_v0, %v8525_v35  ;;  %v8070_v50 = vunpack.c.l.b16 %v7675_v38  ;;  %v8071_v40 = vunpack.c.h.b16 %v7675_v38  ;;  %6648 = vperm.xlu0 %10244, %v12286_v23   ;;  %v434_v11 = vpop.xlane.xlu1 %433 }
 0x15b   :  { %15505 = vst [vmem:[#allocation29_spill] sm:$0xff] %v12744_v18  ;;  %v12752_v28 = vcombine.low %v15507_v44, %v15506_v19  ;;  %v12760_v25 = vmul.f32 0.015625, %v425_v34  ;;  %v8744_v61 = vsel %vm7608_vm0, %v8506_v47, %v8190_v42  ;;  %v4936_v62 = vrot.slane %v4928_v54, %v11326_v13  ;;  %6621 = vperm.xlu1 %10245, %v12326_v4   ;;  %v15513_v34 = vld [vmem:[#allocation92_spill] sm:$0xff] }
 0x15c   :  { %v4943_v22 = vrot.slane %v4929_v2, %v11326_v13  ;;  %v2010_v3 = vrot.slane %v15509_v15, %v11087_v16  ;;  %v8535_v36 = vsel %vm6983_vm5, %v8534_v12, %v8530_v10  ;;  %v8539_v60 = vrot.slane %v8070_v50, %v11039_v58  ;;  %v431_v29 = vpop.xlane.xlu0 %430  ;;  %v15512_v12 = vld [vmem:[#allocation33_spill] sm:$0xff]  ;;  %v15514_v10 = vld [vmem:[#allocation18_spill] sm:$0xff] }
 0x15d   :  { %15508 = vst [vmem:[#allocation73_spill] sm:$0xff] %v12760_v25  ;;  %v7676_v1 = vpack.c.bf16 %v12744_v18, %v12760_v25  ;;  %v2017_v23 = vrot.slane %v15509_v15, %v11106_v27  ;;  %v8544_v42 = vrot.slane %v8071_v40, %v11054_v63  ;;  %v12776_v24 = vmul.f32 0.015625, %v434_v11  ;;  %v15530_v25 = vld [vmem:[#allocation102_spill] sm:$0xff] }
 0x15e   :  { %v2024_v48 = vrot.slane %v15509_v15, %v11288_v26  ;;  %v2031_v39 = vrot.slane %v15509_v15, %v11308_v20  ;;  %v8540_v52 = vsel %vm6990_vm6, %v8539_v60, %v8535_v36  ;;  %v12783_v2 = vmul.f32 0.015625, %v431_v29  ;;  %6654 = vperm.xlu0 %10244, %v12335_v43   ;;  %v440_v35 = vpop.xlane.xlu1 %439 }
 0x15f   :  { %15510 = vst [vmem:[#allocation59_spill] sm:$0xff] %v12776_v24  ;;  %v8072_v7 = vunpack.c.l.b16 %v7676_v1  ;;  %v8073_v54 = vunpack.c.h.b16 %v7676_v1  ;;  %v12786_v4 = vpack.c.b16 %v8744_v61, %v8744_v61  ;;  %v5115_v0 = vcombine.low %v2010_v3, %v2017_v23  ;;  %6627 = vperm.xlu1 %10245, %v15513_v34   ;;  %v15517_v1 = vld [vmem:[#allocation63_spill] sm:$0xff] }
 0x160   :  { %15511 = vst [vmem:[#allocation38_spill] sm:$0xff] %v12783_v2  ;;  %v1758_v38 = vrot.slane %v15512_v12, %v11087_v16  ;;  %v1765_v37 = vrot.slane %v15512_v12, %v11106_v27  ;;  %v7677_v30 = vpack.c.bf16 %v12776_v24, %v12783_v2  ;;  %v5116_v19 = vcombine.low %v2024_v48, %v2031_v39  ;;  %v437_v61 = vpop.xlane.xlu0 %436  ;;  %v15518_v39 = vld [vmem:[#allocation21_spill] sm:$0xff] }
 0x161   :  { %v8549_v47 = vrot.slane %v8072_v7, %v11071_v6  ;;  %v1772_v43 = vrot.slane %v15512_v12, %v11288_v26  ;;  %v8545_v44 = vsel %vm6997_vm7, %v8544_v42, %v8540_v52  ;;  %v8554_v50 = vrot.slane %v8073_v54, %v15514_v10  ;;  %v15519_v7 = vld [vmem:[#allocation35_spill] sm:$0xff] }
 0x162   :  { %v12800_v40 = vmul.f32 0.015625, %v440_v35  ;;  %v1779_v15 = vrot.slane %v15512_v12, %v11308_v20  ;;  %v8074_v3 = vunpack.c.l.b16 %v7677_v30  ;;  %v8075_v36 = vunpack.c.h.b16 %v7677_v30  ;;  %6660 = vperm.xlu0 %10244, %v15517_v1   ;;  %v446_v30 = vpop.xlane.xlu1 %445  ;;  %v15520_v35 = vld [vmem:[#allocation100_spill] sm:$0xff] }
 0x163   :  { %v12804_v60 = vmul.f32 0.015625, %v437_v61  ;;  %v8550_v11 = vsel %vm7004_vm8, %v8549_v47, %v8545_v44  ;;  %v12808_v23 = vcombine.low %v4936_v62, %v4943_v22  ;;  %v5123_v42 = vrot.slane %v5115_v0, %v11326_v13  ;;  %6633 = vperm.xlu1 %10245, %v15520_v35   ;;  %v15522_v0 = vld [vmem:[#allocation44_spill] sm:$0xff] }
 0x164   :  { %15515 = vst [vmem:[#allocation74_spill] sm:$0xff] %v12800_v40  ;;  %v4962_v29 = vcombine.low %v1758_v38, %v1765_v37  ;;  %v4963_v48 = vcombine.low %v1772_v43, %v1779_v15  ;;  %v8559_v52 = vrot.slane %v8074_v3, %v15518_v39  ;;  %v8564_v54 = vrot.slane %v8075_v36, %v15519_v7  ;;  %v443_v62 = vpop.xlane.xlu0 %442  ;;  %v15524_v15 = vld [vmem:[#allocation68_spill] sm:$0xff] }
 0x165   :  { %15516 = vst [vmem:[#allocation60_spill] sm:$0xff] %v12804_v60  ;;  %v7678_v12 = vpack.c.bf16 %v12800_v40, %v12804_v60  ;;  %v5130_v34 = vrot.slane %v5116_v19, %v11326_v13  ;;  %v12817_v61 = vmul.f32 0.015625, %v446_v30  ;;  %v8555_v22 = vsel %vm7011_vm9, %v8554_v50, %v8550_v11  ;;  %v15525_v30 = vld [vmem:[#allocation26_spill] sm:$0xff] }
 0x166   :  { %v2066_v38 = vrot.slane %v15522_v0, %v11087_v16  ;;  %v2073_v37 = vrot.slane %v15522_v0, %v11106_v27  ;;  %v12824_v44 = vmul.f32 0.015625, %v443_v62  ;;  %6666 = vperm.xlu0 %10244, %v15524_v15   ;;  %v8560_v3 = vsel %vm7018_vm10, %v8559_v52, %v8555_v22  ;;  %v15527_v15 = vld [vmem:[#allocation75_spill] sm:$0xff] }
 0x167   :  { %15521 = vst [vmem:[#allocation67_spill] sm:$0xff] %v12817_v61  ;;  %v8076_v47 = vunpack.c.l.b16 %v7678_v12  ;;  %v8077_v43 = vunpack.c.h.b16 %v7678_v12  ;;  %v4970_v19 = vrot.slane %v4962_v29, %v11326_v13  ;;  %v4977_v36 = vrot.slane %v4963_v48, %v11326_v13  ;;  %v452_v12 = vpop.xlane.xlu1 %451  ;;  %6639 = vperm.xlu1 %10245, %v15525_v30   ;;  %v15529_v30 = vld [vmem:[#allocation27_spill] sm:$0xff] }
 0x168   :  { %15523 = vst [vmem:[#allocation62_spill] sm:$0xff] %v12824_v44  ;;  %v2080_v50 = vrot.slane %v15522_v0, %v11288_v26  ;;  %v2087_v1 = vrot.slane %v15522_v0, %v11308_v20  ;;  %v7679_v11 = vpack.c.bf16 %v12817_v61, %v12824_v44  ;;  %v8565_v35 = vsel %vm7025_vm11, %v8564_v54, %v8560_v3  ;;  %v449_v48 = vpop.xlane.xlu0 %448 }
 0x169   :  { %v8569_v52 = vrot.slane %v8076_v47, %v15474_v56  ;;  %v8574_v29 = vrot.slane %v8077_v43, %v15481_v51  ;;  %v12840_v62 = vmul.f32 0.015625, %v452_v12  ;;  %v12842_v22 = vcombine.low %v2066_v38, %v2073_v37 }
 0x16a   :  { %v1814_v0 = vrot.slane %v15527_v15, %v11087_v16  ;;  %v1821_v44 = vrot.slane %v15527_v15, %v11106_v27  ;;  %v12848_v60 = vmul.f32 0.015625, %v449_v48  ;;  %6672 = vperm.xlu0 %10244, %v15529_v30   ;;  %v8078_v54 = vunpack.c.l.b16 %v7679_v11 }
 0x16b   :  { %15526 = vst [vmem:[#allocation64_spill] sm:$0xff] %v12840_v62  ;;  %v8079_v3 = vunpack.c.h.b16 %v7679_v11  ;;  %v8570_v47 = vsel %vm7032_vm12, %v8569_v52, %v8565_v35  ;;  %v12852_v43 = vcombine.low %v5123_v42, %v5130_v34  ;;  %v12854_v12 = vcombine.low %v4970_v19, %v4977_v36  ;;  %v458_v48 = vpop.xlane.xlu1 %457  ;;  %6645 = vperm.xlu1 %10245, %v15530_v25  }
 0x16c   :  { %15528 = vst [vmem:[#allocation61_spill] sm:$0xff] %v12848_v60  ;;  %v12856_v38 = vcombine.low %v2080_v50, %v2087_v1  ;;  %v1828_v37 = vrot.slane %v15527_v15, %v11288_v26  ;;  %v7680_v2 = vpack.c.bf16 %v12840_v62, %v12848_v60  ;;  %v8579_v30 = vrot.slane %v8078_v54, %v15485_v59  ;;  %v455_v19 = vpop.xlane.xlu0 %454  ;;  %v15533_v54 = vld [vmem:[#allocation103_spill] sm:$0xff]  ;;  %v15534_v60 = vld [vmem:[#allocation80_spill] sm:$0xff] }
 0x16d   :  { %v8584_v11 = vrot.slane %v8079_v3, %v15490_v32  ;;  %v1835_v42 = vrot.slane %v15527_v15, %v11308_v20  ;;  %v12867_v34 = vmul.f32 0.015625, %v458_v48  ;;  %v8575_v36 = vsel %vm7039_vm13, %v8574_v29, %v8570_v47 }
 0x16e   :  { %v12872_v1 = vcombine.low %v1814_v0, %v1821_v44  ;;  %v8080_v35 = vunpack.c.l.b16 %v7680_v2  ;;  %v8081_v52 = vunpack.c.h.b16 %v7680_v2  ;;  %v12874_v25 = vmul.f32 0.015625, %v455_v19  ;;  %6678 = vperm.xlu0 %10244, %v15533_v54  }
 0x16f   :  { %15531 = vst [vmem:[#allocation66_spill] sm:$0xff] %v12867_v34  ;;  %v8580_v3 = vsel %vm7046_vm14, %v8579_v30, %v8575_v36  ;;  %v12879_v48 = vcombine.low %v1828_v37, %v1835_v42  ;;  %v2122_v29 = vrot.slane %v15534_v60, %v11087_v16  ;;  %v2129_v47 = vrot.slane %v15534_v60, %v11106_v27  ;;  %v464_v19 = vpop.xlane.xlu1 %463  ;;  %v10296_v36 = vld [vmem:[%s15051_s1 + $0x8] ss:$24 sps:$4 sm:$0xff]  }
 0x170   :  { %15532 = vst [vmem:[#allocation65_spill] sm:$0xff] %v12874_v25  ;;  %v8585_v15 = vsel %vm7053_vm15, %v8584_v11, %v8580_v3  ;;  %v8589_v44 = vrot.slane %v8080_v35, %v10988_v33  ;;  %v8593_v2 = vrot.slane %v8081_v52, %v11015_v46  ;;  %v7681_v0 = vpack.c.bf16 %v12867_v34, %v12874_v25  ;;  %v461_v11 = vpop.xlane.xlu0 %460 }
 0x171   :  { %6651 = vperm.xlu1 %10245, %v12731_v9   ;;  %v8745_v37 = vsel %vm7608_vm0, %v8585_v15, %v12757_v21  ;;  %v12892_v30 = vmul.f32 0.015625, %v464_v19  ;;  %v5164_v35 = vrot.slane %v12856_v38, %v11326_v13  ;;  %v2136_v52 = vrot.slane %v15534_v60, %v11288_v26  ;;  %v10304_v21 = vld [vmem:[%s15051_s1 + $0x3c] ss:$24 sps:$4 sm:$0xff]  }
 0x172   :  { %v12894_v42 = vpack.c.b16 %v8745_v37, %v8745_v37  ;;  %v8082_v54 = vunpack.c.l.b16 %v7681_v0  ;;  %v8083_v9 = vunpack.c.h.b16 %v7681_v0  ;;  %v12903_v3 = vmul.f32 0.015625, %v461_v11  ;;  %6684 = vperm.xlu0 %10244, %v12752_v28   ;;  %v15537_v11 = vld [vmem:[#allocation89_spill] sm:$0xff] }
 0x173   :  { %15535 = vst [vmem:[#allocation69_spill] sm:$0xff] %v12892_v30  ;;  %v5004_v15 = vrot.slane %v12872_v1, %v11326_v13  ;;  %v8594_v19 = vsel %vm6955_vm1, %v8593_v2, %v8589_v44  ;;  %v5011_v38 = vrot.slane %v12879_v48, %v11326_v13  ;;  %v2143_v0 = vrot.slane %v15534_v60, %v11308_v20  ;;  %v470_v1 = vpop.xlane.xlu1 %469  ;;  %v15538_v44 = vld [vmem:[#allocation39_spill] sm:$0xff] }
 0x174   :  { %15536 = vst [vmem:[#allocation70_spill] sm:$0xff] %v12903_v3  ;;  %9748 = vmatprep.mubr.bf16.mxu1 %v12894_v42  ;;  %v5183_v37 = vcombine.low %v2122_v29, %v2129_v47  ;;  %v12918_v28 = vmul.f32 0.015625, %v15537_v11  ;;  %v8598_v50 = vrot.slane %v8082_v54, %v15334_v49  ;;  %v7682_v25 = vpack.c.bf16 %v12892_v30, %v12903_v3  ;;  %v467_v29 = vpop.xlane.xlu0 %466  ;;  %v10302_v47 = vld [vmem:[%s15051_s1 + $0x38] ss:$24 sps:$4 sm:$0xff]  }
 0x175   :  { %9749 = vmatmul.mubr.bf16.vlgmr.msra.gmra.mrb[0].mxu1 %v12786_v4  ;;  %6657 = vperm.xlu1 %10245, %v12808_v23   ;;  %v1870_v48 = vrot.slane %v15538_v44, %v11087_v16  ;;  %v8603_v2 = vrot.slane %v8083_v9, %v11012_v45  ;;  %v12928_v60 = vmul.f32 0.015625, %v470_v1  ;;  %v5184_v54 = vcombine.low %v2136_v52, %v2143_v0 }
 0x176   :  { %9799 = vmatpush1.bf16.msra.mxu1 %v10296_v36  ;;  %9830 = vmatprep.mubr.bf16.mxu1 %v12894_v42  ;;  %v1877_v11 = vrot.slane %v15538_v44, %v11106_v27  ;;  %v8084_v23 = vunpack.c.l.b16 %v7682_v25  ;;  %v8085_v3 = vunpack.c.h.b16 %v7682_v25  ;;  %v12936_v30 = vmul.f32 0.015625, %v467_v29  ;;  %v10310_v36 = vld [vmem:[%s15051_s1 + $0x6c] ss:$24 sps:$4 sm:$0xff]  }
 0x177   :  { %15539 = vst [vmem:[#allocation31_spill] sm:$0xff] %v12928_v60  ;;  %6690 = vperm.xlu0 %10244, %v12852_v43   ;;  %9800 = vmatprep.subr.bf16.mxu1 %v10304_v21  ;;  %v5191_v9 = vrot.slane %v5183_v37, %v11326_v13  ;;  %v8599_v1 = vsel %vm6962_vm2, %v8598_v50, %v8594_v19  ;;  %v476_v21 = vpop.xlane.xlu1 %475 }
 0x178   :  { %15540 = vst [vmem:[#allocation41_spill] sm:$0xff] %v12936_v30  ;;  %v5198_v52 = vrot.slane %v5184_v54, %v11326_v13  ;;  %v1884_v0 = vrot.slane %v15538_v44, %v11288_v26  ;;  %v1891_v25 = vrot.slane %v15538_v44, %v11308_v20  ;;  %v8608_v29 = vrot.slane %v8084_v23, %v11027_v53  ;;  %v473_v34 = vpop.xlane.xlu0 %472  ;;  %v10308_v44 = vld [vmem:[%s15051_s1 + $0x68] ss:$24 sps:$4 sm:$0xff]  }
 0x179   :  { %v7683_v43 = vpack.c.bf16 %v12928_v60, %v12936_v30  ;;  %6663 = vperm.xlu1 %10245, %v12854_v12   ;;  %v15541_v37 = vrot.slane %v12842_v22, %v11326_v13  ;;  %v5030_v19 = vcombine.low %v1870_v48, %v1877_v11  ;;  %v12956_v54 = vmul.f32 0.015625, %v476_v21  ;;  %v15543_v30 = vld [vmem:[#allocation48_spill] sm:$0xff]  ;;  %v10316_v48 = vld [vmem:[%s15051_s1 + $0x9c] ss:$24 sps:$4 sm:$0xff]  }
 0x17a   :  { %9801 = vmatpush1.bf16.msra.mxu1 %v10302_v47  ;;  %v5012_v23 = vcombine.low %v5004_v15, %v5011_v38  ;;  %v5031_v62 = vcombine.low %v1884_v0, %v1891_v25  ;;  %v2178_v60 = vrot.slane %v15543_v30, %v11087_v16  ;;  %v8604_v12 = vsel %vm6969_vm3, %v8603_v2, %v8599_v1 }
 0x17b   :  { %v5165_v50 = vcombine.low %v15541_v37, %v5164_v35  ;;  %15542 = vst [vmem:[#allocation33_spill] sm:$0xff] %v12956_v54  ;;  %v8613_v31 = vrot.slane %v8085_v3, %v11036_v57  ;;  %v8086_v22 = vunpack.c.l.b16 %v7683_v43  ;;  %v12965_v35 = vmul.f32 0.015625, %v473_v34  ;;  %9802 = vmatprep.subr.bf16.mxu1 %v10310_v36  ;;  %v482_v1 = vpop.xlane.xlu1 %481  ;;  %v15547_v37 = vld [vmem:[#allocation95_spill] sm:$0xff] }
 0x17c   :  { %v5199_v47 = vcombine.low %v5191_v9, %v5198_v52  ;;  %v5038_v15 = vrot.slane %v5030_v19, %v11326_v13  ;;  %v5045_v38 = vrot.slane %v5031_v62, %v11326_v13  ;;  %v2185_v11 = vrot.slane %v15543_v30, %v11106_v27  ;;  %v15545_v9 = vld [vmem:[#allocation85_spill] sm:$0xff]  ;;  %v479_v25 = vpop.xlane.xlu0 %478 }
 0x17d   :  { %15544 = vst [vmem:[#allocation92_spill] sm:$0xff] %v12965_v35  ;;  %6696 = vperm.xlu0 %10244, %v5165_v50   ;;  %v8609_v2 = vsel %vm6976_vm4, %v8608_v29, %v8604_v12  ;;  %v8087_v3 = vunpack.c.h.b16 %v7683_v43  ;;  %v7684_v34 = vpack.c.bf16 %v12956_v54, %v12965_v35  ;;  %6669 = vperm.xlu1 %10245, %v5012_v23   ;;  %v15546_v52 = vunpack.c.h.b16 %v15545_v9  ;;  %v10314_v29 = vld [vmem:[%s15051_s1 + $0x98] ss:$24 sps:$4 sm:$0xff]   ;;  %v10322_v12 = vld [vmem:[%s15051_s1 + $0xcc] ss:$24 sps:$4 sm:$0xff]  }
 0x17e   :  { %v2192_v36 = vrot.slane %v15543_v30, %v11288_v26  ;;  %v8618_v62 = vrot.slane %v8086_v22, %v11039_v58  ;;  %9803 = vmatpush1.bf16.msra.mxu1 %v10308_v44  ;;  %v2199_v43 = vrot.slane %v15543_v30, %v11308_v20  ;;  %v5217_v21 = vcombine.low %v2178_v60, %v2185_v11  ;;  %v15550_v60 = vld [vmem:[#allocation40_spill] sm:$0xff] }
 0x17f   :  { %v12982_v0 = vrot.slane %v15546_v52, %v15519_v7  ;;  %v12992_v50 = vpack.c.bf16 %v15547_v37, %v12918_v28  ;;  %v12994_v19 = vmul.f32 0.015625, %v482_v1  ;;  %v12996_v23 = vmul.f32 0.015625, %v479_v25  ;;  %9804 = vmatprep.subr.bf16.mxu1 %v10316_v48  ;;  %v488_v35 = vpop.xlane.xlu1 %487 }
 0x180   :  { %v5046_v44 = vcombine.low %v5038_v15, %v5045_v38  ;;  %v8614_v22 = vsel %vm6983_vm5, %v8613_v31, %v8609_v2  ;;  %v5218_v9 = vcombine.low %v2192_v36, %v2199_v43  ;;  %v5225_v30 = vrot.slane %v5217_v21, %v11326_v13  ;;  %v485_v15 = vpop.xlane.xlu0 %484  ;;  %v10320_v38 = vld [vmem:[%s15051_s1 + $0xc8] ss:$24 sps:$4 sm:$0xff]   ;;  %v10328_v21 = vld [vmem:[%s15051_s1 + $0xfc] ss:$24 sps:$4 sm:$0xff]  }
 0x181   :  { %15548 = vst [vmem:[#allocation18_spill] sm:$0xff] %v12994_v19  ;;  %15549 = vst [vmem:[#allocation63_spill] sm:$0xff] %v12996_v23  ;;  %6702 = vperm.xlu0 %10244, %v5199_v47   ;;  %v1926_v11 = vrot.slane %v15550_v60, %v11087_v16  ;;  %v8623_v1 = vrot.slane %v8087_v3, %v11054_v63  ;;  %v8088_v52 = vunpack.c.l.b16 %v7684_v34  ;;  %v8089_v25 = vunpack.c.h.b16 %v7684_v34  ;;  %v15551_v34 = vld [vmem:[#allocation93_spill] sm:$0xff] }
 0x182   :  { %6675 = vperm.xlu1 %10245, %v5046_v44   ;;  %v1933_v48 = vrot.slane %v15550_v60, %v11106_v27  ;;  %v8619_v47 = vsel %vm6990_vm6, %v8618_v62, %v8614_v22  ;;  %9805 = vmatpush1.bf16.msra.mxu1 %v10314_v29  ;;  %v5232_v31 = vrot.slane %v5218_v9, %v11326_v13  ;;  %v15552_v9 = vld [vmem:[#allocation51_spill] sm:$0xff]  ;;  %v13064_v61 = vmul.f32 0.015625, %v485_v15  ;;  %v15557_v15 = vld [vmem:[#allocation53_spill] sm:$0xff] }
 0x183   :  { %v1940_v2 = vrot.slane %v15550_v60, %v11288_v26  ;;  %v1947_v3 = vrot.slane %v15550_v60, %v11308_v20  ;;  %v13021_v62 = vpack.c.bf16 %v12994_v19, %v12996_v23  ;;  %9806 = vmatprep.subr.bf16.mxu1 %v10322_v12  ;;  %v2234_v54 = vrot.slane %v15552_v9, %v11087_v16  ;;  %v15554_v19 = vld [vmem:[#allocation43_spill] sm:$0xff] }
 0x184   :  { %v5064_v29 = vcombine.low %v1926_v11, %v1933_v48  ;;  %v5233_v44 = vcombine.low %v5225_v30, %v5232_v31  ;;  %v2241_v60 = vrot.slane %v15552_v9, %v11106_v27  ;;  %v13031_v43 = vsel %vm6997_vm7, %v8623_v1, %v8619_v47  ;;  %v13039_v11 = vpop.xlane.xlu1 %493  ;;  %v13043_v31 = vpop.xlane.xlu0 %490  ;;  %15555 = vst [vmem:[#allocation35_spill] sm:$0xff] %v13064_v61 }
 0x185   :  { %v5065_v22 = vcombine.low %v1940_v2, %v1947_v3  ;;  %v13034_v36 = vrot.slane %v8088_v52, %v11071_v6  ;;  %v13037_v12 = vrot.slane %v8089_v25, %v15514_v10  ;;  %v2248_v1 = vrot.slane %v15552_v9, %v11288_v26  ;;  %v10326_v25 = vld [vmem:[%s15051_s1 + $0xf8] ss:$24 sps:$4 sm:$0xff]  }
 0x186   :  { %v5072_v30 = vrot.slane %v5064_v29, %v11326_v13  ;;  %6708 = vperm.xlu0 %10244, %v5233_v44   ;;  %9807 = vmatpush1.bf16.msra.mxu1 %v10320_v38  ;;  %v2255_v52 = vrot.slane %v15552_v9, %v11308_v20  ;;  %v8090_v2 = vunpack.c.l.b16 %v13021_v62  ;;  %v8091_v38 = vunpack.c.h.b16 %v13021_v62  ;;  %v10334_v44 = vld [vmem:[%s15051_s1 + $0x12c] ss:$24 sps:$4 sm:$0xff]  }
 0x187   :  { %v5079_v48 = vrot.slane %v5065_v22, %v11326_v13  ;;  %v13055_v3 = vmul.f32 0.015625, %v488_v35  ;;  %v5251_v29 = vcombine.low %v2234_v54, %v2241_v60  ;;  %9808 = vmatprep.subr.bf16.mxu1 %v10328_v21  ;;  %v1982_v23 = vrot.slane %v15554_v19, %v11087_v16 }
 0x188   :  { %v5252_v9 = vcombine.low %v2248_v1, %v2255_v52  ;;  %v1989_v47 = vrot.slane %v15554_v19, %v11106_v27  ;;  %v500_v35 = vpop.xlane.xlu1 %499  ;;  %v1996_v54 = vrot.slane %v15554_v19, %v11288_v26  ;;  %v2003_v21 = vrot.slane %v15554_v19, %v11308_v20  ;;  %v497_v1 = vpop.xlane.xlu0 %496 }
 0x189   :  { %15553 = vst [vmem:[#allocation21_spill] sm:$0xff] %v13055_v3  ;;  %v5080_v22 = vcombine.low %v5072_v30, %v5079_v48  ;;  %v5259_v62 = vrot.slane %v5251_v29, %v11326_v13  ;;  %v13072_v30 = vmul.f32 0.015625, %v500_v35  ;;  %v2290_v52 = vrot.slane %v15557_v15, %v11087_v16  ;;  %v10332_v29 = vld [vmem:[%s15051_s1 + $0x128] ss:$24 sps:$4 sm:$0xff]  }
 0x18a   :  { %v5266_v60 = vrot.slane %v5252_v9, %v11326_v13  ;;  %9809 = vmatpush1.bf16.msra.mxu1 %v10326_v25  ;;  %v5098_v48 = vcombine.low %v1982_v23, %v1989_v47  ;;  %v5099_v14 = vcombine.low %v1996_v54, %v2003_v21  ;;  %v13079_v40 = vmul.f32 0.015625, %v497_v1  ;;  %v10340_v23 = vld [vmem:[%s15051_s1 + $0x15c] ss:$24 sps:$4 sm:$0xff]   ;;  %v15559_v35 = vld [vmem:[#allocation45_spill] sm:$0xff] }
 0x18b   :  { %6681 = vperm.xlu1 %10245, %v5080_v22   ;;  %15556 = vst [vmem:[#allocation100_spill] sm:$0xff] %v13072_v30  ;;  %v2297_v19 = vrot.slane %v15557_v15, %v11106_v27  ;;  %v2304_v25 = vrot.slane %v15557_v15, %v11288_v26  ;;  %9810 = vmatprep.subr.bf16.mxu1 %v10334_v44 }
 0x18c   :  { %15558 = vst [vmem:[#allocation44_spill] sm:$0xff] %v13079_v40  ;;  %v5267_v47 = vcombine.low %v5259_v62, %v5266_v60  ;;  %v5106_v22 = vrot.slane %v5098_v48, %v11326_v13  ;;  %v2311_v9 = vrot.slane %v15557_v15, %v11308_v20  ;;  %v2038_v54 = vrot.slane %v15559_v35, %v11087_v16  ;;  %v506_v44 = vpop.xlane.xlu1 %505 }
 0x18d   :  { %v5113_v21 = vrot.slane %v5099_v14, %v11326_v13  ;;  %v7688_v1 = vpack.c.bf16 %v13072_v30, %v13079_v40  ;;  %v5285_v8 = vcombine.low %v2290_v52, %v2297_v19  ;;  %v2045_v24 = vrot.slane %v15559_v35, %v11106_v27  ;;  %v503_v14 = vpop.xlane.xlu0 %502  ;;  %v10338_v52 = vld [vmem:[%s15051_s1 + $0x158] ss:$24 sps:$4 sm:$0xff]  }
 0x18e   :  { %6714 = vperm.xlu0 %10244, %v5267_v47   ;;  %v5286_v62 = vcombine.low %v2304_v25, %v2311_v9  ;;  %9811 = vmatpush1.bf16.msra.mxu1 %v10332_v29  ;;  %v13098_v60 = vmul.f32 0.015625, %v506_v44  ;;  %v2052_v48 = vrot.slane %v15559_v35, %v11288_v26  ;;  %v2059_v15 = vrot.slane %v15559_v35, %v11308_v20  ;;  %v10346_v9 = vld [vmem:[%s15051_s1 + $0x18c] ss:$24 sps:$4 sm:$0xff]  }
 0x18f   :  { %v13108_v19 = vrot.slane %v8090_v2, %v15518_v39  ;;  %v13111_v47 = vrot.slane %v8091_v38, %v15519_v7  ;;  %v5114_v29 = vcombine.low %v5106_v22, %v5113_v21  ;;  %v5293_v25 = vrot.slane %v5285_v8, %v11326_v13  ;;  %9812 = vmatprep.subr.bf16.mxu1 %v10340_v23  ;;  %v15562_v38 = vld [vmem:[#allocation54_spill] sm:$0xff] }
 0x190   :  { %15560 = vst [vmem:[#allocation68_spill] sm:$0xff] %v13098_v60  ;;  %v5300_v35 = vrot.slane %v5286_v62, %v11326_v13  ;;  %v5132_v44 = vcombine.low %v2038_v54, %v2045_v24  ;;  %v5133_v40 = vcombine.low %v2052_v48, %v2059_v15  ;;  %v13118_v30 = vmul.f32 0.015625, %v503_v14  ;;  %v512_v23 = vpop.xlane.xlu1 %511 }
 0x191   :  { %6687 = vperm.xlu1 %10245, %v5114_v29   ;;  %v8096_v2 = vunpack.c.l.b16 %v7688_v1  ;;  %v8097_v18 = vunpack.c.h.b16 %v7688_v1  ;;  %v2346_v41 = vrot.slane %v15562_v38, %v11087_v16  ;;  %v2353_v8 = vrot.slane %v15562_v38, %v11106_v27  ;;  %v509_v54 = vpop.xlane.xlu0 %508 }
 0x192   :  { %15561 = vst [vmem:[#allocation26_spill] sm:$0xff] %v13118_v30  ;;  %v5301_v22 = vcombine.low %v5293_v25, %v5300_v35  ;;  %v5140_v21 = vrot.slane %v5132_v44, %v11326_v13  ;;  %v5147_v17 = vrot.slane %v5133_v40, %v11326_v13  ;;  %v13128_v24 = vpack.c.bf16 %v13098_v60, %v13118_v30  ;;  %v10344_v40 = vld [vmem:[%s15051_s1 + $0x188] ss:$24 sps:$4 sm:$0xff]   ;;  %v10352_v35 = vld [vmem:[%s15051_s1 + $0x1bc] ss:$24 sps:$4 sm:$0xff]  }
 0x193   :  { %9813 = vmatpush1.bf16.msra.mxu1 %v10338_v52  ;;  %v13132_v1 = vpack.c.bf16 %v13055_v3, %v13064_v61  ;;  %v2360_v62 = vrot.slane %v15562_v38, %v11288_v26  ;;  %v2367_v48 = vrot.slane %v15562_v38, %v11308_v20  ;;  %v5319_v15 = vcombine.low %v2346_v41, %v2353_v8  ;;  %v15565_v38 = vld [vmem:[#allocation50_spill] sm:$0xff]  ;;  %v15567_v61 = vld [vmem:[#allocation56_spill] sm:$0xff] }
 0x194   :  { %9814 = vmatprep.subr.bf16.mxu1 %v10346_v9  ;;  %v13142_v14 = vmul.f32 0.015625, %v13039_v11  ;;  %6720 = vperm.xlu0 %10244, %v5301_v22   ;;  %v5148_v52 = vcombine.low %v5140_v21, %v5147_v17  ;;  %v8098_v29 = vunpack.c.l.b16 %v13128_v24  ;;  %v13145_v25 = vmul.f32 0.015625, %v512_v23  ;;  %v518_v9 = vpop.xlane.xlu1 %517 }
 0x195   :  { %v5320_v44 = vcombine.low %v2360_v62, %v2367_v48  ;;  %v5327_v41 = vrot.slane %v5319_v15, %v11326_v13  ;;  %v2094_v8 = vrot.slane %v15565_v38, %v11087_v16  ;;  %v2101_v11 = vrot.slane %v15565_v38, %v11106_v27  ;;  %v515_v62 = vpop.xlane.xlu0 %514 }
 0x196   :  { %15563 = vst [vmem:[#allocation75_spill] sm:$0xff] %v13142_v14  ;;  %15564 = vst [vmem:[#allocation27_spill] sm:$0xff] %v13145_v25  ;;  %v8668_v17 = vrot.slane %v8096_v2, %v10988_v33  ;;  %v8672_v22 = vrot.slane %v8097_v18, %v11015_v46  ;;  %6693 = vperm.xlu1 %10245, %v5148_v52   ;;  %v2108_v23 = vrot.slane %v15565_v38, %v11288_v26  ;;  %v10350_v18 = vld [vmem:[%s15051_s1 + $0x1b8] ss:$24 sps:$4 sm:$0xff]  }
 0x197   :  { %v2115_v21 = vrot.slane %v15565_v38, %v11308_v20  ;;  %v5334_v48 = vrot.slane %v5320_v44, %v11326_v13  ;;  %v5166_v15 = vcombine.low %v2094_v8, %v2101_v11  ;;  %v13162_v3 = vmul.f32 0.015625, %v509_v54  ;;  %9815 = vmatpush1.bf16.msra.mxu1 %v10344_v40  ;;  %v10358_v54 = vld [vmem:[%s15051_s1 + $0x1ec] ss:$24 sps:$4 sm:$0xff]  }
 0x198   :  { %v2402_v30 = vrot.slane %v15567_v61, %v11087_v16  ;;  %v8099_v2 = vunpack.c.h.b16 %v13128_v24  ;;  %v2409_v38 = vrot.slane %v15567_v61, %v11106_v27  ;;  %v2416_v44 = vrot.slane %v15567_v61, %v11288_v26  ;;  %9816 = vmatprep.subr.bf16.mxu1 %v10352_v35 }
 0x199   :  { %15566 = vst [vmem:[#allocation102_spill] sm:$0xff] %v13162_v3  ;;  %v5167_v52 = vcombine.low %v2108_v23, %v2115_v21  ;;  %v8677_v40 = vrot.slane %v8098_v29, %v15334_v49  ;;  %v5335_v8 = vcombine.low %v5327_v41, %v5334_v48  ;;  %v5174_v11 = vrot.slane %v5166_v15, %v11326_v13  ;;  %v13181_v23 = vpop.xlane.xlu1 %523  ;;  %v13187_v46 = vpop.xlane.xlu0 %520  ;;  %v15569_v48 = vld [vmem:[#allocation49_spill] sm:$0xff] }
 0x19a   :  { %v7690_v24 = vpack.c.bf16 %v13145_v25, %v13162_v3  ;;  %v8673_v21 = vsel %vm6955_vm1, %v8672_v22, %v8668_v17  ;;  %v2423_v35 = vrot.slane %v15567_v61, %v11308_v20  ;;  %v5353_v33 = vcombine.low %v2402_v30, %v2409_v38  ;;  %v10356_v17 = vld [vmem:[%s15051_s1 + $0x1e8] ss:$24 sps:$4 sm:$0xff]  }
 0x19b   :  { %v5181_v60 = vrot.slane %v5167_v52, %v11326_v13  ;;  %6726 = vperm.xlu0 %10244, %v5335_v8   ;;  %v13189_v41 = vmul.f32 0.015625, %v518_v9  ;;  %v2150_v15 = vrot.slane %v15569_v48, %v11087_v16  ;;  %v2157_v3 = vrot.slane %v15569_v48, %v11106_v27  ;;  %9817 = vmatpush1.bf16.msra.mxu1 %v10350_v18  ;;  %v10364_v9 = vld [vmem:[%s15051_s1 + $0x21c] ss:$24 sps:$4 sm:$0xff]   ;;  %v15572_v49 = vld [vmem:[#allocation81_spill] sm:$0xff] }
 0x19c   :  { %v8100_v29 = vunpack.c.l.b16 %v7690_v24  ;;  %v5354_v61 = vcombine.low %v2416_v44, %v2423_v35  ;;  %v5361_v30 = vrot.slane %v5353_v33, %v11326_v13  ;;  %v2164_v52 = vrot.slane %v15569_v48, %v11288_v26  ;;  %9818 = vmatprep.subr.bf16.mxu1 %v10358_v54  ;;  %v15571_v54 = vld [vmem:[#allocation83_spill] sm:$0xff] }
 0x19d   :  { %15568 = vst [vmem:[#allocation103_spill] sm:$0xff] %v13189_v41  ;;  %v5182_v22 = vcombine.low %v5174_v11, %v5181_v60  ;;  %v8678_v38 = vsel %vm6962_vm2, %v8677_v40, %v8673_v21  ;;  %v8682_v18 = vrot.slane %v8099_v2, %v11012_v45  ;;  %v2171_v8 = vrot.slane %v15569_v48, %v11308_v20  ;;  %v13208_v60 = vpop.xlane.xlu1 %529  ;;  %v13217_v40 = vpop.xlane.xlu0 %526 }
 0x19e   :  { %v5200_v25 = vcombine.low %v2150_v15, %v2157_v3  ;;  %v5368_v33 = vrot.slane %v5354_v61, %v11326_v13  ;;  %v13211_v44 = vmul.f32 0.015625, %v515_v62  ;;  %v2458_v11 = vrot.slane %v15571_v54, %v11087_v16  ;;  %v10362_v62 = vld [vmem:[%s15051_s1 + $0x218] ss:$24 sps:$4 sm:$0xff]  }
 0x19f   :  { %6699 = vperm.xlu1 %10245, %v5182_v22   ;;  %v2465_v35 = vrot.slane %v15571_v54, %v11106_v27  ;;  %v8101_v2 = vunpack.c.h.b16 %v7690_v24  ;;  %v5201_v21 = vcombine.low %v2164_v52, %v2171_v8  ;;  %v2472_v3 = vrot.slane %v15571_v54, %v11288_v26  ;;  %9819 = vmatpush1.bf16.msra.mxu1 %v10356_v17 }
 0x1a0   :  { %15570 = vst [vmem:[#allocation80_spill] sm:$0xff] %v13211_v44  ;;  %v5208_v48 = vrot.slane %v5200_v25, %v11326_v13  ;;  %v8687_v15 = vrot.slane %v8100_v29, %v11027_v53  ;;  %v5369_v22 = vcombine.low %v5361_v30, %v5368_v33  ;;  %v7691_v61 = vpack.c.bf16 %v13189_v41, %v13211_v44  ;;  %v10370_v25 = vld [vmem:[%s15051_s1 + $0x24c] ss:$24 sps:$4 sm:$0xff]  }
 0x1a1   :  { %v2479_v24 = vrot.slane %v15571_v54, %v11308_v20  ;;  %9820 = vmatprep.subr.bf16.mxu1 %v10364_v9  ;;  %v5215_v52 = vrot.slane %v5201_v21, %v11326_v13  ;;  %v5387_v8 = vcombine.low %v2458_v11, %v2465_v35  ;;  %v2206_v29 = vrot.slane %v15572_v49, %v11087_v16  ;;  %v13237_v30 = vpop.xlane.xlu1 %535 }
 0x1a2   :  { %v8683_v33 = vsel %vm6969_vm3, %v8682_v18, %v8678_v38  ;;  %6732 = vperm.xlu0 %10244, %v5369_v22   ;;  %v8102_v44 = vunpack.c.l.b16 %v7691_v61  ;;  %v2213_v9 = vrot.slane %v15572_v49, %v11106_v27  ;;  %v2220_v21 = vrot.slane %v15572_v49, %v11288_v26  ;;  %v10368_v38 = vld [vmem:[%s15051_s1 + $0x248] ss:$24 sps:$4 sm:$0xff]   ;;  %v13253_v22 = vpop.xlane.xlu0 %532 }
 0x1a3   :  { %v5388_v54 = vcombine.low %v2472_v3, %v2479_v24  ;;  %v5216_v41 = vcombine.low %v5208_v48, %v5215_v52  ;;  %v5395_v53 = vrot.slane %v5387_v8, %v11326_v13  ;;  %v2227_v11 = vrot.slane %v15572_v49, %v11308_v20  ;;  %9821 = vmatpush1.bf16.msra.mxu1 %v10362_v62  ;;  %v10376_v24 = vld [vmem:[%s15051_s1 + $0x27c] ss:$24 sps:$4 sm:$0xff]  }
 0x1a4   :  { %v8688_v18 = vsel %vm6976_vm4, %v8687_v15, %v8683_v33  ;;  %v8692_v35 = vrot.slane %v8101_v2, %v11036_v57  ;;  %v5234_v48 = vcombine.low %v2206_v29, %v2213_v9  ;;  %9822 = vmatprep.subr.bf16.mxu1 %v10370_v25  ;;  %v8103_v49 = vunpack.c.h.b16 %v7691_v61  ;;  %v15573_v52 = vld [vmem:[#allocation86_spill] sm:$0xff] }
 0x1a5   :  { %v5402_v3 = vrot.slane %v5388_v54, %v11326_v13  ;;  %6705 = vperm.xlu1 %10245, %v5216_v41   ;;  %v5235_v62 = vcombine.low %v2220_v21, %v2227_v11  ;;  %v2514_v8 = vrot.slane %v15573_v52, %v11087_v16  ;;  %v2521_v15 = vrot.slane %v15573_v52, %v11106_v27  ;;  %v13262_v2 = vpop.xlane.xlu1 %541 }
 0x1a6   :  { %v13265_v29 = vmul.f32 0.015625, %v13181_v23  ;;  %v5242_v25 = vrot.slane %v5234_v48, %v11326_v13  ;;  %v2528_v54 = vrot.slane %v15573_v52, %v11288_v26  ;;  %v8697_v41 = vrot.slane %v8102_v44, %v11039_v58  ;;  %v13297_v58 = vpop.xlane.xlu0 %538 }
 0x1a7   :  { %v5403_v33 = vcombine.low %v5395_v53, %v5402_v3  ;;  %v5249_v61 = vrot.slane %v5235_v62, %v11326_v13  ;;  %v13273_v9 = vmul.f32 0.015625, %v13187_v46  ;;  %v2535_v21 = vrot.slane %v15573_v52, %v11308_v20  ;;  %9823 = vmatpush1.bf16.msra.mxu1 %v10368_v38  ;;  %v10374_v53 = vld [vmem:[%s15051_s1 + $0x278] ss:$24 sps:$4 sm:$0xff]   ;;  %v10382_v46 = vld [vmem:[%s15051_s1 + $0x2ac] ss:$24 sps:$4 sm:$0xff]  }
 0x1a8   :  { %15574 = vst [vmem:[#allocation89_spill] sm:$0xff] %v13265_v29  ;;  %v5421_v11 = vcombine.low %v2514_v8, %v2521_v15  ;;  %v15576_v3 = vld [vmem:[#allocation82_spill] sm:$0xff]  ;;  %9824 = vmatprep.subr.bf16.mxu1 %v10376_v24  ;;  %v8693_v38 = vsel %vm6983_vm5, %v8692_v35, %v8688_v18  ;;  %v8702_v62 = vrot.slane %v8103_v49, %v11054_v63  ;;  %v13300_v57 = vmul.f32 0.015625, %v13043_v31 }
 0x1a9   :  { %15575 = vst [vmem:[#allocation39_spill] sm:$0xff] %v13273_v9  ;;  %6738 = vperm.xlu0 %10244, %v5403_v33   ;;  %v2262_v44 = vrot.slane %v15576_v3, %v11087_v16  ;;  %v2269_v48 = vrot.slane %v15576_v3, %v11106_v27  ;;  %v5250_v52 = vcombine.low %v5242_v25, %v5249_v61  ;;  %v13290_v23 = vpop.permute.xlu1 %6564  ;;  %v10380_v25 = vld [vmem:[%s15051_s1 + $0x2a8] ss:$24 sps:$4 sm:$0xff]  }
 0x1aa   :  { %v5422_v17 = vcombine.low %v2528_v54, %v2535_v21  ;;  %15577 = vst [vmem:[#allocation48_spill] sm:$0xff] %v13290_v23  ;;  %v5429_v8 = vrot.slane %v5421_v11, %v11326_v13  ;;  %v2276_v15 = vrot.slane %v15576_v3, %v11288_v26  ;;  %v2283_v24 = vrot.slane %v15576_v3, %v11308_v20  ;;  %v10388_v21 = vld [vmem:[%s15051_s1 + $0x2dc] ss:$24 sps:$4 sm:$0xff]  }
 0x1ab   :  { %v5268_v33 = vcombine.low %v2262_v44, %v2269_v48  ;;  %15578 = vst [vmem:[#allocation85_spill] sm:$0xff] %v13300_v57  ;;  %v8698_v18 = vsel %vm6990_vm6, %v8697_v41, %v8693_v38  ;;  %6711 = vperm.xlu1 %10245, %v5250_v52   ;;  %v7692_v35 = vpack.c.bf16 %v13265_v29, %v13273_v9  ;;  %v15582_v52 = vld [vmem:[#allocation55_spill] sm:$0xff] }
 0x1ac   :  { %v5436_v49 = vrot.slane %v5422_v17, %v11326_v13  ;;  %9825 = vmatpush1.bf16.msra.mxu1 %v10374_v53  ;;  %v5269_v54 = vcombine.low %v2276_v15, %v2283_v24  ;;  %v2570_v31 = vrot.slane %v15547_v37, %v11087_v16  ;;  %v2577_v41 = vrot.slane %v15547_v37, %v11106_v27  ;;  %v13332_v15 = vpop.permute.xlu0 %6561 }
 0x1ad   :  { %v5276_v61 = vrot.slane %v5268_v33, %v11326_v13  ;;  %9826 = vmatprep.subr.bf16.mxu1 %v10382_v46  ;;  %v13318_v53 = vmul.f32 0.015625, %v13208_v60  ;;  %v2584_v11 = vrot.slane %v15547_v37, %v11288_v26  ;;  %v2591_v3 = vrot.slane %v15547_v37, %v11308_v20  ;;  %v13324_v44 = vpop.permute.xlu1 %6567  ;;  %15583 = vst [vmem:[#allocation51_spill] sm:$0xff] %v13332_v15 }
 0x1ae   :  { %v5437_v17 = vcombine.low %v5429_v8, %v5436_v49  ;;  %15580 = vst [vmem:[#allocation40_spill] sm:$0xff] %v13324_v44  ;;  %v5283_v48 = vrot.slane %v5269_v54, %v11326_v13  ;;  %v13328_v46 = vmul.f32 0.015625, %v13217_v40  ;;  %v5455_v38 = vcombine.low %v2570_v31, %v2577_v41  ;;  %v10386_v49 = vld [vmem:[%s15051_s1 + $0x2d8] ss:$24 sps:$4 sm:$0xff]  }
 0x1af   :  { %15579 = vst [vmem:[#allocation95_spill] sm:$0xff] %v13318_v53  ;;  %v2318_v8 = vrot.slane %v15582_v52, %v11087_v16  ;;  %v8104_v60 = vunpack.c.l.b16 %v7692_v35  ;;  %v8105_v24 = vunpack.c.h.b16 %v7692_v35  ;;  %v5456_v33 = vcombine.low %v2584_v11, %v2591_v3  ;;  %v10392_v35 = vld [vmem:[%s15051_s1 + $0x30c] ss:$24 sps:$4 sm:$0xff]  }
 0x1b0   :  { %15581 = vst [vmem:[#allocation93_spill] sm:$0xff] %v13328_v46  ;;  %6744 = vperm.xlu0 %10244, %v5437_v17   ;;  %v2325_v37 = vrot.slane %v15582_v52, %v11106_v27  ;;  %9827 = vmatpush1.bf16.msra.mxu1 %v10380_v25  ;;  %v5284_v40 = vcombine.low %v5276_v61, %v5283_v48  ;;  %v13365_v23 = vpop.permute.xlu0 %6588 }
 0x1b1   :  { %v5463_v54 = vrot.slane %v5455_v38, %v11326_v13  ;;  %v2332_v31 = vrot.slane %v15582_v52, %v11288_v26  ;;  %v2339_v41 = vrot.slane %v15582_v52, %v11308_v20  ;;  %9828 = vmatprep.subr.bf16.mxu1 %v10388_v21  ;;  %v13349_v25 = vpack.c.bf16 %v13142_v14, %v13300_v57  ;;  %v13355_v3 = vpop.permute.xlu1 %6570  ;;  %v15585_v38 = vld [vmem:[#allocation96_spill] sm:$0xff] }
 0x1b2   :  { %v13352_v17 = vsel %vm6997_vm7, %v8702_v62, %v8698_v18  ;;  %v5470_v61 = vrot.slane %v5456_v33, %v11326_v13  ;;  %v5302_v11 = vcombine.low %v2318_v8, %v2325_v37  ;;  %15584 = vst [vmem:[#allocation43_spill] sm:$0xff] %v13355_v3  ;;  %6717 = vperm.xlu1 %10245, %v5284_v40   ;;  %15586 = vst [vmem:[#allocation53_spill] sm:$0xff] %v13365_v23  ;;  %v10390_v37 = vld [vmem:[%s15051_s1 + $0x308] ss:$24 sps:$4 sm:$0xff]  }
 0x1b3   :  { %v13359_v21 = vpack.c.bf16 %v13318_v53, %v13328_v46  ;;  %v5303_v48 = vcombine.low %v2332_v31, %v2339_v41  ;;  %v2626_v52 = vrot.slane %v15585_v38, %v11087_v16  ;;  %v2633_v44 = vrot.slane %v15585_v38, %v11106_v27  ;;  %v15594_v14 = vld [vmem:[#allocation84_spill] sm:$0xff]  ;;  %v15646_v53 = vld [vmem:[#allocation34_spill] sm:$0xff] }
 0x1b4   :  { %v5471_v62 = vcombine.low %v5463_v54, %v5470_v61  ;;  %v5310_v18 = vrot.slane %v5302_v11, %v11326_v13  ;;  %v2640_v8 = vrot.slane %v15585_v38, %v11288_v26  ;;  %v2647_v33 = vrot.slane %v15585_v38, %v11308_v20  ;;  %9829 = vmatpush1.bf16.msra.mxu1 %v10386_v49  ;;  %v15587_v11 = vld [vmem:[#allocation57_spill] sm:$0xff] }
 0x1b5   :  { %v13376_v40 = vrot.slane %v8104_v60, %v11071_v6  ;;  %v13379_v31 = vrot.slane %v8105_v24, %v15514_v10  ;;  %v5317_v54 = vrot.slane %v5303_v48, %v11326_v13  ;;  %v5489_v41 = vcombine.low %v2626_v52, %v2633_v44  ;;  %9839 = vmatprep.subr.bf16.mxu1 %v10392_v35  ;;  %v13388_v60 = vpop.permute.xlu1 %6573  ;;  %v10398_v24 = vld [vmem:[%s15051_s1 + $0x33c] ss:$24 sps:$4 sm:$0xff]  }
 0x1b6   :  { %6750 = vperm.xlu0 %10244, %v5471_v62   ;;  %v5490_v61 = vcombine.low %v2640_v8, %v2647_v33  ;;  %v2374_v38 = vrot.slane %v15587_v11, %v11087_v16  ;;  %v2381_v49 = vrot.slane %v15587_v11, %v11106_v27  ;;  %v2388_v23 = vrot.slane %v15587_v11, %v11288_v26  ;;  %v13401_v62 = vpop.permute.xlu0 %6594  ;;  %v10404_v8 = vld [vmem:[%s15051_s1 + $0x36c] ss:$24 sps:$4 sm:$0xff]  }
 0x1b7   :  { %15588 = vst [vmem:[#allocation45_spill] sm:$0xff] %v13388_v60  ;;  %v13394_v44 = vmul.f32 0.015625, %v13237_v30  ;;  %v5318_v35 = vcombine.low %v5310_v18, %v5317_v54  ;;  %v13397_v48 = vmul.f32 0.015625, %v13253_v22  ;;  %v5497_v52 = vrot.slane %v5489_v41, %v11326_v13  ;;  %9831 = vmatmul.mubr.bf16.vlgmr.msra.gmra.mrb[4].mxu1 %v12786_v4  ;;  %15591 = vst [vmem:[#allocation56_spill] sm:$0xff] %v13401_v62  ;;  %v15592_v30 = vld [vmem:[#allocation98_spill] sm:$0xff] }
 0x1b8   :  { %v5504_v33 = vrot.slane %v5490_v61, %v11326_v13  ;;  %v2395_v60 = vrot.slane %v15587_v11, %v11308_v20  ;;  %v5336_v3 = vcombine.low %v2374_v38, %v2381_v49  ;;  %9840 = vmatpush1.bf16.msra.mxu1 %v10390_v37  ;;  %v2682_v22 = vrot.slane %v15592_v30, %v11087_v16  ;;  %v10396_v61 = vld [vmem:[%s15051_s1 + $0x338] ss:$24 sps:$4 sm:$0xff]  }
 0x1b9   :  { %15589 = vst [vmem:[#allocation54_spill] sm:$0xff] %v13394_v44  ;;  %15590 = vst [vmem:[#allocation50_spill] sm:$0xff] %v13397_v48  ;;  %6723 = vperm.xlu1 %10245, %v5318_v35   ;;  %v2689_v18 = vrot.slane %v15592_v30, %v11106_v27  ;;  %v2696_v54 = vrot.slane %v15592_v30, %v11288_v26  ;;  %v2703_v41 = vrot.slane %v15592_v30, %v11308_v20  ;;  %v13420_v35 = vpop.permute.xlu1 %6576 }
 0x1ba   :  { %v8107_v11 = vunpack.c.h.b16 %v13359_v21  ;;  %v5505_v37 = vcombine.low %v5497_v52, %v5504_v33  ;;  %v5337_v38 = vcombine.low %v2388_v23, %v2395_v60  ;;  %v5344_v49 = vrot.slane %v5336_v3, %v11326_v13  ;;  %9841 = vmatprep.subr.bf16.mxu1 %v10398_v24  ;;  %15593 = vst [vmem:[#allocation49_spill] sm:$0xff] %v13420_v35  ;;  %v13431_v52 = vpop.permute.xlu0 %6600 }
 0x1bb   :  { %v13427_v30 = vpack.c.bf16 %v13394_v44, %v13397_v48  ;;  %v5523_v62 = vcombine.low %v2682_v22, %v2689_v18  ;;  %v5524_v15 = vcombine.low %v2696_v54, %v2703_v41  ;;  %v2430_v57 = vrot.slane %v15594_v14, %v11087_v16  ;;  %15595 = vst [vmem:[#allocation83_spill] sm:$0xff] %v13431_v52  ;;  %v15596_v18 = vld [vmem:[#allocation22_spill] sm:$0xff] }
 0x1bc   :  { %6756 = vperm.xlu0 %10244, %v5505_v37   ;;  %v5351_v23 = vrot.slane %v5337_v38, %v11326_v13  ;;  %v2437_v3 = vrot.slane %v15594_v14, %v11106_v27  ;;  %v2444_v60 = vrot.slane %v15594_v14, %v11288_v26  ;;  %v2451_v24 = vrot.slane %v15594_v14, %v11308_v20  ;;  %v10402_v14 = vld [vmem:[%s15051_s1 + $0x368] ss:$24 sps:$4 sm:$0xff]  }
 0x1bd   :  { %v5531_v33 = vrot.slane %v5523_v62, %v11326_v13  ;;  %v5538_v22 = vrot.slane %v5524_v15, %v11326_v13  ;;  %v2738_v54 = vrot.slane %v15596_v18, %v11087_v16  ;;  %v2745_v41 = vrot.slane %v15596_v18, %v11106_v27  ;;  %9842 = vmatpush1.bf16.msra.mxu1 %v10396_v61  ;;  %v13451_v62 = vpop.permute.xlu1 %6579 }
 0x1be   :  { %v5352_v37 = vcombine.low %v5344_v49, %v5351_v23  ;;  %v5370_v38 = vcombine.low %v2430_v57, %v2437_v3  ;;  %v5371_v52 = vcombine.low %v2444_v60, %v2451_v24  ;;  %v2752_v35 = vrot.slane %v15596_v18, %v11288_v26  ;;  %9843 = vmatprep.subr.bf16.mxu1 %v10404_v8  ;;  %v13458_v57 = vpop.permute.xlu0 %6606  ;;  %v10410_v23 = vld [vmem:[%s15051_s1 + $0x39c] ss:$24 sps:$4 sm:$0xff]  }
 0x1bf   :  { %15597 = vst [vmem:[#allocation81_spill] sm:$0xff] %v13451_v62  ;;  %v13454_v15 = vmul.f32 0.015625, %v13262_v2  ;;  %v5539_v9 = vcombine.low %v5531_v33, %v5538_v22  ;;  %v2759_v61 = vrot.slane %v15596_v18, %v11308_v20  ;;  %v5557_v49 = vcombine.low %v2738_v54, %v2745_v41  ;;  %15599 = vst [vmem:[#allocation82_spill] sm:$0xff] %v13458_v57  ;;  %v15600_v60 = vld [vmem:[#allocation87_spill] sm:$0xff] }
 0x1c0   :  { %6729 = vperm.xlu1 %10245, %v5352_v37   ;;  %v5378_v3 = vrot.slane %v5370_v38, %v11326_v13  ;;  %v5385_v8 = vrot.slane %v5371_v52, %v11326_v13  ;;  %v2486_v2 = vrot.slane %v15600_v60, %v11087_v16  ;;  %v2493_v24 = vrot.slane %v15600_v60, %v11106_v27  ;;  %v15602_v38 = vld [vmem:[#allocation71_spill] sm:$0xff] }
 0x1c1   :  { %15598 = vst [vmem:[#allocation86_spill] sm:$0xff] %v13454_v15  ;;  %6762 = vperm.xlu0 %10244, %v5539_v9   ;;  %v5558_v33 = vcombine.low %v2752_v35, %v2759_v61  ;;  %v5565_v22 = vrot.slane %v5557_v49, %v11326_v13  ;;  %v2500_v18 = vrot.slane %v15600_v60, %v11288_v26  ;;  %v13475_v41 = vmul.f32 0.015625, %v13297_v58  ;;  %v10408_v9 = vld [vmem:[%s15051_s1 + $0x398] ss:$24 sps:$4 sm:$0xff]   ;;  %v13482_v35 = vpop.permute.xlu1 %6582 }
 0x1c2   :  { %v2507_v54 = vrot.slane %v15600_v60, %v11308_v20  ;;  %v5386_v52 = vcombine.low %v5378_v3, %v5385_v8  ;;  %v5404_v37 = vcombine.low %v2486_v2, %v2493_v24  ;;  %v2794_v57 = vrot.slane %v15602_v38, %v11087_v16  ;;  %9844 = vmatpush1.bf16.msra.mxu1 %v10402_v14  ;;  %v13489_v3 = vpop.permute.xlu0 %6612 }
 0x1c3   :  { %15601 = vst [vmem:[#allocation55_spill] sm:$0xff] %v13475_v41  ;;  %15603 = vst [vmem:[#allocation96_spill] sm:$0xff] %v13482_v35  ;;  %v5572_v61 = vrot.slane %v5558_v33, %v11326_v13  ;;  %v2801_v60 = vrot.slane %v15602_v38, %v11106_v27  ;;  %v2808_v58 = vrot.slane %v15602_v38, %v11288_v26  ;;  %9845 = vmatprep.subr.bf16.mxu1 %v10410_v23  ;;  %v10416_v23 = vld [vmem:[%s15051_s1 + $0x3cc] ss:$24 sps:$4 sm:$0xff]   ;;  %v10414_v35 = vld [vmem:[%s15051_s1 + $0x3c8] ss:$24 sps:$4 sm:$0xff]  }
 0x1c4   :  { %v5405_v49 = vcombine.low %v2500_v18, %v2507_v54  ;;  %v15604_v14 = vunpack.c.l.b16 %v13359_v21  ;;  %v13497_v2 = vrot.slane %v8107_v11, %v15519_v7  ;;  %6735 = vperm.xlu1 %10245, %v5386_v52   ;;  %v5412_v24 = vrot.slane %v5404_v37, %v11326_v13 }
 0x1c5   :  { %v2815_v33 = vrot.slane %v15602_v38, %v11308_v20  ;;  %v8108_v18 = vunpack.c.l.b16 %v13427_v30  ;;  %v5573_v54 = vcombine.low %v5565_v22, %v5572_v61  ;;  %v13509_v11 = vpack.c.bf16 %v13454_v15, %v13475_v41  ;;  %v13518_v22 = vpop.permute.xlu1 %6585 }
 0x1c6   :  { %v13494_v8 = vrot.slane %v15604_v14, %v15518_v39  ;;  %v5419_v21 = vrot.slane %v5405_v49, %v11326_v13  ;;  %v5591_v14 = vcombine.low %v2794_v57, %v2801_v60  ;;  %v2542_v37 = vrot.slane %v12918_v28, %v11087_v16  ;;  %9846 = vmatpush1.bf16.msra.mxu1 %v10408_v9  ;;  %v10422_v9 = vld [vmem:[%s15051_s1 + $0x3fc] ss:$24 sps:$4 sm:$0xff]  }
 0x1c7   :  { %v5592_v52 = vcombine.low %v2808_v58, %v2815_v33  ;;  %v2549_v38 = vrot.slane %v12918_v28, %v11106_v27  ;;  %15605 = vst [vmem:[#allocation57_spill] sm:$0xff] %v13518_v22  ;;  %6768 = vperm.xlu0 %10244, %v5573_v54   ;;  %v2556_v49 = vrot.slane %v12918_v28, %v11288_v26  ;;  %v13525_v58 = vpop.permute.xlu0 %6618  ;;  %v8109_v33 = vunpack.c.h.b16 %v13427_v30 }
 0x1c8   :  { %v5420_v57 = vcombine.low %v5412_v24, %v5419_v21  ;;  %v5599_v61 = vrot.slane %v5591_v14, %v11326_v13  ;;  %v2563_v60 = vrot.slane %v12918_v28, %v11308_v20  ;;  %v15606_v24 = vld [vmem:[#allocation19_spill] sm:$0xff]  ;;  %9847 = vmatprep.subr.bf16.mxu1 %v10416_v23  ;;  %v15610_v44 = vunpack.c.l.b16 %v15551_v34 }
 0x1c9   :  { %v5606_v22 = vrot.slane %v5592_v52, %v11326_v13  ;;  %v5438_v54 = vcombine.low %v2542_v37, %v2549_v38  ;;  %v2850_v21 = vrot.slane %v15606_v24, %v11087_v16  ;;  %v2857_v28 = vrot.slane %v15606_v24, %v11106_v27  ;;  %v10420_v23 = vld [vmem:[%s15051_s1 + $0x3f8] ss:$24 sps:$4 sm:$0xff]   ;;  %v13546_v38 = vpop.permute.xlu1 %6591 }
 0x1ca   :  { %6741 = vperm.xlu1 %10245, %v5420_v57   ;;  %v5439_v14 = vcombine.low %v2556_v49, %v2563_v60  ;;  %v2864_v62 = vrot.slane %v15606_v24, %v11288_v26  ;;  %v2871_v15 = vrot.slane %v15606_v24, %v11308_v20  ;;  %v8047_v52 = vunpack.c.h.b16 %v12992_v50  ;;  %9848 = vmatpush1.bf16.msra.mxu1 %v10414_v35 }
 0x1cb   :  { %v5607_v41 = vcombine.low %v5599_v61, %v5606_v22  ;;  %v5446_v30 = vrot.slane %v5438_v54, %v11326_v13  ;;  %v8110_v37 = vunpack.c.l.b16 %v13509_v11  ;;  %15607 = vst [vmem:[#allocation98_spill] sm:$0xff] %v13546_v38  ;;  %v5625_v49 = vcombine.low %v2850_v21, %v2857_v28  ;;  %9849 = vmatprep.subr.bf16.mxu1 %v10422_v9  ;;  %v13550_v22 = vpop.permute.xlu0 %6624  ;;  %v15608_v61 = vld [vmem:[#allocation88_spill] sm:$0xff]  ;;  %v15609_v54 = vld [vmem:[#allocation90_spill] sm:$0xff]  ;;  %v15613_v28 = vld [vmem:[#allocation91_spill] sm:$0xff] }
 0x1cc   :  { %v5453_v57 = vrot.slane %v5439_v14, %v11326_v13  ;;  %v5626_v60 = vcombine.low %v2864_v62, %v2871_v15  ;;  %v8111_v24 = vunpack.c.h.b16 %v13509_v11  ;;  %v8392_v35 = vsel %vm7004_vm8, %v15609_v54, %v15608_v61  ;;  %v15614_v61 = vld [vmem:[#allocation94_spill] sm:$0xff] }
 0x1cd   :  { %6774 = vperm.xlu0 %10244, %v5607_v41   ;;  %v8411_v48 = vrot.slane %v15610_v44, %v15474_v56  ;;  %v15611_v38 = vunpack.c.h.b16 %v15551_v34  ;;  %v15612_v62 = vunpack.c.l.b16 %v12992_v50  ;;  %v10428_v41 = vld [vmem:[%s15051_s1 + $0x42c] ss:$24 sps:$4 sm:$0xff]   ;;  %v5633_v9 = vrot.slane %v5625_v49, %v11326_v13 }
 0x1ce   :  { %v5454_v11 = vcombine.low %v5446_v30, %v5453_v57  ;;  %v5640_v21 = vrot.slane %v5626_v60, %v11326_v13  ;;  %v8397_v44 = vsel %vm7011_vm9, %v15613_v28, %v8392_v35  ;;  %v8708_v50 = vsel %vm7004_vm8, %v13376_v40, %v13352_v17  ;;  %9850 = vmatpush1.bf16.msra.mxu1 %v10420_v23  ;;  %v10426_v30 = vld [vmem:[%s15051_s1 + $0x428] ss:$24 sps:$4 sm:$0xff]   ;;  %v13581_v57 = vpop.permute.xlu1 %6597  ;;  %v10434_v40 = vld [vmem:[%s15051_s1 + $0x45c] ss:$24 sps:$4 sm:$0xff]  }
 0x1cf   :  { %v8416_v14 = vrot.slane %v15611_v38, %v15481_v51  ;;  %v8421_v15 = vrot.slane %v15612_v62, %v15485_v59  ;;  %v8402_v34 = vsel %vm7018_vm10, %v15614_v61, %v8397_v44  ;;  %v8426_v38 = vrot.slane %v8047_v52, %v15490_v32  ;;  %15615 = vst [vmem:[#allocation84_spill] sm:$0xff] %v13581_v57  ;;  %v13588_v17 = vpop.permute.xlu0 %6630  ;;  %v15618_v44 = vld [vmem:[#allocation42_spill] sm:$0xff]  ;;  %v15619_v61 = vld [vmem:[#allocation47_spill] sm:$0xff] }
 0x1d0   :  { %v8727_v54 = vrot.slane %v8108_v18, %v15474_v56  ;;  %6747 = vperm.xlu1 %10245, %v5454_v11   ;;  %v5641_v49 = vcombine.low %v5633_v9, %v5640_v21  ;;  %v8407_v60 = vsel %vm7025_vm11, %v12982_v0, %v8402_v34  ;;  %v8713_v52 = vsel %vm7011_vm9, %v13379_v31, %v8708_v50  ;;  %v15616_v11 = vld [vmem:[#allocation52_spill] sm:$0xff]  ;;  %v15620_v34 = vld [vmem:[#allocation46_spill] sm:$0xff] }
 0x1d1   :  { %v8732_v35 = vrot.slane %v8109_v33, %v15481_v51  ;;  %v8412_v18 = vsel %vm7032_vm12, %v8411_v48, %v8407_v60  ;;  %v8718_v23 = vsel %vm7018_vm10, %v13494_v8, %v8713_v52  ;;  %v8737_v62 = vrot.slane %v8110_v37, %v15485_v59  ;;  %9851 = vmatprep.subr.bf16.mxu1 %v10428_v41 }
 0x1d2   :  { %v8742_v0 = vrot.slane %v8111_v24, %v15490_v32  ;;  %6780 = vperm.xlu0 %10244, %v5641_v49   ;;  %v8417_v31 = vsel %vm7039_vm13, %v8416_v14, %v8412_v18  ;;  %v8723_v33 = vsel %vm7025_vm11, %v13497_v2, %v8718_v23  ;;  %v8030_v9 = vunpack.c.l.b16 %v15616_v11  ;;  %9852 = vmatpush1.bf16.msra.mxu1 %v10426_v30  ;;  %v10432_v24 = vld [vmem:[%s15051_s1 + $0x458] ss:$24 sps:$4 sm:$0xff]   ;;  %v13610_v14 = vpop.permute.xlu1 %6603  ;;  %v10440_v30 = vld [vmem:[%s15051_s1 + $0x48c] ss:$24 sps:$4 sm:$0xff]  }
 0x1d3   :  { %v8031_v21 = vunpack.c.h.b16 %v15616_v11  ;;  %v8422_v48 = vsel %vm7046_vm14, %v8421_v15, %v8417_v31  ;;  %v8728_v28 = vsel %vm7032_vm12, %v8727_v54, %v8723_v33  ;;  %v8094_v8 = vunpack.c.l.b16 %v13349_v25  ;;  %15617 = vst [vmem:[#allocation22_spill] sm:$0xff] %v13610_v14  ;;  %9853 = vmatprep.subr.bf16.mxu1 %v10434_v40  ;;  %v15624_v40 = vld [vmem:[#allocation78_spill] sm:$0xff] }
 0x1d4   :  { %v8095_v37 = vunpack.c.h.b16 %v13349_v25  ;;  %v8427_v2 = vsel %vm7053_vm15, %v8426_v38, %v8422_v48  ;;  %v8733_v41 = vsel %vm7039_vm13, %v8732_v35, %v8728_v28  ;;  %v8313_v15 = vsel %vm7004_vm8, %v15619_v61, %v15618_v44  ;;  %v13620_v25 = vpop.permute.xlu0 %6636  ;;  %v15622_v38 = vld [vmem:[#allocation77_spill] sm:$0xff]  ;;  %v15625_v48 = vld [vmem:[#allocation79_spill] sm:$0xff] }
 0x1d5   :  { %v15621_v50 = vunpack.c.l.b16 %v15620_v34  ;;  %v8738_v49 = vsel %vm7046_vm14, %v8737_v62, %v8733_v41  ;;  %v8318_v60 = vsel %vm7011_vm9, %v15622_v38, %v8313_v15  ;;  %v15623_v52 = vunpack.c.h.b16 %v15620_v34  ;;  %v15628_v38 = vld [vmem:[#allocation97_spill] sm:$0xff] }
 0x1d6   :  { %v8342_v18 = vrot.slane %v8030_v9, %v15485_v59  ;;  %v8743_v23 = vsel %vm7053_vm15, %v8742_v0, %v8738_v49  ;;  %v8323_v31 = vsel %vm7018_vm10, %v15624_v40, %v8318_v60  ;;  %v8347_v33 = vrot.slane %v8031_v21, %v15490_v32  ;;  %9854 = vmatpush1.bf16.msra.mxu1 %v10432_v24  ;;  %v10438_v21 = vld [vmem:[%s15051_s1 + $0x488] ss:$24 sps:$4 sm:$0xff]   ;;  %v13650_v44 = vpop.permute.xlu1 %6609  ;;  %v10446_v24 = vld [vmem:[%s15051_s1 + $0x4bc] ss:$24 sps:$4 sm:$0xff]   ;;  %v10452_v40 = vld [vmem:[%s15051_s1 + $0x4ec] ss:$24 sps:$4 sm:$0xff]  }
 0x1d7   :  { %v8332_v54 = vrot.slane %v15621_v50, %v15474_v56  ;;  %v8337_v35 = vrot.slane %v15623_v52, %v15481_v51  ;;  %v8629_v62 = vsel %vm7004_vm8, %v13034_v36, %v13031_v43  ;;  %v8747_v11 = vsel %vm7608_vm0, %v8743_v23, %v8427_v2  ;;  %9855 = vmatprep.subr.bf16.mxu1 %v10440_v30 }
 0x1d8   :  { %v8328_v28 = vsel %vm7025_vm11, %v15625_v48, %v8323_v31  ;;  %v8634_v41 = vsel %vm7011_vm9, %v13037_v12, %v8629_v62  ;;  %v15626_v0 = vunpack.c.l.b16 %v13132_v1  ;;  %v13652_v36 = vpack.c.b16 %v8747_v11, %v8747_v11  ;;  %v13660_v15 = vpop.permute.xlu0 %6642  ;;  %v15629_v48 = vld [vmem:[#allocation25_spill] sm:$0xff] }
 0x1d9   :  { %v8333_v43 = vsel %vm7032_vm12, %v8332_v54, %v8328_v28  ;;  %v8639_v2 = vsel %vm7018_vm10, %v13108_v19, %v8634_v41  ;;  %v15627_v12 = vunpack.c.h.b16 %v13132_v1  ;;  %v8658_v54 = vrot.slane %v8094_v8, %v15485_v59  ;;  %v10444_v8 = vld [vmem:[%s15051_s1 + $0x4b8] ss:$24 sps:$4 sm:$0xff]  }
 0x1da   :  { %v8648_v9 = vrot.slane %v15626_v0, %v15474_v56  ;;  %v8338_v34 = vsel %vm7039_vm13, %v8337_v35, %v8333_v43  ;;  %v8644_v50 = vsel %vm7025_vm11, %v13111_v47, %v8639_v2  ;;  %v8663_v19 = vrot.slane %v8095_v37, %v15490_v32  ;;  %9789 = vmatprep.mubr.bf16.mxu0 %v13652_v36  ;;  %v13682_v37 = vpop.permute.xlu1 %6615  ;;  %v10393_v41 = vld [vmem:[%s15051_s1 + $0x10] ss:$24 sps:$4 sm:$0xff]  }
 0x1db   :  { %v8653_v61 = vrot.slane %v15627_v12, %v15481_v51  ;;  %v8343_v1 = vsel %vm7046_vm14, %v8342_v18, %v8338_v34  ;;  %9871 = vmatprep.mubr.bf16.mxu1 %v13652_v36  ;;  %v2598_v60 = vrot.slane %v15628_v38, %v11087_v16  ;;  %v2605_v47 = vrot.slane %v15628_v38, %v11106_v27 }
 0x1dc   :  { %v8649_v30 = vsel %vm7032_vm12, %v8648_v9, %v8644_v50  ;;  %9856 = vmatpush1.bf16.msra.mxu1 %v10438_v21  ;;  %v2612_v35 = vrot.slane %v15628_v38, %v11288_v26  ;;  %v2619_v18 = vrot.slane %v15628_v38, %v11308_v20  ;;  %v13689_v23 = vpop.permute.xlu0 %6648  ;;  %v8348_v31 = vsel %vm7053_vm15, %v8347_v33, %v8343_v1 }
 0x1dd   :  { %v8654_v49 = vsel %vm7039_vm13, %v8653_v61, %v8649_v30  ;;  %9857 = vmatprep.subr.bf16.mxu1 %v10446_v24  ;;  %v5472_v11 = vcombine.low %v2598_v60, %v2605_v47  ;;  %v2906_v28 = vrot.slane %v15629_v48, %v11087_v16  ;;  %v2913_v21 = vrot.slane %v15629_v48, %v11106_v27  ;;  %v10401_v61 = vld [vmem:[%s15051_s1 + $0x44] ss:$24 sps:$4 sm:$0xff]   ;;  %v10450_v60 = vld [vmem:[%s15051_s1 + $0x4e8] ss:$24 sps:$4 sm:$0xff]  }
 0x1de   :  { %v8659_v52 = vsel %vm7046_vm14, %v8658_v54, %v8654_v49  ;;  %v5473_v9 = vcombine.low %v2612_v35, %v2619_v18  ;;  %v2920_v43 = vrot.slane %v15629_v48, %v11288_v26  ;;  %v2927_v12 = vrot.slane %v15629_v48, %v11308_v20  ;;  %v13714_v24 = vpop.permute.xlu1 %6621  ;;  %v15630_v54 = vld [vmem:[#allocation99_spill] sm:$0xff] }
 0x1df   :  { %v8664_v62 = vsel %vm7053_vm15, %v8663_v19, %v8659_v52  ;;  %v5480_v2 = vrot.slane %v5472_v11, %v11326_v13  ;;  %v5659_v50 = vcombine.low %v2906_v28, %v2913_v21  ;;  %v2654_v19 = vrot.slane %v15630_v54, %v11087_v16  ;;  %v10399_v52 = vld [vmem:[%s15051_s1 + $0x40] ss:$24 sps:$4 sm:$0xff]  }
 0x1e0   :  { %v8746_v0 = vsel %vm7608_vm0, %v8664_v62, %v8348_v31  ;;  %9858 = vmatpush1.bf16.msra.mxu1 %v10444_v8  ;;  %v5487_v34 = vrot.slane %v5473_v9, %v11326_v13  ;;  %v2661_v1 = vrot.slane %v15630_v54, %v11106_v27  ;;  %v5660_v30 = vcombine.low %v2920_v43, %v2927_v12  ;;  %v13734_v18 = vpop.permute.xlu0 %6654  ;;  %v15631_v62 = vld [vmem:[#allocation30_spill] sm:$0xff] }
 0x1e1   :  { %v13706_v33 = vpack.c.b16 %v8746_v0, %v8746_v0  ;;  %9859 = vmatprep.subr.bf16.mxu1 %v10452_v40  ;;  %v2668_v49 = vrot.slane %v15630_v54, %v11288_v26  ;;  %v2675_v38 = vrot.slane %v15630_v54, %v11308_v20  ;;  %v5667_v8 = vrot.slane %v5659_v50, %v11326_v13  ;;  %v10458_v9 = vld [vmem:[%s15051_s1 + $0x51c] ss:$24 sps:$4 sm:$0xff]   ;;  %v10405_v54 = vld [vmem:[%s15051_s1 + $0x70] ss:$24 sps:$4 sm:$0xff]  }
 0x1e2   :  { %v5488_v47 = vcombine.low %v5480_v2, %v5487_v34  ;;  %v5506_v35 = vcombine.low %v2654_v19, %v2661_v1  ;;  %v5674_v40 = vrot.slane %v5660_v30, %v11326_v13  ;;  %v2962_v11 = vrot.slane %v15631_v62, %v11087_v16  ;;  %v15632_v2 = vld [vmem:[#allocation101_spill] sm:$0xff] }
 0x1e3   :  { %9790 = vmatmul.mubr.bf16.vlgmr.msra.gmra.mrb[0].mxu0 %v13706_v33  ;;  %v5507_v31 = vcombine.low %v2668_v49, %v2675_v38  ;;  %v2969_v28 = vrot.slane %v15631_v62, %v11106_v27  ;;  %v2983_v0 = vrot.slane %v15631_v62, %v11308_v20  ;;  %v2710_v12 = vrot.slane %v15632_v2, %v11087_v16  ;;  %v10413_v38 = vld [vmem:[%s15051_s1 + $0xa4] ss:$24 sps:$4 sm:$0xff]  }
 0x1e4   :  { %9881 = vmatpush1.bf16.msra.mxu0 %v10393_v41  ;;  %9912 = vmatprep.mubr.bf16.mxu0 %v12894_v42  ;;  %v10407_v42 = vld [vmem:[%s15051_s1 + $0x74] ss:$24 sps:$4 sm:$0xff]   ;;  %v5514_v48 = vrot.slane %v5506_v35, %v11326_v13  ;;  %v2976_v41 = vrot.slane %v15631_v62, %v11288_v26  ;;  %v5675_v21 = vcombine.low %v5667_v8, %v5674_v40  ;;  %v15633_v40 = vld [vmem:[#allocation36_spill] sm:$0xff] }
 0x1e5   :  { %9882 = vmatprep.subr.bf16.mxu0 %v10401_v61  ;;  %6753 = vperm.xlu1 %10245, %v5488_v47   ;;  %v5521_v43 = vrot.slane %v5507_v31, %v11326_v13  ;;  %v13755_v61 = vpop.permute.xlu1 %6627  ;;  %v5693_v34 = vcombine.low %v2962_v11, %v2969_v28  ;;  %v2717_v19 = vrot.slane %v15632_v2, %v11106_v27 }
 0x1e6   :  { %9860 = vmatpush1.bf16.msra.mxu1 %v10450_v60  ;;  %v5694_v50 = vcombine.low %v2976_v41, %v2983_v0  ;;  %v2724_v1 = vrot.slane %v15632_v2, %v11288_v26  ;;  %6786 = vperm.xlu0 %10244, %v5675_v21   ;;  %v2731_v49 = vrot.slane %v15632_v2, %v11308_v20  ;;  %v10411_v0 = vld [vmem:[%s15051_s1 + $0xa0] ss:$24 sps:$4 sm:$0xff]  }
 0x1e7   :  { %v5522_v30 = vcombine.low %v5514_v48, %v5521_v43  ;;  %v5701_v60 = vrot.slane %v5693_v34, %v11326_v13  ;;  %v5540_v8 = vcombine.low %v2710_v12, %v2717_v19  ;;  %9861 = vmatprep.subr.bf16.mxu1 %v10458_v9  ;;  %v3018_v31 = vrot.slane %v15633_v40, %v11087_v16  ;;  %v15634_v43 = vld [vmem:[#allocation72_spill] sm:$0xff]  ;;  %v10419_v34 = vld [vmem:[%s15051_s1 + $0xd4] ss:$24 sps:$4 sm:$0xff]  }
 0x1e8   :  { %9883 = vmatpush1.bf16.msra.mxu0 %v10399_v52  ;;  %v5708_v47 = vrot.slane %v5694_v50, %v11326_v13  ;;  %v13771_v52 = vpop.permute.xlu0 %6660  ;;  %v5541_v35 = vcombine.low %v2724_v1, %v2731_v49  ;;  %v3025_v62 = vrot.slane %v15633_v40, %v11106_v27  ;;  %v3032_v11 = vrot.slane %v15633_v40, %v11288_v26 }
 0x1e9   :  { %9884 = vmatprep.subr.bf16.mxu0 %v10407_v42  ;;  %6759 = vperm.xlu1 %10245, %v5522_v30   ;;  %v10456_v42 = vld [vmem:[%s15051_s1 + $0x518] ss:$24 sps:$4 sm:$0xff]   ;;  %v5548_v28 = vrot.slane %v5540_v8, %v11326_v13  ;;  %v3039_v41 = vrot.slane %v15633_v40, %v11308_v20  ;;  %v2766_v2 = vrot.slane %v15634_v43, %v11087_v16  ;;  %v13796_v50 = vpop.permute.xlu1 %6633  ;;  %v10464_v30 = vld [vmem:[%s15051_s1 + $0x54c] ss:$24 sps:$4 sm:$0xff]  }
 0x1ea   :  { %v5709_v48 = vcombine.low %v5701_v60, %v5708_v47  ;;  %v5555_v9 = vrot.slane %v5541_v35, %v11326_v13  ;;  %v5727_v21 = vcombine.low %v3018_v31, %v3025_v62  ;;  %v2773_v12 = vrot.slane %v15634_v43, %v11106_v27  ;;  %9862 = vmatpush1.bf16.msra.mxu1 %v10456_v42  ;;  %v10462_v47 = vld [vmem:[%s15051_s1 + $0x548] ss:$24 sps:$4 sm:$0xff]  }
 0x1eb   :  { %v2780_v19 = vrot.slane %v15634_v43, %v11288_v26  ;;  %v2787_v1 = vrot.slane %v15634_v43, %v11308_v20  ;;  %v3074_v40 = vrot.slane %v12629_v55, %v11087_v16  ;;  %v3081_v31 = vrot.slane %v12629_v55, %v11106_v27  ;;  %v10417_v62 = vld [vmem:[%s15051_s1 + $0xd0] ss:$24 sps:$4 sm:$0xff]   ;;  %9863 = vmatprep.subr.bf16.mxu1 %v10464_v30 }
 0x1ec   :  { %9885 = vmatpush1.bf16.msra.mxu0 %v10405_v54  ;;  %6792 = vperm.xlu0 %10244, %v5709_v48   ;;  %v5728_v54 = vcombine.low %v3032_v11, %v3039_v41  ;;  %v5556_v49 = vcombine.low %v5548_v28, %v5555_v9  ;;  %v5574_v60 = vcombine.low %v2766_v2, %v2773_v12  ;;  %v13817_v11 = vpop.permute.xlu0 %6666  ;;  %v10425_v41 = vld [vmem:[%s15051_s1 + $0x104] ss:$24 sps:$4 sm:$0xff]  }
 0x1ed   :  { %9886 = vmatprep.subr.bf16.mxu0 %v10413_v38  ;;  %v5735_v38 = vrot.slane %v5727_v21, %v11326_v13  ;;  %v5575_v35 = vcombine.low %v2780_v19, %v2787_v1  ;;  %v3088_v48 = vrot.slane %v12629_v55, %v11288_v26  ;;  %v3095_v28 = vrot.slane %v12629_v55, %v11308_v20  ;;  %v15635_v2 = vld [vmem:[#allocation23_spill] sm:$0xff]  ;;  %v13837_v19 = vpop.permute.xlu1 %6639 }
 0x1ee   :  { %v5742_v8 = vrot.slane %v5728_v54, %v11326_v13  ;;  %6765 = vperm.xlu1 %10245, %v5556_v49   ;;  %v5582_v42 = vrot.slane %v5574_v60, %v11326_v13  ;;  %v5761_v21 = vcombine.low %v3074_v40, %v3081_v31  ;;  %v2822_v12 = vrot.slane %v15635_v2, %v11087_v16  ;;  %v10423_v49 = vld [vmem:[%s15051_s1 + $0x100] ss:$24 sps:$4 sm:$0xff]  }
 0x1ef   :  { %v5589_v9 = vrot.slane %v5575_v35, %v11326_v13  ;;  %v5762_v43 = vcombine.low %v3088_v48, %v3095_v28  ;;  %v2829_v54 = vrot.slane %v15635_v2, %v11106_v27  ;;  %v2836_v55 = vrot.slane %v15635_v2, %v11288_v26  ;;  %9864 = vmatpush1.bf16.msra.mxu1 %v10462_v47 }
 0x1f0   :  { %9887 = vmatpush1.bf16.msra.mxu0 %v10411_v0  ;;  %v5743_v0 = vcombine.low %v5735_v38, %v5742_v8  ;;  %v5769_v30 = vrot.slane %v5761_v21, %v11326_v13  ;;  %v2843_v60 = vrot.slane %v15635_v2, %v11308_v20  ;;  %v3130_v8 = vrot.slane %v12668_v5, %v11087_v16  ;;  %v10429_v2 = vld [vmem:[%s15051_s1 + $0x130] ss:$24 sps:$4 sm:$0xff]  }
 0x1f1   :  { %9888 = vmatprep.subr.bf16.mxu0 %v10419_v34  ;;  %v10470_v34 = vld [vmem:[%s15051_s1 + $0x57c] ss:$24 sps:$4 sm:$0xff]   ;;  %v5590_v1 = vcombine.low %v5582_v42, %v5589_v9  ;;  %v5776_v38 = vrot.slane %v5762_v43, %v11326_v13  ;;  %v5608_v47 = vcombine.low %v2822_v12, %v2829_v54  ;;  %v3137_v35 = vrot.slane %v12668_v5, %v11106_v27  ;;  %v13857_v42 = vpop.permute.xlu0 %6672 }
 0x1f2   :  { %6798 = vperm.xlu0 %10244, %v5743_v0   ;;  %v3144_v40 = vrot.slane %v12668_v5, %v11288_v26  ;;  %v3151_v31 = vrot.slane %v12668_v5, %v11308_v20  ;;  %v5609_v28 = vcombine.low %v2836_v55, %v2843_v60  ;;  %v10468_v0 = vld [vmem:[%s15051_s1 + $0x578] ss:$24 sps:$4 sm:$0xff]   ;;  %9865 = vmatprep.subr.bf16.mxu1 %v10470_v34  ;;  %v15636_v5 = vld [vmem:[#allocation32_spill] sm:$0xff] }
 0x1f3   :  { %6771 = vperm.xlu1 %10245, %v5590_v1   ;;  %v5777_v48 = vcombine.low %v5769_v30, %v5776_v38  ;;  %v5795_v9 = vcombine.low %v3130_v8, %v3137_v35  ;;  %v2878_v43 = vrot.slane %v15636_v5, %v11087_v16  ;;  %v2885_v54 = vrot.slane %v15636_v5, %v11106_v27  ;;  %v13875_v1 = vpop.permute.xlu1 %6645  ;;  %v15637_v8 = vld [vmem:[#allocation28_spill] sm:$0xff] }
 0x1f4   :  { %9889 = vmatpush1.bf16.msra.mxu0 %v10417_v62  ;;  %v10431_v62 = vld [vmem:[%s15051_s1 + $0x134] ss:$24 sps:$4 sm:$0xff]   ;;  %v5796_v21 = vcombine.low %v3144_v40, %v3151_v31  ;;  %v5623_v12 = vrot.slane %v5609_v28, %v11326_v13  ;;  %v2892_v55 = vrot.slane %v15636_v5, %v11288_v26  ;;  %v2899_v34 = vrot.slane %v15636_v5, %v11308_v20  ;;  %v10437_v40 = vld [vmem:[%s15051_s1 + $0x164] ss:$24 sps:$4 sm:$0xff]  }
 0x1f5   :  { %9890 = vmatprep.subr.bf16.mxu0 %v10425_v41  ;;  %v5616_v41 = vrot.slane %v5608_v47, %v11326_v13  ;;  %v5803_v30 = vrot.slane %v5795_v9, %v11326_v13  ;;  %v5642_v60 = vcombine.low %v2878_v43, %v2885_v54  ;;  %v3186_v35 = vrot.slane %v15637_v8, %v11087_v16  ;;  %v13893_v9 = vpop.permute.xlu0 %6678 }
 0x1f6   :  { %6804 = vperm.xlu0 %10244, %v5777_v48   ;;  %v5643_v47 = vcombine.low %v2892_v55, %v2899_v34  ;;  %9866 = vmatpush1.bf16.msra.mxu1 %v10468_v0  ;;  %v3193_v48 = vrot.slane %v15637_v8, %v11106_v27  ;;  %v3200_v28 = vrot.slane %v15637_v8, %v11288_v26  ;;  %v10443_v55 = vld [vmem:[%s15051_s1 + $0x194] ss:$24 sps:$4 sm:$0xff]  }
 0x1f7   :  { %v5624_v38 = vcombine.low %v5616_v41, %v5623_v12  ;;  %v10435_v41 = vld [vmem:[%s15051_s1 + $0x160] ss:$24 sps:$4 sm:$0xff]   ;;  %v5650_v0 = vrot.slane %v5642_v60, %v11326_v13  ;;  %v13911_v60 = vpop.permute.xlu1 %6651  ;;  %v3053_v46 = vrot.slane %v15646_v53, %v11106_v27 }
 0x1f8   :  { %9891 = vmatpush1.bf16.msra.mxu0 %v10423_v49  ;;  %v5810_v49 = vrot.slane %v5796_v21, %v11326_v13  ;;  %v5657_v21 = vrot.slane %v5643_v47, %v11326_v13  ;;  %v5829_v5 = vcombine.low %v3186_v35, %v3193_v48  ;;  %v15638_v12 = vld [vmem:[#allocation104_spill] sm:$0xff] }
 0x1f9   :  { %9892 = vmatprep.subr.bf16.mxu0 %v10431_v62  ;;  %v3207_v62 = vrot.slane %v15637_v8, %v11308_v20  ;;  %6777 = vperm.xlu1 %10245, %v5624_v38   ;;  %v2934_v54 = vrot.slane %v15638_v12, %v11087_v16  ;;  %v10476_v38 = vld [vmem:[%s15051_s1 + $0x5ac] ss:$24 sps:$4 sm:$0xff]  }
 0x1fa   :  { %v5811_v31 = vcombine.low %v5803_v30, %v5810_v49  ;;  %v5658_v34 = vcombine.low %v5650_v0, %v5657_v21  ;;  %v2948_v30 = vrot.slane %v15638_v12, %v11288_v26  ;;  %v2955_v49 = vrot.slane %v15638_v12, %v11308_v20  ;;  %v15639_v48 = vld [vmem:[#allocation24_spill] sm:$0xff]  ;;  %9867 = vmatprep.subr.bf16.mxu1 %v10476_v38 }
 0x1fb   :  { %v5830_v43 = vcombine.low %v3200_v28, %v3207_v62  ;;  %v5837_v47 = vrot.slane %v5829_v5, %v11326_v13  ;;  %v3242_v28 = vrot.slane %v15639_v48, %v11087_v16  ;;  %v3256_v62 = vrot.slane %v15639_v48, %v11288_v26  ;;  %v10441_v0 = vld [vmem:[%s15051_s1 + $0x190] ss:$24 sps:$4 sm:$0xff]   ;;  %v10447_v38 = vld [vmem:[%s15051_s1 + $0x1c0] ss:$24 sps:$4 sm:$0xff]  }
 0x1fc   :  { %9893 = vmatpush1.bf16.msra.mxu0 %v10429_v2  ;;  %6810 = vperm.xlu0 %10244, %v5811_v31   ;;  %v2941_v2 = vrot.slane %v15638_v12, %v11106_v27  ;;  %v5677_v31 = vcombine.low %v2948_v30, %v2955_v49  ;;  %v13930_v12 = vpop.permute.xlu0 %6684 }
 0x1fd   :  { %9894 = vmatprep.subr.bf16.mxu0 %v10437_v40  ;;  %v5844_v8 = vrot.slane %v5830_v43, %v11326_v13  ;;  %6783 = vperm.xlu1 %10245, %v5658_v34   ;;  %v3249_v40 = vrot.slane %v15639_v48, %v11106_v27  ;;  %v10449_v43 = vld [vmem:[%s15051_s1 + $0x1c4] ss:$24 sps:$4 sm:$0xff]   ;;  %15640 = vst [vmem:[#allocation87_spill] sm:$0xff] %v13930_v12  ;;  %v15641_v34 = vld [vmem:[#allocation37_spill] sm:$0xff] }
 0x1fe   :  { %v5676_v35 = vcombine.low %v2934_v54, %v2941_v2  ;;  %v5691_v54 = vrot.slane %v5677_v31, %v11326_v13  ;;  %v2990_v30 = vrot.slane %v15641_v34, %v11087_v16 }
 0x1ff   :  { %v5845_v21 = vcombine.low %v5837_v47, %v5844_v8  ;;  %v5863_v2 = vcombine.low %v3242_v28, %v3249_v40  ;;  %v2997_v47 = vrot.slane %v15641_v34, %v11106_v27  ;;  %v3011_v8 = vrot.slane %v15641_v34, %v11308_v20  ;;  %v13948_v28 = vpop.permute.xlu1 %6657  ;;  %v15642_v40 = vld [vmem:[#allocation14_spill] sm:$0xff] }
 0x200   :  { %9895 = vmatpush1.bf16.msra.mxu0 %v10435_v41  ;;  %v5684_v5 = vrot.slane %v5676_v35, %v11326_v13  ;;  %v3263_v41 = vrot.slane %v15639_v48, %v11308_v20  ;;  %v10474_v35 = vld [vmem:[%s15051_s1 + $0x5a8] ss:$24 sps:$4 sm:$0xff]  }
 0x201   :  { %9896 = vmatprep.subr.bf16.mxu0 %v10443_v55  ;;  %6816 = vperm.xlu0 %10244, %v5845_v21   ;;  %v3004_v55 = vrot.slane %v15641_v34, %v11288_v26  ;;  %v5871_v48 = vrot.slane %v5863_v2, %v11326_v13 }
 0x202   :  { %v5864_v49 = vcombine.low %v3256_v62, %v3263_v41  ;;  %v5692_v31 = vcombine.low %v5684_v5, %v5691_v54  ;;  %v7062_v62 = vrot.slane %v13489_v3, %v15642_v40  ;;  %v5710_v41 = vcombine.low %v2990_v30, %v2997_v47  ;;  %v15643_v5 = vld [vmem:[#allocation29_spill] sm:$0xff]  ;;  %v15644_v47 = vld [vmem:[#allocation12_spill] sm:$0xff]  ;;  %9868 = vmatpush1.bf16.msra.mxu1 %v10474_v35 }
 0x203   :  { %v5711_v34 = vcombine.low %v3004_v55, %v3011_v8  ;;  %v3298_v54 = vrot.slane %v15643_v5, %v11087_v16  ;;  %v3312_v2 = vrot.slane %v15643_v5, %v11288_v26  ;;  %v3319_v14 = vrot.slane %v15643_v5, %v11308_v20  ;;  %v10455_v3 = vld [vmem:[%s15051_s1 + $0x1f4] ss:$24 sps:$4 sm:$0xff]   ;;  %v13968_v8 = vpop.permute.xlu0 %6690 }
 0x204   :  { %9897 = vmatpush1.bf16.msra.mxu0 %v10441_v0  ;;  %v5878_v21 = vrot.slane %v5864_v49, %v11326_v13  ;;  %6789 = vperm.xlu1 %10245, %v5692_v31   ;;  %v3305_v0 = vrot.slane %v15643_v5, %v11106_v27  ;;  %v7058_v55 = vrot.slane %v13650_v44, %v15644_v47 }
 0x205   :  { %9898 = vmatprep.subr.bf16.mxu0 %v10449_v43  ;;  %v5718_v43 = vrot.slane %v5710_v41, %v11326_v13  ;;  %v5725_v49 = vrot.slane %v5711_v34, %v11326_v13  ;;  %15645 = vst [vmem:[#allocation71_spill] sm:$0xff] %v13968_v8  ;;  %v5898_v57 = vcombine.low %v3312_v2, %v3319_v14  ;;  %v10461_v41 = vld [vmem:[%s15051_s1 + $0x224] ss:$24 sps:$4 sm:$0xff]  }
 0x206   :  { %v5879_v30 = vcombine.low %v5871_v48, %v5878_v21  ;;  %v5897_v31 = vcombine.low %v3298_v54, %v3305_v0  ;;  %v3046_v5 = vrot.slane %v15646_v53, %v11087_v16  ;;  %v10453_v48 = vld [vmem:[%s15051_s1 + $0x1f0] ss:$24 sps:$4 sm:$0xff]   ;;  %v7072_v21 = vrot.slane %v13525_v58, %v11012_v45  ;;  %v13989_v58 = vpop.permute.xlu1 %6663 }
 0x207   :  { %v5726_v44 = vcombine.low %v5718_v43, %v5725_v49  ;;  %v3060_v35 = vrot.slane %v15646_v53, %v11288_v26  ;;  %v3067_v14 = vrot.slane %v15646_v53, %v11308_v20  ;;  %v5912_v34 = vrot.slane %v5898_v57, %v11326_v13  ;;  %v10482_v57 = vld [vmem:[%s15051_s1 + $0x5dc] ss:$24 sps:$4 sm:$0xff]  }
 0x208   :  { %9899 = vmatpush1.bf16.msra.mxu0 %v10447_v38  ;;  %6822 = vperm.xlu0 %10244, %v5879_v30   ;;  %v5905_v38 = vrot.slane %v5897_v31, %v11326_v13  ;;  %v7063_v54 = vsel %vm6955_vm1, %v7062_v62, %v7058_v55  ;;  %v5744_v0 = vcombine.low %v3046_v5, %v3053_v46  ;;  %v15647_v30 = vld [vmem:[#allocation59_spill] sm:$0xff]  ;;  %v15648_v55 = vld [vmem:[#allocation13_spill] sm:$0xff] }
 0x209   :  { %9900 = vmatprep.subr.bf16.mxu0 %v10455_v3  ;;  %6795 = vperm.xlu1 %10245, %v5726_v44   ;;  %v5745_v2 = vcombine.low %v3060_v35, %v3067_v14  ;;  %v3354_v43 = vrot.slane %v15647_v30, %v11087_v16  ;;  %v3361_v53 = vrot.slane %v15647_v30, %v11106_v27  ;;  %v10459_v5 = vld [vmem:[%s15051_s1 + $0x220] ss:$24 sps:$4 sm:$0xff]  }
 0x20a   :  { %v3368_v49 = vrot.slane %v15647_v30, %v11288_v26  ;;  %v5913_v62 = vcombine.low %v5905_v38, %v5912_v34  ;;  %v5752_v46 = vrot.slane %v5744_v0, %v11326_v13  ;;  %v3375_v3 = vrot.slane %v15647_v30, %v11308_v20  ;;  %v15649_v14 = vld [vmem:[#allocation20_spill] sm:$0xff]  ;;  %v14013_v34 = vpop.permute.xlu0 %6696  ;;  %v10467_v30 = vld [vmem:[%s15051_s1 + $0x254] ss:$24 sps:$4 sm:$0xff]   ;;  %9869 = vmatprep.subr.bf16.mxu1 %v10482_v57 }
 0x20b   :  { %v7067_v31 = vrot.slane %v13682_v37, %v15648_v55  ;;  %v5759_v44 = vrot.slane %v5745_v2, %v11326_v13  ;;  %v5931_v35 = vcombine.low %v3354_v43, %v3361_v53  ;;  %v3102_v29 = vrot.slane %v15649_v14, %v11087_v16  ;;  %15650 = vst [vmem:[#allocation19_spill] sm:$0xff] %v14013_v34  ;;  %v15651_v43 = vld [vmem:[#allocation16_spill] sm:$0xff] }
 0x20c   :  { %9901 = vmatpush1.bf16.msra.mxu0 %v10453_v48  ;;  %v3109_v38 = vrot.slane %v15649_v14, %v11106_v27  ;;  %6828 = vperm.xlu0 %10244, %v5913_v62   ;;  %v5932_v0 = vcombine.low %v3368_v49, %v3375_v3  ;;  %v3116_v48 = vrot.slane %v15649_v14, %v11288_v26 }
 0x20d   :  { %9902 = vmatprep.subr.bf16.mxu0 %v10461_v41  ;;  %v7068_v37 = vsel %vm6962_vm2, %v7067_v31, %v7063_v54  ;;  %v3123_v2 = vrot.slane %v15649_v14, %v11308_v20  ;;  %v7082_v53 = vrot.slane %v13550_v22, %v15651_v43  ;;  %v5760_v41 = vcombine.low %v5752_v46, %v5759_v44  ;;  %v10480_v54 = vld [vmem:[%s15051_s1 + $0x5d8] ss:$24 sps:$4 sm:$0xff]   ;;  %v14034_v22 = vpop.permute.xlu1 %6669 }
 0x20e   :  { %v5939_v34 = vrot.slane %v5931_v35, %v11326_v13  ;;  %v5778_v62 = vcombine.low %v3102_v29, %v3109_v38  ;;  %v5946_v49 = vrot.slane %v5932_v0, %v11326_v13  ;;  %v15652_v31 = vld [vmem:[#allocation74_spill] sm:$0xff]  ;;  %v7073_v44 = vsel %vm6969_vm3, %v7072_v21, %v7068_v37  ;;  %9870 = vmatpush1.bf16.msra.mxu1 %v10480_v54 }
 0x20f   :  { %v5779_v3 = vcombine.low %v3116_v48, %v3123_v2  ;;  %v3410_v14 = vrot.slane %v15652_v31, %v11087_v16  ;;  %v3417_v8 = vrot.slane %v15652_v31, %v11106_v27  ;;  %6801 = vperm.xlu1 %10245, %v5760_v41   ;;  %v3424_v46 = vrot.slane %v15652_v31, %v11288_v26  ;;  %v10465_v35 = vld [vmem:[%s15051_s1 + $0x250] ss:$24 sps:$4 sm:$0xff]   ;;  %v15653_v48 = vld [vmem:[#allocation15_spill] sm:$0xff] }
 0x210   :  { %9903 = vmatpush1.bf16.msra.mxu0 %v10459_v5  ;;  %v5786_v29 = vrot.slane %v5778_v62, %v11326_v13  ;;  %v3431_v57 = vrot.slane %v15652_v31, %v11308_v20  ;;  %v5947_v38 = vcombine.low %v5939_v34, %v5946_v49  ;;  %v7077_v2 = vrot.slane %v13714_v24, %v15653_v48  ;;  %v15654_v62 = vld [vmem:[#allocation58_spill] sm:$0xff]  ;;  %v10473_v34 = vld [vmem:[%s15051_s1 + $0x284] ss:$24 sps:$4 sm:$0xff]  }
 0x211   :  { %v5793_v5 = vrot.slane %v5779_v3, %v11326_v13  ;;  %v5965_v0 = vcombine.low %v3410_v14, %v3417_v8  ;;  %9904 = vmatprep.subr.bf16.mxu0 %v10467_v30  ;;  %v3158_v12 = vrot.slane %v15654_v62, %v11087_v16  ;;  %v3165_v31 = vrot.slane %v15654_v62, %v11106_v27  ;;  %v14057_v8 = vpop.permute.xlu0 %6702 }
 0x212   :  { %v5966_v41 = vcombine.low %v3424_v46, %v3431_v57  ;;  %v3172_v21 = vrot.slane %v15654_v62, %v11288_v26  ;;  %15655 = vst [vmem:[#allocation88_spill] sm:$0xff] %v14057_v8  ;;  %6834 = vperm.xlu0 %10244, %v5947_v38   ;;  %v7078_v30 = vsel %vm6976_vm4, %v7077_v2, %v7073_v44  ;;  %v15656_v57 = vld [vmem:[#allocation67_spill] sm:$0xff] }
 0x213   :  { %v5794_v24 = vcombine.low %v5786_v29, %v5793_v5  ;;  %v5973_v37 = vrot.slane %v5965_v0, %v11326_v13  ;;  %v3179_v49 = vrot.slane %v15654_v62, %v11308_v20  ;;  %v7092_v3 = vrot.slane %v13588_v17, %v11054_v63  ;;  %v10471_v17 = vld [vmem:[%s15051_s1 + $0x280] ss:$24 sps:$4 sm:$0xff]   ;;  %9872 = vmatmul.mubr.bf16.vlgmr.msra.gmra.mrb[4].mxu1 %v13706_v33 }
 0x214   :  { %v5980_v14 = vrot.slane %v5966_v41, %v11326_v13  ;;  %v5812_v46 = vcombine.low %v3158_v12, %v3165_v31  ;;  %v3466_v54 = vrot.slane %v15656_v57, %v11087_v16  ;;  %9905 = vmatpush1.bf16.msra.mxu0 %v10465_v35  ;;  %v3473_v29 = vrot.slane %v15656_v57, %v11106_v27  ;;  %v14077_v12 = vpop.permute.xlu1 %6675  ;;  %v15657_v41 = vld [vmem:[#allocation17_spill] sm:$0xff] }
 0x215   :  { %6807 = vperm.xlu1 %10245, %v5794_v24   ;;  %v5813_v38 = vcombine.low %v3172_v21, %v3179_v49  ;;  %v3480_v44 = vrot.slane %v15656_v57, %v11288_v26  ;;  %v3487_v5 = vrot.slane %v15656_v57, %v11308_v20  ;;  %v7083_v2 = vsel %vm6983_vm5, %v7082_v53, %v7078_v30  ;;  %v10479_v31 = vld [vmem:[%s15051_s1 + $0x2b4] ss:$24 sps:$4 sm:$0xff]   ;;  %v15658_v57 = vld [vmem:[#allocation76_spill] sm:$0xff]  ;;  %v14097_v30 = vpop.permute.xlu0 %6708 }
 0x216   :  { %v5981_v0 = vcombine.low %v5973_v37, %v5980_v14  ;;  %v5820_v35 = vrot.slane %v5812_v46, %v11326_v13  ;;  %v7087_v62 = vrot.slane %v13755_v61, %v15657_v41  ;;  %9906 = vmatprep.subr.bf16.mxu0 %v10473_v34  ;;  %v5999_v24 = vcombine.low %v3466_v54, %v3473_v29 }
 0x217   :  { %v5827_v21 = vrot.slane %v5813_v38, %v11326_v13  ;;  %v6000_v49 = vcombine.low %v3480_v44, %v3487_v5  ;;  %v3214_v8 = vrot.slane %v15658_v57, %v11087_v16  ;;  %v3221_v61 = vrot.slane %v15658_v57, %v11106_v27  ;;  %v15659_v5 = vld [vmem:[#allocation64_spill] sm:$0xff] }
 0x218   :  { %6840 = vperm.xlu0 %10244, %v5981_v0   ;;  %v7088_v53 = vsel %vm6990_vm6, %v7087_v62, %v7083_v2  ;;  %v3228_v34 = vrot.slane %v15658_v57, %v11288_v26  ;;  %v3235_v37 = vrot.slane %v15658_v57, %v11308_v20  ;;  %v7102_v14 = vrot.slane %v13620_v25, %v15514_v10  ;;  %v10477_v62 = vld [vmem:[%s15051_s1 + $0x2b0] ss:$24 sps:$4 sm:$0xff]  }
 0x219   :  { %v5828_v46 = vcombine.low %v5820_v35, %v5827_v21  ;;  %v6007_v54 = vrot.slane %v5999_v24, %v11326_v13  ;;  %v6014_v38 = vrot.slane %v6000_v49, %v11326_v13  ;;  %9907 = vmatpush1.bf16.msra.mxu0 %v10471_v17  ;;  %v5846_v29 = vcombine.low %v3214_v8, %v3221_v61  ;;  %v10485_v21 = vld [vmem:[%s15051_s1 + $0x2e4] ss:$24 sps:$4 sm:$0xff]   ;;  %v14118_v24 = vpop.permute.xlu1 %6681 }
 0x21a   :  { %v5847_v44 = vcombine.low %v3228_v34, %v3235_v37  ;;  %v3522_v0 = vrot.slane %v15659_v5, %v11087_v16  ;;  %v3529_v2 = vrot.slane %v15659_v5, %v11106_v27  ;;  %9908 = vmatprep.subr.bf16.mxu0 %v10479_v31  ;;  %v3536_v35 = vrot.slane %v15659_v5, %v11288_v26  ;;  %v15660_v37 = vld [vmem:[#allocation73_spill] sm:$0xff] }
 0x21b   :  { %6813 = vperm.xlu1 %10245, %v5828_v46   ;;  %v6015_v25 = vcombine.low %v6007_v54, %v6014_v38  ;;  %v3543_v8 = vrot.slane %v15659_v5, %v11308_v20  ;;  %v7093_v17 = vsel %vm6997_vm7, %v7092_v3, %v7088_v53  ;;  %v5854_v49 = vrot.slane %v5846_v29, %v11326_v13  ;;  %v14137_v5 = vpop.permute.xlu0 %6714 }
 0x21c   :  { %v5861_v31 = vrot.slane %v5847_v44, %v11326_v13  ;;  %v6033_v57 = vcombine.low %v3522_v0, %v3529_v2  ;;  %v7097_v61 = vrot.slane %v13796_v50, %v11071_v6  ;;  %v3270_v46 = vrot.slane %v15660_v37, %v11087_v16  ;;  %v10483_v50 = vld [vmem:[%s15051_s1 + $0x2e0] ss:$24 sps:$4 sm:$0xff]  }
 0x21d   :  { %6846 = vperm.xlu0 %10244, %v6015_v25   ;;  %v6034_v34 = vcombine.low %v3536_v35, %v3543_v8  ;;  %v3277_v3 = vrot.slane %v15660_v37, %v11106_v27  ;;  %v3284_v53 = vrot.slane %v15660_v37, %v11288_v26  ;;  %v3291_v44 = vrot.slane %v15660_v37, %v11308_v20  ;;  %v15661_v35 = vld [vmem:[#allocation66_spill] sm:$0xff]  ;;  %v14157_v37 = vpop.permute.xlu1 %6687 }
 0x21e   :  { %v5862_v54 = vcombine.low %v5854_v49, %v5861_v31  ;;  %v6041_v38 = vrot.slane %v6033_v57, %v11326_v13  ;;  %v7098_v29 = vsel %vm7004_vm8, %v7097_v61, %v7093_v17  ;;  %9909 = vmatpush1.bf16.msra.mxu0 %v10477_v62  ;;  %v7112_v0 = vrot.slane %v13660_v15, %v15519_v7  ;;  %v10488_v15 = vld [vmem:[%s15051_s1 + $0x314] ss:$24 sps:$4 sm:$0xff]  }
 0x21f   :  { %v6048_v2 = vrot.slane %v6034_v34, %v11326_v13  ;;  %v5880_v25 = vcombine.low %v3270_v46, %v3277_v3  ;;  %v3578_v8 = vrot.slane %v15661_v35, %v11087_v16  ;;  %9910 = vmatprep.subr.bf16.mxu0 %v10485_v21  ;;  %v5881_v17 = vcombine.low %v3284_v53, %v3291_v44 }
 0x220   :  { %6819 = vperm.xlu1 %10245, %v5862_v54   ;;  %v3585_v62 = vrot.slane %v15661_v35, %v11106_v27  ;;  %v3592_v49 = vrot.slane %v15661_v35, %v11288_v26  ;;  %v3599_v31 = vrot.slane %v15661_v35, %v11308_v20  ;;  %v7103_v21 = vsel %vm7011_vm9, %v7102_v14, %v7098_v29  ;;  %v15662_v54 = vld [vmem:[#allocation38_spill] sm:$0xff] }
 0x221   :  { %v6049_v57 = vcombine.low %v6041_v38, %v6048_v2  ;;  %v5888_v61 = vrot.slane %v5880_v25, %v11326_v13  ;;  %v7107_v34 = vrot.slane %v13837_v19, %v15518_v39  ;;  %v5895_v46 = vrot.slane %v5881_v17, %v11326_v13  ;;  %v10486_v29 = vld [vmem:[%s15051_s1 + $0x310] ss:$24 sps:$4 sm:$0xff]   ;;  %v14176_v17 = vpop.permute.xlu0 %6720 }
 0x222   :  { %v6067_v3 = vcombine.low %v3578_v8, %v3585_v62  ;;  %v6068_v53 = vcombine.low %v3592_v49, %v3599_v31  ;;  %v3326_v44 = vrot.slane %v15662_v54, %v11087_v16  ;;  %9911 = vmatpush1.bf16.msra.mxu0 %v10483_v50  ;;  %v3333_v2 = vrot.slane %v15662_v54, %v11106_v27  ;;  %v15663_v31 = vld [vmem:[#allocation69_spill] sm:$0xff] }
 0x223   :  { %6852 = vperm.xlu0 %10244, %v6049_v57   ;;  %v7108_v38 = vsel %vm7018_vm10, %v7107_v34, %v7103_v21  ;;  %v3340_v14 = vrot.slane %v15662_v54, %v11288_v26  ;;  %v3347_v19 = vrot.slane %v15662_v54, %v11308_v20  ;;  %v7122_v25 = vrot.slane %v13689_v23, %v15481_v51 }
 0x224   :  { %v5896_v50 = vcombine.low %v5888_v61, %v5895_v46  ;;  %v6075_v35 = vrot.slane %v6067_v3, %v11326_v13  ;;  %v6082_v8 = vrot.slane %v6068_v53, %v11326_v13  ;;  %9921 = vmatprep.subr.bf16.mxu0 %v10488_v15  ;;  %v5914_v62 = vcombine.low %v3326_v44, %v3333_v2  ;;  %v10491_v46 = vld [vmem:[%s15051_s1 + $0x344] ss:$24 sps:$4 sm:$0xff]   ;;  %v14195_v44 = vpop.permute.xlu1 %6693 }
 0x225   :  { %v5915_v49 = vcombine.low %v3340_v14, %v3347_v19  ;;  %v3634_v57 = vrot.slane %v15663_v31, %v11087_v16  ;;  %v3641_v21 = vrot.slane %v15663_v31, %v11106_v27  ;;  %9913 = vmatmul.mubr.bf16.vlgmr.msra.gmra.mrb[4].mxu0 %v12786_v4  ;;  %v3648_v61 = vrot.slane %v15663_v31, %v11288_v26  ;;  %v15664_v14 = vld [vmem:[#allocation60_spill] sm:$0xff] }
 0x226   :  { %6825 = vperm.xlu1 %10245, %v5896_v50   ;;  %v6083_v23 = vcombine.low %v6075_v35, %v6082_v8  ;;  %v3655_v15 = vrot.slane %v15663_v31, %v11308_v20  ;;  %v7113_v34 = vsel %vm7025_vm11, %v7112_v0, %v7108_v38  ;;  %v5922_v3 = vrot.slane %v5914_v62, %v11326_v13  ;;  %v10489_v50 = vld [vmem:[%s15051_s1 + $0x340] ss:$24 sps:$4 sm:$0xff]   ;;  %v10494_v62 = vld [vmem:[%s15051_s1 + $0x374] ss:$24 sps:$4 sm:$0xff]  }
 0x227   :  { %v5929_v53 = vrot.slane %v5915_v49, %v11326_v13  ;;  %v6101_v54 = vcombine.low %v3634_v57, %v3641_v21  ;;  %v7117_v4 = vrot.slane %v13875_v1, %v15474_v56  ;;  %9922 = vmatpush1.bf16.msra.mxu0 %v10486_v29  ;;  %v3382_v0 = vrot.slane %v15664_v14, %v11087_v16  ;;  %v15665_v21 = vld [vmem:[#allocation31_spill] sm:$0xff] }
 0x228   :  { %6858 = vperm.xlu0 %10244, %v6083_v23   ;;  %v6102_v2 = vcombine.low %v3648_v61, %v3655_v15  ;;  %v3389_v38 = vrot.slane %v15664_v14, %v11106_v27  ;;  %v3396_v19 = vrot.slane %v15664_v14, %v11288_v26  ;;  %v3403_v8 = vrot.slane %v15664_v14, %v11308_v20  ;;  %v14219_v61 = vpop.permute.xlu0 %6726 }
 0x229   :  { %v5930_v35 = vcombine.low %v5922_v3, %v5929_v53  ;;  %v6109_v1 = vrot.slane %v6101_v54, %v11326_v13  ;;  %v7118_v29 = vsel %vm7032_vm12, %v7117_v4, %v7113_v34  ;;  %9953 = vmatprep.mubr.bf16.mxu0 %v13652_v36  ;;  %v7132_v49 = vrot.slane %v13734_v18, %v15490_v32  ;;  %v10492_v4 = vld [vmem:[%s15051_s1 + $0x370] ss:$24 sps:$4 sm:$0xff]  }
 0x22a   :  { %v6116_v31 = vrot.slane %v6102_v2, %v11326_v13  ;;  %v5948_v57 = vcombine.low %v3382_v0, %v3389_v38  ;;  %v3690_v23 = vrot.slane %v15665_v21, %v11087_v16  ;;  %9923 = vmatprep.subr.bf16.mxu0 %v10491_v46  ;;  %v5949_v15 = vcombine.low %v3396_v19, %v3403_v8  ;;  %v15666_v38 = vld [vmem:[#allocation62_spill] sm:$0xff] }
 0x22b   :  { %6831 = vperm.xlu1 %10245, %v5930_v35   ;;  %v3697_v36 = vrot.slane %v15665_v21, %v11106_v27  ;;  %v3704_v34 = vrot.slane %v15665_v21, %v11288_v26  ;;  %v3711_v18 = vrot.slane %v15665_v21, %v11308_v20  ;;  %v7123_v54 = vsel %vm7039_vm13, %v7122_v25, %v7118_v29  ;;  %v14237_v35 = vpop.permute.xlu1 %6699  ;;  %v10497_v29 = vld [vmem:[%s15051_s1 + $0x3a4] ss:$24 sps:$4 sm:$0xff]  }
 0x22c   :  { %v6117_v3 = vcombine.low %v6109_v1, %v6116_v31  ;;  %v5956_v53 = vrot.slane %v5948_v57, %v11326_v13  ;;  %v7127_v46 = vrot.slane %v13911_v60, %v15485_v59  ;;  %9924 = vmatpush1.bf16.msra.mxu0 %v10489_v50  ;;  %v5963_v2 = vrot.slane %v5949_v15, %v11326_v13 }
 0x22d   :  { %v6135_v14 = vcombine.low %v3690_v23, %v3697_v36  ;;  %v6136_v0 = vcombine.low %v3704_v34, %v3711_v18  ;;  %v3438_v19 = vrot.slane %v15666_v38, %v11087_v16  ;;  %9925 = vmatprep.subr.bf16.mxu0 %v10494_v62  ;;  %v3445_v60 = vrot.slane %v15666_v38, %v11106_v27  ;;  %v15668_v36 = vld [vmem:[#allocation33_spill] sm:$0xff]  ;;  %v10495_v18 = vld [vmem:[%s15051_s1 + $0x3a0] ss:$24 sps:$4 sm:$0xff]  }
 0x22e   :  { %6864 = vperm.xlu0 %10244, %v6117_v3   ;;  %v7128_v25 = vsel %vm7046_vm14, %v7127_v46, %v7123_v54  ;;  %v3452_v50 = vrot.slane %v15666_v38, %v11288_v26  ;;  %v3459_v1 = vrot.slane %v15666_v38, %v11308_v20  ;;  %v5964_v8 = vcombine.low %v5956_v53, %v5963_v2  ;;  %v14261_v3 = vpop.permute.xlu0 %6732  ;;  %v10500_v46 = vld [vmem:[%s15051_s1 + $0x3d4] ss:$24 sps:$4 sm:$0xff]  }
 0x22f   :  { %v6143_v62 = vrot.slane %v6135_v14, %v11326_v13  ;;  %v6150_v31 = vrot.slane %v6136_v0, %v11326_v13  ;;  %v14252_v57 = vsel %vm7053_vm15, %v7132_v49, %v7128_v25  ;;  %v7141_v21 = vrot.slane %v13771_v52, %v15642_v40  ;;  %v15669_v0 = vld [vmem:[#allocation61_spill] sm:$0xff] }
 0x230   :  { %15667 = vst [vmem:[#allocation90_spill] sm:$0xff] %v14252_v57  ;;  %v5982_v23 = vcombine.low %v3438_v19, %v3445_v60  ;;  %v5983_v15 = vcombine.low %v3452_v50, %v3459_v1  ;;  %v3746_v34 = vrot.slane %v15668_v36, %v11087_v16  ;;  %9926 = vmatpush1.bf16.msra.mxu0 %v10492_v4  ;;  %v14282_v1 = vpop.permute.xlu1 %6705 }
 0x231   :  { %6837 = vperm.xlu1 %10245, %v5964_v8   ;;  %v6151_v53 = vcombine.low %v6143_v62, %v6150_v31  ;;  %v3753_v49 = vrot.slane %v15668_v36, %v11106_v27  ;;  %v3760_v52 = vrot.slane %v15668_v36, %v11288_v26  ;;  %v3767_v54 = vrot.slane %v15668_v36, %v11308_v20  ;;  %v10498_v31 = vld [vmem:[%s15051_s1 + $0x3d0] ss:$24 sps:$4 sm:$0xff]  }
 0x232   :  { %v5990_v4 = vrot.slane %v5982_v23, %v11326_v13  ;;  %v5997_v2 = vrot.slane %v5983_v15, %v11326_v13  ;;  %v7137_v14 = vrot.slane %v13948_v28, %v15644_v47  ;;  %v3494_v38 = vrot.slane %v15669_v0, %v11087_v16  ;;  %9927 = vmatprep.subr.bf16.mxu0 %v10497_v29 }
 0x233   :  { %6870 = vperm.xlu0 %10244, %v6151_v53   ;;  %v6169_v19 = vcombine.low %v3746_v34, %v3753_v49  ;;  %v6170_v25 = vcombine.low %v3760_v52, %v3767_v54  ;;  %v3501_v60 = vrot.slane %v15669_v0, %v11106_v27  ;;  %v3508_v50 = vrot.slane %v15669_v0, %v11288_v26  ;;  %v15670_v34 = vld [vmem:[#allocation100_spill] sm:$0xff]  ;;  %v14305_v54 = vpop.permute.xlu0 %6738 }
 0x234   :  { %v7151_v8 = vrot.slane %v13817_v11, %v11012_v45  ;;  %v5998_v62 = vcombine.low %v5990_v4, %v5997_v2  ;;  %v7142_v28 = vsel %vm6955_vm1, %v7141_v21, %v7137_v14  ;;  %v3515_v29 = vrot.slane %v15669_v0, %v11308_v20  ;;  %9928 = vmatpush1.bf16.msra.mxu0 %v10495_v18  ;;  %v10503_v52 = vld [vmem:[%s15051_s1 + $0x404] ss:$24 sps:$4 sm:$0xff]   ;;  %v15671_v14 = vld [vmem:[#allocation65_spill] sm:$0xff] }
 0x235   :  { %v6177_v23 = vrot.slane %v6169_v19, %v11326_v13  ;;  %v6184_v15 = vrot.slane %v6170_v25, %v11326_v13  ;;  %v6016_v36 = vcombine.low %v3494_v38, %v3501_v60  ;;  %v3970_v53 = vrot.slane %v15670_v34, %v11087_v16  ;;  %9929 = vmatprep.subr.bf16.mxu0 %v10500_v46 }
 0x236   :  { %6843 = vperm.xlu1 %10245, %v5998_v62   ;;  %v6017_v11 = vcombine.low %v3508_v50, %v3515_v29  ;;  %v3977_v21 = vrot.slane %v15670_v34, %v11106_v27  ;;  %v3984_v18 = vrot.slane %v15670_v34, %v11288_v26  ;;  %v3991_v49 = vrot.slane %v15670_v34, %v11308_v20 }
 0x237   :  { %v6185_v4 = vcombine.low %v6177_v23, %v6184_v15  ;;  %v6024_v46 = vrot.slane %v6016_v36, %v11326_v13  ;;  %v7146_v2 = vrot.slane %v13989_v58, %v15648_v55  ;;  %v3550_v0 = vrot.slane %v15671_v14, %v11087_v16  ;;  %v10501_v23 = vld [vmem:[%s15051_s1 + $0x400] ss:$24 sps:$4 sm:$0xff]   ;;  %v14325_v15 = vpop.permute.xlu1 %6711 }
 0x238   :  { %v6031_v38 = vrot.slane %v6017_v11, %v11326_v13  ;;  %v6305_v19 = vcombine.low %v3970_v53, %v3977_v21  ;;  %v6306_v25 = vcombine.low %v3984_v18, %v3991_v49  ;;  %v3557_v60 = vrot.slane %v15671_v14, %v11106_v27  ;;  %9930 = vmatpush1.bf16.msra.mxu0 %v10498_v31  ;;  %v15672_v53 = vld [vmem:[#allocation68_spill] sm:$0xff]  ;;  %v10506_v49 = vld [vmem:[%s15051_s1 + $0x434] ss:$24 sps:$4 sm:$0xff]  }
 0x239   :  { %v7161_v50 = vrot.slane %v13857_v42, %v15651_v43  ;;  %6876 = vperm.xlu0 %10244, %v6185_v4   ;;  %v7147_v62 = vsel %vm6962_vm2, %v7146_v2, %v7142_v28  ;;  %v3564_v58 = vrot.slane %v15671_v14, %v11288_v26  ;;  %v3571_v29 = vrot.slane %v15671_v14, %v11308_v20  ;;  %v14342_v14 = vpop.permute.xlu0 %6744 }
 0x23a   :  { %v6032_v36 = vcombine.low %v6024_v46, %v6031_v38  ;;  %v6313_v31 = vrot.slane %v6305_v19, %v11326_v13  ;;  %v6320_v42 = vrot.slane %v6306_v25, %v11326_v13  ;;  %v6050_v34 = vcombine.low %v3550_v0, %v3557_v60  ;;  %9931 = vmatprep.subr.bf16.mxu0 %v10503_v52  ;;  %v15673_v25 = vld [vmem:[#allocation70_spill] sm:$0xff] }
 0x23b   :  { %v6051_v28 = vcombine.low %v3564_v58, %v3571_v29  ;;  %v4026_v11 = vrot.slane %v15672_v53, %v11087_v16  ;;  %v4033_v21 = vrot.slane %v15672_v53, %v11106_v27  ;;  %v4040_v18 = vrot.slane %v15672_v53, %v11288_v26 }
 0x23c   :  { %6849 = vperm.xlu1 %10245, %v6032_v36   ;;  %v6321_v4 = vcombine.low %v6313_v31, %v6320_v42  ;;  %v6058_v46 = vrot.slane %v6050_v34, %v11326_v13  ;;  %v4047_v52 = vrot.slane %v15672_v53, %v11308_v20  ;;  %v7152_v2 = vsel %vm6969_vm3, %v7151_v8, %v7147_v62  ;;  %v10504_v36 = vld [vmem:[%s15051_s1 + $0x430] ss:$24 sps:$4 sm:$0xff]   ;;  %v10509_v34 = vld [vmem:[%s15051_s1 + $0x464] ss:$24 sps:$4 sm:$0xff]  }
 0x23d   :  { %v6065_v0 = vrot.slane %v6051_v28, %v11326_v13  ;;  %v6339_v38 = vcombine.low %v4026_v11, %v4033_v21  ;;  %v7156_v19 = vrot.slane %v14034_v22, %v15653_v48  ;;  %v3606_v60 = vrot.slane %v15673_v25, %v11087_v16  ;;  %9932 = vmatpush1.bf16.msra.mxu0 %v10501_v23  ;;  %v14365_v28 = vpop.permute.xlu1 %6717 }
 0x23e   :  { %6900 = vperm.xlu0 %10244, %v6321_v4   ;;  %v6340_v58 = vcombine.low %v4040_v18, %v4047_v52  ;;  %v3613_v29 = vrot.slane %v15673_v25, %v11106_v27  ;;  %v3620_v8 = vrot.slane %v15673_v25, %v11288_v26  ;;  %v3627_v62 = vrot.slane %v15673_v25, %v11308_v20  ;;  %v15674_v18 = vld [vmem:[#allocation27_spill] sm:$0xff]  ;;  %v14381_v25 = vpop.permute.xlu0 %6750 }
 0x23f   :  { %v7171_v22 = vrot.slane %v13893_v9, %v11054_v63  ;;  %v6066_v31 = vcombine.low %v6058_v46, %v6065_v0  ;;  %v6347_v23 = vrot.slane %v6339_v38, %v11326_v13  ;;  %v7157_v42 = vsel %vm6976_vm4, %v7156_v19, %v7152_v2  ;;  %9933 = vmatprep.subr.bf16.mxu0 %v10506_v49 }
 0x240   :  { %v6354_v53 = vrot.slane %v6340_v58, %v11326_v13  ;;  %v6084_v11 = vcombine.low %v3606_v60, %v3613_v29  ;;  %v6085_v21 = vcombine.low %v3620_v8, %v3627_v62  ;;  %v4082_v4 = vrot.slane %v15674_v18, %v11087_v16  ;;  %v15675_v29 = vld [vmem:[#allocation41_spill] sm:$0xff] }
 0x241   :  { %6855 = vperm.xlu1 %10245, %v6066_v31   ;;  %v4089_v9 = vrot.slane %v15674_v18, %v11106_v27  ;;  %v4096_v49 = vrot.slane %v15674_v18, %v11288_v26  ;;  %v4103_v46 = vrot.slane %v15674_v18, %v11308_v20  ;;  %v7162_v52 = vsel %vm6983_vm5, %v7161_v50, %v7157_v42  ;;  %v10507_v50 = vld [vmem:[%s15051_s1 + $0x460] ss:$24 sps:$4 sm:$0xff]   ;;  %v10512_v42 = vld [vmem:[%s15051_s1 + $0x494] ss:$24 sps:$4 sm:$0xff]  }
 0x242   :  { %v6355_v2 = vcombine.low %v6347_v23, %v6354_v53  ;;  %v6092_v0 = vrot.slane %v6084_v11, %v11326_v13  ;;  %v6099_v38 = vrot.slane %v6085_v21, %v11326_v13  ;;  %v7166_v19 = vrot.slane %v14077_v12, %v15657_v41  ;;  %9934 = vmatpush1.bf16.msra.mxu0 %v10504_v36  ;;  %v15676_v53 = vld [vmem:[#allocation87_spill] sm:$0xff] }
 0x243   :  { %v6373_v60 = vcombine.low %v4082_v4, %v4089_v9  ;;  %v6374_v58 = vcombine.low %v4096_v49, %v4103_v46  ;;  %v3662_v8 = vrot.slane %v15675_v29, %v11087_v16  ;;  %v3669_v62 = vrot.slane %v15675_v29, %v11106_v27  ;;  %9935 = vmatprep.subr.bf16.mxu0 %v10509_v34  ;;  %v14402_v4 = vpop.permute.xlu1 %6723  ;;  %v15677_v49 = vld [vmem:[#allocation103_spill] sm:$0xff] }
 0x244   :  { %6906 = vperm.xlu0 %10244, %v6355_v2   ;;  %v6100_v31 = vcombine.low %v6092_v0, %v6099_v38  ;;  %v7167_v12 = vsel %vm6990_vm6, %v7166_v19, %v7162_v52  ;;  %v3676_v36 = vrot.slane %v15675_v29, %v11288_v26  ;;  %v3683_v23 = vrot.slane %v15675_v29, %v11308_v20 }
 0x245   :  { %v7181_v11 = vrot.slane %v15676_v53, %v15514_v10  ;;  %v6381_v21 = vrot.slane %v6373_v60, %v11326_v13  ;;  %v6388_v34 = vrot.slane %v6374_v58, %v11326_v13  ;;  %v6118_v18 = vcombine.low %v3662_v8, %v3669_v62  ;;  %v10510_v58 = vld [vmem:[%s15051_s1 + $0x490] ss:$24 sps:$4 sm:$0xff]  }
 0x246   :  { %6861 = vperm.xlu1 %10245, %v6100_v31   ;;  %v6119_v9 = vcombine.low %v3676_v36, %v3683_v23  ;;  %v4138_v46 = vrot.slane %v15677_v49, %v11087_v16  ;;  %v4145_v52 = vrot.slane %v15677_v49, %v11106_v27  ;;  %v4152_v2 = vrot.slane %v15677_v49, %v11288_v26  ;;  %v15678_v31 = vld [vmem:[#allocation92_spill] sm:$0xff]  ;;  %v14422_v23 = vpop.permute.xlu0 %6756 }
 0x247   :  { %v6389_v0 = vcombine.low %v6381_v21, %v6388_v34  ;;  %v6126_v38 = vrot.slane %v6118_v18, %v11326_v13  ;;  %v4159_v19 = vrot.slane %v15677_v49, %v11308_v20  ;;  %v7172_v60 = vsel %vm6997_vm7, %v7171_v22, %v7167_v12  ;;  %9936 = vmatpush1.bf16.msra.mxu0 %v10507_v50  ;;  %v15679_v21 = vld [vmem:[#allocation71_spill] sm:$0xff] }
 0x248   :  { %v6133_v29 = vrot.slane %v6119_v9, %v11326_v13  ;;  %v6407_v8 = vcombine.low %v4138_v46, %v4145_v52  ;;  %v7176_v62 = vrot.slane %v14118_v24, %v11071_v6  ;;  %v3718_v36 = vrot.slane %v15678_v31, %v11087_v16  ;;  %9937 = vmatprep.subr.bf16.mxu0 %v10512_v42  ;;  %v10515_v24 = vld [vmem:[%s15051_s1 + $0x4c4] ss:$24 sps:$4 sm:$0xff]   ;;  %v14437_v49 = vpop.f32.mrb[0].mxu1 }
 0x249   :  { %6912 = vperm.xlu0 %10244, %v6389_v0   ;;  %v6408_v53 = vcombine.low %v4152_v2, %v4159_v19  ;;  %v3725_v22 = vrot.slane %v15678_v31, %v11106_v27  ;;  %v3732_v50 = vrot.slane %v15678_v31, %v11288_v26  ;;  %v3739_v12 = vrot.slane %v15678_v31, %v11308_v20  ;;  %v15681_v0 = vld [vmem:[#allocation89_spill] sm:$0xff]  ;;  %v14442_v31 = vpop.permute.xlu1 %6729  ;;  %v14444_v57 = vpop.f32.mrb[1].mxu1 }
 0x24a   :  { %v7191_v42 = vrot.slane %v15679_v21, %v15519_v7  ;;  %v6134_v34 = vcombine.low %v6126_v38, %v6133_v29  ;;  %v6415_v18 = vrot.slane %v6407_v8, %v11326_v13  ;;  %v7177_v9 = vsel %vm7004_vm8, %v7176_v62, %v7172_v60  ;;  %15680 = vst [vmem:[#allocation91_spill] sm:$0xff] %v14437_v49  ;;  %v9754_v62 = vpop.f32.mrb[2].mxu1 }
 0x24b   :  { %v6422_v46 = vrot.slane %v6408_v53, %v11326_v13  ;;  %v6152_v52 = vcombine.low %v3718_v36, %v3725_v22  ;;  %v6153_v2 = vcombine.low %v3732_v50, %v3739_v12  ;;  %v4194_v19 = vrot.slane %v15681_v0, %v11087_v16  ;;  %9938 = vmatpush1.bf16.msra.mxu0 %v10510_v58  ;;  %v10513_v58 = vld [vmem:[%s15051_s1 + $0x4c0] ss:$24 sps:$4 sm:$0xff]   ;;  %v9755_v12 = vpop.f32.mrb[3].mxu1 }
 0x24c   :  { %15682 = vst [vmem:[#allocation94_spill] sm:$0xff] %v14444_v57  ;;  %6867 = vperm.xlu1 %10245, %v6134_v34   ;;  %v4201_v38 = vrot.slane %v15681_v0, %v11106_v27  ;;  %v4208_v60 = vrot.slane %v15681_v0, %v11288_v26  ;;  %v4215_v29 = vrot.slane %v15681_v0, %v11308_v20  ;;  %v15683_v0 = vld [vmem:[#allocation44_spill] sm:$0xff] }
 0x24d   :  { %v7182_v8 = vsel %vm7011_vm9, %v7181_v11, %v7177_v9  ;;  %v6423_v36 = vcombine.low %v6415_v18, %v6422_v46  ;;  %v6160_v53 = vrot.slane %v6152_v52, %v11326_v13  ;;  %v6167_v22 = vrot.slane %v6153_v2, %v11326_v13  ;;  %9939 = vmatprep.subr.bf16.mxu0 %v10515_v24  ;;  %v10518_v18 = vld [vmem:[%s15051_s1 + $0x4f4] ss:$24 sps:$4 sm:$0xff]   ;;  %v14467_v46 = vpop.permute.xlu0 %6762  ;;  %v10516_v12 = vld [vmem:[%s15051_s1 + $0x4f0] ss:$24 sps:$4 sm:$0xff]  }
 0x24e   :  { %v7186_v50 = vrot.slane %v14157_v37, %v15518_v39  ;;  %v6441_v21 = vcombine.low %v4194_v19, %v4201_v38  ;;  %v6442_v34 = vcombine.low %v4208_v60, %v4215_v29  ;;  %v3942_v11 = vrot.slane %v15683_v0, %v11087_v16  ;;  %v15684_v19 = vld [vmem:[#allocation19_spill] sm:$0xff] }
 0x24f   :  { %v3949_v9 = vrot.slane %v15683_v0, %v11106_v27  ;;  %6918 = vperm.xlu0 %10244, %v6423_v36   ;;  %v6168_v52 = vcombine.low %v6160_v53, %v6167_v22  ;;  %v3956_v24 = vrot.slane %v15683_v0, %v11288_v26  ;;  %v3963_v2 = vrot.slane %v15683_v0, %v11308_v20  ;;  %v15685_v53 = vld [vmem:[#allocation93_spill] sm:$0xff] }
 0x250   :  { %v7187_v37 = vsel %vm7018_vm10, %v7186_v50, %v7182_v8  ;;  %v7201_v38 = vrot.slane %v15684_v19, %v15481_v51  ;;  %v6449_v60 = vrot.slane %v6441_v21, %v11326_v13  ;;  %v6456_v29 = vrot.slane %v6442_v34, %v11326_v13  ;;  %9940 = vmatpush1.bf16.msra.mxu0 %v10513_v58  ;;  %v14487_v21 = vpop.permute.xlu1 %6735  ;;  %v15686_v19 = vld [vmem:[#allocation26_spill] sm:$0xff] }
 0x251   :  { %v6288_v62 = vcombine.low %v3942_v11, %v3949_v9  ;;  %6873 = vperm.xlu1 %10245, %v6168_v52   ;;  %v6289_v36 = vcombine.low %v3956_v24, %v3963_v2  ;;  %v4222_v8 = vrot.slane %v15685_v53, %v11087_v16  ;;  %v4229_v22 = vrot.slane %v15685_v53, %v11106_v27  ;;  %v10521_v9 = vld [vmem:[%s15051_s1 + $0x524] ss:$24 sps:$4 sm:$0xff]  }
 0x252   :  { %v4236_v50 = vrot.slane %v15685_v53, %v11288_v26  ;;  %v6457_v34 = vcombine.low %v6449_v60, %v6456_v29  ;;  %v4243_v0 = vrot.slane %v15685_v53, %v11308_v20  ;;  %v7192_v11 = vsel %vm7025_vm11, %v7191_v42, %v7187_v37  ;;  %9941 = vmatprep.subr.bf16.mxu0 %v10518_v18  ;;  %v14507_v37 = vpop.permute.xlu0 %6768 }
 0x253   :  { %v6296_v58 = vrot.slane %v6288_v62, %v11326_v13  ;;  %v6303_v52 = vrot.slane %v6289_v36, %v11326_v13  ;;  %v6458_v24 = vcombine.low %v4222_v8, %v4229_v22  ;;  %v7196_v2 = vrot.slane %v14195_v44, %v15474_v56  ;;  %v15687_v36 = vld [vmem:[#allocation88_spill] sm:$0xff] }
 0x254   :  { %v3998_v60 = vrot.slane %v15686_v19, %v11087_v16  ;;  %6924 = vperm.xlu0 %10244, %v6457_v34   ;;  %v6459_v29 = vcombine.low %v4236_v50, %v4243_v0  ;;  %v4005_v62 = vrot.slane %v15686_v19, %v11106_v27  ;;  %v4012_v42 = vrot.slane %v15686_v19, %v11288_v26  ;;  %v10519_v50 = vld [vmem:[%s15051_s1 + $0x520] ss:$24 sps:$4 sm:$0xff]  }
 0x255   :  { %v4019_v18 = vrot.slane %v15686_v19, %v11308_v20  ;;  %v7211_v53 = vrot.slane %v15687_v36, %v15490_v32  ;;  %v6304_v44 = vcombine.low %v6296_v58, %v6303_v52  ;;  %v6466_v8 = vrot.slane %v6458_v24, %v11326_v13  ;;  %9942 = vmatpush1.bf16.msra.mxu0 %v10516_v12  ;;  %v15688_v19 = vld [vmem:[#allocation95_spill] sm:$0xff]  ;;  %v10524_v24 = vld [vmem:[%s15051_s1 + $0x554] ss:$24 sps:$4 sm:$0xff]  }
 0x256   :  { %v7197_v22 = vsel %vm7032_vm12, %v7196_v2, %v7192_v11  ;;  %v6473_v34 = vrot.slane %v6459_v29, %v11326_v13  ;;  %v6322_v0 = vcombine.low %v3998_v60, %v4005_v62  ;;  %v4250_v49 = vrot.slane %v15688_v19, %v11087_v16  ;;  %9943 = vmatprep.subr.bf16.mxu0 %v10521_v9  ;;  %v14529_v2 = vpop.permute.xlu1 %6741  ;;  %v15689_v36 = vld [vmem:[#allocation102_spill] sm:$0xff] }
 0x257   :  { %v6323_v57 = vcombine.low %v4012_v42, %v4019_v18  ;;  %6897 = vperm.xlu1 %10245, %v6304_v44   ;;  %v4257_v58 = vrot.slane %v15688_v19, %v11106_v27  ;;  %v4264_v11 = vrot.slane %v15688_v19, %v11288_v26  ;;  %v4271_v12 = vrot.slane %v15688_v19, %v11308_v20 }
 0x258   :  { %v7202_v52 = vsel %vm7039_vm13, %v7201_v38, %v7197_v22  ;;  %v6474_v60 = vcombine.low %v6466_v8, %v6473_v34  ;;  %v6330_v9 = vrot.slane %v6322_v0, %v11326_v13  ;;  %v7206_v62 = vrot.slane %v14237_v35, %v15485_v59  ;;  %v10522_v8 = vld [vmem:[%s15051_s1 + $0x550] ss:$24 sps:$4 sm:$0xff]   ;;  %v10527_v34 = vld [vmem:[%s15051_s1 + $0x584] ss:$24 sps:$4 sm:$0xff]   ;;  %v14550_v0 = vpop.permute.xlu0 %6774 }
 0x259   :  { %v6337_v29 = vrot.slane %v6323_v57, %v11326_v13  ;;  %v6475_v42 = vcombine.low %v4250_v49, %v4257_v58  ;;  %v6476_v18 = vcombine.low %v4264_v11, %v4271_v12  ;;  %v4054_v44 = vrot.slane %v15689_v36, %v11087_v16  ;;  %9944 = vmatpush1.bf16.msra.mxu0 %v10519_v50 }
 0x25a   :  { %v4061_v38 = vrot.slane %v15689_v36, %v11106_v27  ;;  %6927 = vperm.xlu0 %10244, %v6474_v60   ;;  %v7207_v57 = vsel %vm7046_vm14, %v7206_v62, %v7202_v52  ;;  %v4068_v35 = vrot.slane %v15689_v36, %v11288_v26  ;;  %v4075_v49 = vrot.slane %v15689_v36, %v11308_v20  ;;  %v15690_v60 = vld [vmem:[#allocation50_spill] sm:$0xff] }
 0x25b   :  { %v6338_v22 = vcombine.low %v6330_v9, %v6337_v29  ;;  %v6483_v50 = vrot.slane %v6475_v42, %v11326_v13  ;;  %v6490_v19 = vrot.slane %v6476_v18, %v11326_v13  ;;  %v14555_v58 = vsel %vm7053_vm15, %v7211_v53, %v7207_v57  ;;  %9945 = vmatprep.subr.bf16.mxu0 %v10524_v24  ;;  %v14571_v18 = vpop.permute.xlu1 %6747 }
 0x25c   :  { %v6356_v11 = vcombine.low %v4054_v44, %v4061_v38  ;;  %v7220_v12 = vrot.slane %v14097_v30, %v15642_v40  ;;  %v6357_v52 = vcombine.low %v4068_v35, %v4075_v49  ;;  %v4278_v9 = vrot.slane %v15690_v60, %v11087_v16  ;;  %v10525_v30 = vld [vmem:[%s15051_s1 + $0x580] ss:$24 sps:$4 sm:$0xff]  }
 0x25d   :  { %6903 = vperm.xlu1 %10245, %v6338_v22   ;;  %v4285_v29 = vrot.slane %v15690_v60, %v11106_v27  ;;  %v6491_v62 = vcombine.low %v6483_v50, %v6490_v19  ;;  %v4292_v53 = vrot.slane %v15690_v60, %v11288_v26  ;;  %v4299_v24 = vrot.slane %v15690_v60, %v11308_v20  ;;  %v15691_v22 = vld [vmem:[#allocation80_spill] sm:$0xff]  ;;  %v10530_v19 = vld [vmem:[%s15051_s1 + $0x5b4] ss:$24 sps:$4 sm:$0xff]   ;;  %v14591_v60 = vpop.permute.xlu0 %6780 }
 0x25e   :  { %v6364_v42 = vrot.slane %v6356_v11, %v11326_v13  ;;  %9946 = vmatpush1.bf16.msra.mxu0 %v10522_v8  ;;  %v6371_v36 = vrot.slane %v6357_v52, %v11326_v13  ;;  %v7216_v38 = vrot.slane %v14282_v1, %v15644_v47  ;;  %v4110_v57 = vrot.slane %v15691_v22, %v11087_v16 }
 0x25f   :  { %v6492_v44 = vcombine.low %v4278_v9, %v4285_v29  ;;  %9947 = vmatprep.subr.bf16.mxu0 %v10527_v34  ;;  %6930 = vperm.xlu0 %10244, %v6491_v62   ;;  %v6493_v35 = vcombine.low %v4292_v53, %v4299_v24  ;;  %v4117_v8 = vrot.slane %v15691_v22, %v11106_v27  ;;  %v15692_v53 = vld [vmem:[#allocation54_spill] sm:$0xff] }
 0x260   :  { %v4124_v49 = vrot.slane %v15691_v22, %v11288_v26  ;;  %v4131_v50 = vrot.slane %v15691_v22, %v11308_v20  ;;  %v7230_v1 = vrot.slane %v14137_v5, %v11012_v45  ;;  %v6372_v11 = vcombine.low %v6364_v42, %v6371_v36  ;;  %v10528_v36 = vld [vmem:[%s15051_s1 + $0x5b0] ss:$24 sps:$4 sm:$0xff]  }
 0x261   :  { %v6500_v34 = vrot.slane %v6492_v44, %v11326_v13  ;;  %v7221_v52 = vsel %vm6955_vm1, %v7220_v12, %v7216_v38  ;;  %v6507_v9 = vrot.slane %v6493_v35, %v11326_v13  ;;  %v6390_v29 = vcombine.low %v4110_v57, %v4117_v8  ;;  %v15693_v57 = vld [vmem:[#allocation39_spill] sm:$0xff] }
 0x262   :  { %v6391_v62 = vcombine.low %v4124_v49, %v4131_v50  ;;  %v4306_v24 = vrot.slane %v15692_v53, %v11087_v16  ;;  %9948 = vmatpush1.bf16.msra.mxu0 %v10525_v30  ;;  %6909 = vperm.xlu1 %10245, %v6372_v11   ;;  %v4313_v22 = vrot.slane %v15692_v53, %v11106_v27 }
 0x263   :  { %v4320_v5 = vrot.slane %v15692_v53, %v11288_v26  ;;  %v4327_v12 = vrot.slane %v15692_v53, %v11308_v20  ;;  %v7225_v42 = vrot.slane %v14325_v15, %v15648_v55  ;;  %v6508_v44 = vcombine.low %v6500_v34, %v6507_v9  ;;  %9949 = vmatprep.subr.bf16.mxu0 %v10530_v19  ;;  %v10533_v34 = vld [vmem:[%s15051_s1 + $0x5e4] ss:$24 sps:$4 sm:$0xff]  }
 0x264   :  { %v6398_v30 = vrot.slane %v6390_v29, %v11326_v13  ;;  %v6405_v38 = vrot.slane %v6391_v62, %v11326_v13  ;;  %v4166_v35 = vrot.slane %v15693_v57, %v11087_v16  ;;  %v14611_v8 = vpop.permute.xlu1 %6753  ;;  %v6509_v49 = vcombine.low %v4306_v24, %v4313_v22  ;;  %v15694_v22 = vld [vmem:[#allocation55_spill] sm:$0xff] }
 0x265   :  { %v6510_v50 = vcombine.low %v4320_v5, %v4327_v12  ;;  %v7226_v11 = vsel %vm6962_vm2, %v7225_v42, %v7221_v52  ;;  %v4173_v15 = vrot.slane %v15693_v57, %v11106_v27  ;;  %v7240_v9 = vrot.slane %v14176_v17, %v15651_v43  ;;  %6933 = vperm.xlu0 %10244, %v6508_v44   ;;  %v14629_v12 = vpop.permute.xlu0 %6786 }
 0x266   :  { %v6406_v29 = vcombine.low %v6398_v30, %v6405_v38  ;;  %v4180_v19 = vrot.slane %v15693_v57, %v11288_v26  ;;  %v4187_v62 = vrot.slane %v15693_v57, %v11308_v20  ;;  %v6517_v52 = vrot.slane %v6509_v49, %v11326_v13  ;;  %9950 = vmatpush1.bf16.msra.mxu0 %v10528_v36  ;;  %v10531_v38 = vld [vmem:[%s15051_s1 + $0x5e0] ss:$24 sps:$4 sm:$0xff]   ;;  %s10613_s1 = smov [#allocation6]  }
 0x267   :  { %v6524_v53 = vrot.slane %v6510_v50, %v11326_v13  ;;  %v6424_v24 = vcombine.low %v4166_v35, %v4173_v15  ;;  %v4334_v5 = vrot.slane %v15694_v22, %v11087_v16  ;;  %v4341_v42 = vrot.slane %v15694_v22, %v11106_v27  ;;  %9951 = vmatprep.subr.bf16.mxu0 %v10533_v34  ;;  %s10013_s6 = sshll.u32 %s10613_s1, 4  ;;  %s10014_s6 = int_to_ptr.vmem [resolvable:$true] %s10013_s6 }
 0x268   :  { %6915 = vperm.xlu1 %10245, %v6406_v29   ;;  %v6425_v17 = vcombine.low %v4180_v19, %v4187_v62  ;;  %v4348_v44 = vrot.slane %v15694_v22, %v11288_v26  ;;  %v4355_v30 = vrot.slane %v15694_v22, %v11308_v20  ;;  %v7231_v35 = vsel %vm6969_vm3, %v7230_v1, %v7226_v11  ;;  %v14644_v50 = vpop.permute.xlu1 %6759  ;;  %v15695_v62 = vld [vmem:[#allocation63_spill] sm:$0xff]  ;;  %s10556_s2 = scalar_lea.vmem %s10014_s6, 128  ;;  %p10561_p9 = scmp.lt.s32.totalorder %s10014_s6, %s10014_s6 }
 0x269   :  { %v6525_v57 = vcombine.low %v6517_v52, %v6524_v53  ;;  %v6432_v36 = vrot.slane %v6424_v24, %v11326_v13  ;;  %v7235_v49 = vrot.slane %v14365_v28, %v15653_v48  ;;  %v6526_v29 = vcombine.low %v4334_v5, %v4341_v42  ;;  %p10557_p8 = scmp.ne.s32.totalorder %s10014_s6, %s10556_s2  ;;  %p10562_p10 = scmp.lt.s32.totalorder %s10556_s2, %s10556_s2 }
 0x26a   :  { %v6439_v15 = vrot.slane %v6425_v17, %v11326_v13  ;;  %v6527_v19 = vcombine.low %v4348_v44, %v4355_v30  ;;  %v3774_v22 = vrot.slane %v15695_v62, %v11087_v16  ;;  %v3781_v53 = vrot.slane %v15695_v62, %v11106_v27  ;;  %9952 = vmatpush1.bf16.msra.mxu0 %v10531_v38  ;;  %v15696_v44 = vld [vmem:[#allocation86_spill] sm:$0xff] }
 0x26b   :  { %6936 = vperm.xlu0 %10244, %v6525_v57   ;;  %v7236_v52 = vsel %vm6976_vm4, %v7235_v49, %v7231_v35  ;;  %v3788_v1 = vrot.slane %v15695_v62, %v11288_v26  ;;  %v3795_v28 = vrot.slane %v15695_v62, %v11308_v20  ;;  %v7250_v11 = vrot.slane %v14219_v61, %v11054_v63  ;;  %v14664_v35 = vpop.permute.xlu0 %6792  ;;  %p10563_p11 = por %p10562_p10, %p10561_p9 }
 0x26c   :  { %v6440_v34 = vcombine.low %v6432_v36, %v6439_v15  ;;  %v6534_v24 = vrot.slane %v6526_v29, %v11326_v13  ;;  %v6541_v5 = vrot.slane %v6527_v19, %v11326_v13  ;;  %v6186_v17 = vcombine.low %v3774_v22, %v3781_v53 }
 0x26d   :  { %v6187_v42 = vcombine.low %v3788_v1, %v3795_v28  ;;  %v4362_v30 = vrot.slane %v15696_v44, %v11087_v16  ;;  %v4369_v57 = vrot.slane %v15696_v44, %v11106_v27  ;;  %v4376_v61 = vrot.slane %v15696_v44, %v11288_v26  ;;  %9954 = vmatmul.mubr.bf16.vlgmr.msra.gmra.mrb[4].mxu0 %v13706_v33  ;;  %v14676_v22 = vpop.permute.xlu1 %6765  ;;  %v15697_v1 = vld [vmem:[#allocation18_spill] sm:$0xff]  ;;  %p10564_p12 = pnand %p10563_p11, %p10557_p8 }
 0x26e   :  { %6921 = vperm.xlu1 %10245, %v6440_v34   ;;  %v6542_v49 = vcombine.low %v6534_v24, %v6541_v5  ;;  %v4383_v36 = vrot.slane %v15696_v44, %v11308_v20  ;;  %v7241_v38 = vsel %vm6983_vm5, %v7240_v9, %v7236_v52  ;;  %v6194_v15 = vrot.slane %v6186_v17, %v11326_v13 }
 0x26f   :  { %v6201_v29 = vrot.slane %v6187_v42, %v11326_v13  ;;  %v6543_v19 = vcombine.low %v4362_v30, %v4369_v57  ;;  %v7245_v62 = vrot.slane %v14402_v4, %v15657_v41  ;;  %v3802_v28 = vrot.slane %v15697_v1, %v11087_v16 }
 0x270   :  { %6939 = vperm.xlu0 %10244, %v6542_v49   ;;  %v6544_v53 = vcombine.low %v4376_v61, %v4383_v36  ;;  %v3809_v9 = vrot.slane %v15697_v1, %v11106_v27  ;;  %v3816_v52 = vrot.slane %v15697_v1, %v11288_v26  ;;  %v3823_v33 = vrot.slane %v15697_v1, %v11308_v20  ;;  %v15698_v49 = vld [vmem:[#allocation35_spill] sm:$0xff] }
 0x271   :  { %v6202_v34 = vcombine.low %v6194_v15, %v6201_v29  ;;  %v6551_v24 = vrot.slane %v6543_v19, %v11326_v13  ;;  %v7246_v4 = vsel %vm6990_vm6, %v7245_v62, %v7241_v38  ;;  %v7260_v5 = vrot.slane %v14261_v3, %v15514_v10  ;;  %v14698_v38 = vpop.permute.xlu0 %6798 }
 0x272   :  { %v6558_v17 = vrot.slane %v6544_v53, %v11326_v13  ;;  %v6203_v42 = vcombine.low %v3802_v28, %v3809_v9  ;;  %v7251_v44 = vsel %vm6997_vm7, %v7250_v11, %v7246_v4  ;;  %v6204_v30 = vcombine.low %v3816_v52, %v3823_v33  ;;  %v14709_v1 = vpop.permute.xlu1 %6771 }
 0x273   :  { %6879 = vperm.xlu1 %10245, %v6202_v34   ;;  %v7255_v57 = vrot.slane %v14442_v31, %v11071_v6  ;;  %v3830_v61 = vrot.slane %v15698_v49, %v11087_v16  ;;  %v3837_v36 = vrot.slane %v15698_v49, %v11106_v27  ;;  %v3844_v29 = vrot.slane %v15698_v49, %v11288_v26  ;;  %v15699_v34 = vld [vmem:[#allocation21_spill] sm:$0xff] }
 0x274   :  { %v6559_v15 = vcombine.low %v6551_v24, %v6558_v17  ;;  %v6211_v3 = vrot.slane %v6203_v42, %v11326_v13  ;;  %v3851_v11 = vrot.slane %v15698_v49, %v11308_v20  ;;  %v7270_v31 = vrot.slane %v14305_v54, %v15519_v7 }
 0x275   :  { %v6218_v19 = vrot.slane %v6204_v30, %v11326_v13  ;;  %v7256_v62 = vsel %vm7004_vm8, %v7255_v57, %v7251_v44  ;;  %v6220_v53 = vcombine.low %v3830_v61, %v3837_v36  ;;  %v7265_v52 = vrot.slane %v14487_v21, %v15518_v39  ;;  %v15700_v61 = vld [vmem:[#allocation85_spill] sm:$0xff] }
 0x276   :  { %6942 = vperm.xlu0 %10244, %v6559_v15   ;;  %v6221_v28 = vcombine.low %v3844_v29, %v3851_v11  ;;  %v7261_v9 = vsel %vm7011_vm9, %v7260_v5, %v7256_v62  ;;  %v3858_v24 = vrot.slane %v15699_v34, %v11087_v16  ;;  %v3865_v33 = vrot.slane %v15699_v34, %v11106_v27  ;;  %v14732_v15 = vpop.permute.xlu0 %6804 }
 0x277   :  { %v6219_v4 = vcombine.low %v6211_v3, %v6218_v19  ;;  %v6228_v54 = vrot.slane %v6220_v53, %v11326_v13  ;;  %v3872_v17 = vrot.slane %v15699_v34, %v11288_v26  ;;  %v7280_v42 = vrot.slane %v14342_v14, %v15481_v51 }
 0x278   :  { %v6235_v5 = vrot.slane %v6221_v28, %v11326_v13  ;;  %v7266_v44 = vsel %vm7018_vm10, %v7265_v52, %v7261_v9  ;;  %v3879_v21 = vrot.slane %v15699_v34, %v11308_v20  ;;  %v6237_v30 = vcombine.low %v3858_v24, %v3865_v33  ;;  %v6778_v53 = vpop.permute.xlu1 %6777  ;;  %v15701_v24 = vld [vmem:[#allocation75_spill] sm:$0xff] }
 0x279   :  { %6882 = vperm.xlu1 %10245, %v6219_v4   ;;  %v7271_v57 = vsel %vm7025_vm11, %v7270_v31, %v7266_v44  ;;  %v7275_v49 = vrot.slane %v14529_v2, %v15474_v56  ;;  %v3886_v36 = vrot.slane %v15700_v61, %v11087_v16  ;;  %v7290_v14 = vrot.slane %v14381_v25, %v15490_v32 }
 0x27a   :  { %v6238_v3 = vcombine.low %v3872_v17, %v3879_v21  ;;  %v3893_v29 = vrot.slane %v15700_v61, %v11106_v27  ;;  %v3900_v11 = vrot.slane %v15700_v61, %v11288_v26  ;;  %v6236_v19 = vcombine.low %v6228_v54, %v6235_v5 }
 0x27b   :  { %v6245_v31 = vrot.slane %v6237_v30, %v11326_v13  ;;  %v7276_v2 = vsel %vm7032_vm12, %v7275_v49, %v7271_v57  ;;  %v3907_v62 = vrot.slane %v15700_v61, %v11308_v20  ;;  %v7285_v52 = vrot.slane %v14571_v18, %v15485_v59  ;;  %v6811_v30 = vpop.permute.xlu0 %6810 }
 0x27c   :  { %v6252_v28 = vrot.slane %v6238_v3, %v11326_v13  ;;  %v6254_v9 = vcombine.low %v3886_v36, %v3893_v29  ;;  %v7281_v25 = vsel %vm7039_vm13, %v7280_v42, %v7276_v2  ;;  %v3914_v4 = vrot.slane %v15701_v24, %v11087_v16  ;;  %v6784_v57 = vpop.permute.xlu1 %6783 }
 0x27d   :  { %6885 = vperm.xlu1 %10245, %v6236_v19   ;;  %v6255_v34 = vcombine.low %v3900_v11, %v3907_v62  ;;  %v3921_v54 = vrot.slane %v15701_v24, %v11106_v27  ;;  %v3928_v33 = vrot.slane %v15701_v24, %v11288_v26  ;;  %v7286_v5 = vsel %vm7046_vm14, %v7285_v52, %v7281_v25 }
 0x27e   :  { %v6262_v17 = vrot.slane %v6254_v9, %v11326_v13  ;;  %v3935_v42 = vrot.slane %v15701_v24, %v11308_v20  ;;  %v6253_v44 = vcombine.low %v6245_v31, %v6252_v28  ;;  %v14760_v21 = vsel %vm7053_vm15, %v7290_v14, %v7286_v5 }
 0x27f   :  { %v6269_v18 = vrot.slane %v6255_v34, %v11326_v13  ;;  %v6271_v16 = vcombine.low %v3914_v4, %v3921_v54  ;;  %v7299_v27 = vrot.slane %v14422_v23, %v15642_v40  ;;  %v7295_v49 = vrot.slane %v14611_v8, %v15644_v47 }
 0x280   :  { %v6272_v26 = vcombine.low %v3928_v33, %v3935_v42  ;;  %v7304_v61 = vrot.slane %v14644_v50, %v15648_v55  ;;  %v7314_v20 = vrot.slane %v14676_v22, %v15653_v48  ;;  %v7309_v36 = vrot.slane %v14467_v46, %v11012_v45  ;;  %v6817_v31 = vpop.permute.xlu0 %6816 }
 0x281   :  { %6888 = vperm.xlu1 %10245, %v6253_v44   ;;  %v6270_v14 = vcombine.low %v6262_v17, %v6269_v18  ;;  %v7300_v3 = vsel %vm6955_vm1, %v7299_v27, %v7295_v49  ;;  %v6279_v29 = vrot.slane %v6271_v16, %v11326_v13  ;;  %v7324_v8 = vrot.slane %v14709_v1, %v15657_v41 }
 0x282   :  { %v6286_v23 = vrot.slane %v6272_v26, %v11326_v13  ;;  %v7305_v11 = vsel %vm6962_vm2, %v7304_v61, %v7300_v3  ;;  %v7319_v50 = vrot.slane %v14507_v37, %v15651_v43  ;;  %v7334_v19 = vrot.slane %v6778_v53, %v11071_v6 }
 0x283   :  { %v7310_v22 = vsel %vm6969_vm3, %v7309_v36, %v7305_v11  ;;  %v6790_v2 = vpop.permute.xlu1 %6789  ;;  %v7329_v62 = vrot.slane %v14550_v0, %v11054_v63  ;;  %v7344_v25 = vrot.slane %v6784_v57, %v15518_v39  ;;  %v7339_v37 = vrot.slane %v14591_v60, %v15514_v10 }
 0x284   :  { %v7315_v46 = vsel %vm6976_vm4, %v7314_v20, %v7310_v22  ;;  %v6287_v9 = vcombine.low %v6279_v29, %v6286_v23  ;;  %v7354_v34 = vrot.slane %v6790_v2, %v15474_v56  ;;  %v7349_v0 = vrot.slane %v14629_v12, %v15519_v7 }
 0x285   :  { %6891 = vperm.xlu1 %10245, %v6270_v14   ;;  %v7320_v28 = vsel %vm6983_vm5, %v7319_v50, %v7315_v46  ;;  %v7359_v60 = vrot.slane %v14664_v35, %v15481_v51  ;;  %v7369_v44 = vrot.slane %v14698_v38, %v15490_v32  ;;  %v7378_v27 = vrot.slane %v14732_v15, %v15642_v40 }
 0x286   :  { %v7325_v1 = vsel %vm6990_vm6, %v7324_v8, %v7320_v28  ;;  %v7388_v38 = vrot.slane %v6811_v30, %v11012_v45  ;;  %v7398_v15 = vrot.slane %v6817_v31, %v15651_v43 }
 0x287   :  { %v7330_v52 = vsel %vm6997_vm7, %v7329_v62, %v7325_v1  ;;  %v6823_v33 = vpop.permute.xlu0 %6822 }
 0x288   :  { %v7335_v53 = vsel %vm7004_vm8, %v7334_v19, %v7330_v52  ;;  %v6796_v4 = vpop.permute.xlu1 %6795  ;;  %v7408_v30 = vrot.slane %v6823_v33, %v11054_v63 }
 0x289   :  { %6894 = vperm.xlu1 %10245, %v6287_v9   ;;  %v7340_v24 = vsel %vm7011_vm9, %v7339_v37, %v7335_v53  ;;  %v7364_v17 = vrot.slane %v6796_v4, %v15485_v59  ;;  %v15702_v53 = vld [vmem:[#allocation51_spill] sm:$0xff] }
 0x28a   :  { %v7345_v54 = vsel %vm7018_vm10, %v7344_v25, %v7340_v24 }
 0x28b   :  { %v7350_v5 = vsel %vm7025_vm11, %v7349_v0, %v7345_v54  ;;  %v6829_v26 = vpop.permute.xlu0 %6828  ;;  %v15703_v0 = vld [vmem:[#allocation11_spill] sm:$0xff] }
 0x28c   :  { %v7355_v42 = vsel %vm7032_vm12, %v7354_v34, %v7350_v5  ;;  %v7418_v31 = vrot.slane %v6829_v26, %v15514_v10  ;;  %v6949_v34 = vrot.slane %v15702_v53, %v15644_v47  ;;  %v7892_v24 = vsub.s32 0, %v15703_v0  ;;  %v14835_v54 = vld [vmem:[#allocation2] sm:$0x3f] }
 0x28d   :  { %v7360_v12 = vsel %vm7039_vm13, %v7359_v60, %v7355_v42  ;;  %v7896_v33 = vsub.s32 1, %v15703_v0  ;;  %v15704_v60 = vld [vmem:[#allocation48_spill] sm:$0xff]  ;;  %v15706_v26 = vld [vmem:[#allocation43_spill] sm:$0xff] }
 0x28e   :  { %v7365_v18 = vsel %vm7046_vm14, %v7364_v17, %v7360_v12  ;;  %v6802_v57 = vpop.permute.xlu1 %6801  ;;  %v6954_v5 = vrot.slane %v15704_v60, %v15642_v40 }
 0x28f   :  { %v14807_v16 = vsel %vm7053_vm15, %v7369_v44, %v7365_v18  ;;  %v7374_v35 = vrot.slane %v6802_v57, %v15644_v47  ;;  %v15705_v44 = vld [vmem:[#allocation40_spill] sm:$0xff] }
 0x290   :  { %v6961_v12 = vrot.slane %v15705_v44, %v15648_v55 }
 0x291   :  { %v7379_v49 = vsel %vm6955_vm1, %v7378_v27, %v7374_v35  ;;  %v6835_v36 = vpop.permute.xlu0 %6834  ;;  %v6956_v27 = vsel %vm6955_vm1, %v6954_v5, %v6949_v34  ;;  %v6968_v35 = vrot.slane %v15706_v26, %v11012_v45 }
 0x292   :  { %v7428_v17 = vrot.slane %v6835_v36, %v15519_v7 }
 0x294   :  { %v6808_v61 = vpop.permute.xlu1 %6807 }
 0x295   :  { %v7383_v20 = vrot.slane %v6808_v61, %v15648_v55  ;;  %v15707_v61 = vld [vmem:[#allocation45_spill] sm:$0xff] }
 0x297   :  { %v7384_v14 = vsel %vm6962_vm2, %v7383_v20, %v7379_v49  ;;  %v6841_v11 = vpop.permute.xlu0 %6840  ;;  %v7893_v49 = vrot.slane %v14835_v54, %v7892_v24  ;;  %v6975_v20 = vrot.slane %v15707_v61, %v15653_v48 }
 0x298   :  { %v7389_v3 = vsel %vm6969_vm3, %v7388_v38, %v7384_v14  ;;  %v7897_v38 = vrot.slane %v14835_v54, %v7896_v33  ;;  %v15708_v14 = vld [vmem:[#allocation49_spill] sm:$0xff] }
 0x29a   :  { %v6814_v29 = vpop.permute.xlu1 %6813 }
 0x29b   :  { %v7393_v23 = vrot.slane %v6814_v29, %v15653_v48 }
 0x29c   :  { %v6847_v19 = vpop.permute.xlu0 %6846 }
 0x29d   :  { %v7394_v8 = vsel %vm6976_vm4, %v7393_v23, %v7389_v3  ;;  %v6982_v3 = vrot.slane %v15708_v14, %v15651_v43  ;;  %v6963_v23 = vsel %vm6962_vm2, %v6961_v12, %v6956_v27 }
 0x29e   :  { %v7399_v50 = vsel %vm6983_vm5, %v7398_v15, %v7394_v8  ;;  %v15709_v15 = vld [vmem:[#allocation81_spill] sm:$0xff] }
 0x29f   :  { %v6820_v22 = vpop.permute.xlu1 %6819  ;;  %v6989_v8 = vrot.slane %v15709_v15, %v15657_v41  ;;  %v15716_v15 = vld [vmem:[#allocation84_spill] sm:$0xff] }
 0x2a0   :  { %v7403_v46 = vrot.slane %v6820_v22, %v15657_v41  ;;  %v6970_v22 = vsel %vm6969_vm3, %v6968_v35, %v6963_v23  ;;  %v15714_v35 = vld [vmem:[#allocation98_spill] sm:$0xff] }
 0x2a2   :  { %v7404_v2 = vsel %vm6990_vm6, %v7403_v46, %v7399_v50  ;;  %v14827_v1 = vpop.permute.xlu0 %6852  ;;  %v7438_v50 = vrot.slane %v6841_v11, %v15481_v51  ;;  %v15710_v46 = vld [vmem:[#allocation96_spill] sm:$0xff] }
 0x2a3   :  { %v7409_v62 = vsel %vm6997_vm7, %v7408_v30, %v7404_v2  ;;  %v6996_v30 = vrot.slane %v15710_v46, %v11054_v63  ;;  %v15711_v2 = vld [vmem:[#allocation91_spill] sm:$0xff] }
 0x2a5   :  { %v6826_v28 = vpop.permute.xlu1 %6825 }
 0x2a6   :  { %v7413_v9 = vrot.slane %v6826_v28, %v11071_v6 }
 0x2a7   :  { %v14844_v18 = vpop.permute.xlu0 %6858 }
 0x2a8   :  { %v7414_v25 = vsel %vm7004_vm8, %v7413_v9, %v7409_v62  ;;  %v9751_v62 = vadd.f32 %v15711_v2, %v7893_v49  ;;  %v6977_v9 = vsel %vm6976_vm4, %v6975_v20, %v6970_v22  ;;  %v7017_v49 = vrot.slane %v15714_v35, %v15518_v39  ;;  %v15718_v2 = vld [vmem:[#allocation22_spill] sm:$0xff] }
 0x2a9   :  { %v7419_v37 = vsel %vm7011_vm9, %v7418_v31, %v7414_v25  ;;  %v15712_v31 = vld [vmem:[#allocation57_spill] sm:$0xff]  ;;  %v6984_v24 = vsel %vm6983_vm5, %v6982_v3, %v6977_v9  ;;  %v15719_v9 = vld [vmem:[#allocation83_spill] sm:$0xff] }
 0x2aa   :  { %v6832_v52 = vpop.permute.xlu1 %6831  ;;  %v7003_v25 = vrot.slane %v15712_v31, %v11071_v6  ;;  %v6991_v60 = vsel %vm6990_vm6, %v6989_v8, %v6984_v24  ;;  %v7031_v8 = vrot.slane %v15716_v15, %v15474_v56  ;;  %v7038_v31 = vrot.slane %v15719_v9, %v15481_v51 }
 0x2ab   :  { %v7423_v4 = vrot.slane %v6832_v52, %v15518_v39  ;;  %v6998_v12 = vsel %vm6997_vm7, %v6996_v30, %v6991_v60 }
 0x2ac   :  { %v7005_v26 = vsel %vm7004_vm8, %v7003_v25, %v6998_v12 }
 0x2ad   :  { %v7424_v42 = vsel %vm7018_vm10, %v7423_v4, %v7419_v37  ;;  %v15713_v37 = vld [vmem:[#allocation94_spill] sm:$0xff]  ;;  %v14870_v53 = vpop.permute.xlu0 %6864 }
 0x2ae   :  { %v7429_v57 = vsel %vm7025_vm11, %v7428_v17, %v7424_v42  ;;  %v9753_v52 = vadd.f32 %v15713_v37, %v7897_v38  ;;  %v15715_v38 = vld [vmem:[#allocation53_spill] sm:$0xff] }
 0x2b0   :  { %v6838_v36 = vpop.permute.xlu1 %6837 }
 0x2b1   :  { %v7433_v29 = vrot.slane %v6838_v36, %v15474_v56  ;;  %v7010_v36 = vrot.slane %v15715_v38, %v15514_v10 }
 0x2b3   :  { %v7434_v28 = vsel %vm7032_vm12, %v7433_v29, %v7429_v57  ;;  %v7448_v57 = vrot.slane %v6847_v19, %v15490_v32  ;;  %v7012_v3 = vsel %vm7011_vm9, %v7010_v36, %v7005_v26  ;;  %v14892_v29 = vpop.permute.xlu0 %6870 }
 0x2b4   :  { %v7439_v11 = vsel %vm7039_vm13, %v7438_v50, %v7434_v28  ;;  %v7019_v23 = vsel %vm7018_vm10, %v7017_v49, %v7012_v3  ;;  %v15717_v50 = vld [vmem:[#allocation56_spill] sm:$0xff] }
 0x2b5   :  { %v6844_v4 = vpop.permute.xlu1 %6843  ;;  %v7024_v22 = vrot.slane %v15717_v50, %v15519_v7 }
 0x2b6   :  { %v9791_v34 = vpop.f32.mrb[0].mxu0  ;;  %v7443_v5 = vrot.slane %v6844_v4, %v15485_v59 }
 0x2b7   :  { %v14874_v33 = vadd.f32 %v9791_v34, %v9751_v62  ;;  %v9793_v17 = vpop.f32.mrb[1].mxu0  ;;  %v7026_v46 = vsel %vm7025_vm11, %v7024_v22, %v7019_v23  ;;  %v7045_v62 = vrot.slane %v15718_v2, %v15485_v59 }
 0x2b8   :  { %v14878_v42 = vadd.f32 %v9793_v17, %v9753_v52  ;;  %v9795_v44 = vpop.f32.mrb[2].mxu0  ;;  %v7444_v61 = vsel %vm7046_vm14, %v7443_v5, %v7439_v11  ;;  %v7033_v30 = vsel %vm7032_vm12, %v7031_v8, %v7026_v46  ;;  %v14909_v25 = vpop.permute.xlu0 %6876  ;;  %v15720_v11 = vld [vmem:[#allocation82_spill] sm:$0xff]  ;;  %v7904_v8 = vsub.s32 3, %v15703_v0 }
 0x2b9   :  { %v9796_v27 = vpop.f32.mrb[3].mxu0  ;;  %v7449_v14 = vsel %vm7053_vm15, %v7448_v57, %v7444_v61  ;;  %v7040_v37 = vsel %vm7039_vm13, %v7038_v31, %v7033_v30  ;;  %v7052_v34 = vrot.slane %v15720_v11, %v15490_v32  ;;  %v15721_v5 = vld [vmem:[#allocation90_spill] sm:$0xff] }
 0x2ba   :  { %v9968_v20 = vcombine.low %v14874_v33, %v14878_v42  ;;  %v7047_v52 = vsel %vm7046_vm14, %v7045_v62, %v7040_v37  ;;  %v14924_v44 = vsel %vm7608_vm0, %v7449_v14, %v15721_v5  ;;  %v7900_v14 = vsub.s32 2, %v15703_v0 }
 0x2bb   :  { %v14894_v19 = vpop.permute.xlu1 %6849  ;;  %v7054_v4 = vsel %vm7053_vm15, %v7052_v34, %v7047_v52  ;;  %v7905_v31 = vrot.slane %v14835_v54, %v7904_v8 }
 0x2bc   :  { %v14920_v60 = vsel %vm7608_vm0, %v14807_v16, %v7054_v4  ;;  %v7901_v62 = vrot.slane %v14835_v54, %v7900_v14 }
 0x2bd   :  { %v6901_v17 = vpop.permute.xlu0 %6900  ;;  %v7613_v12 = vcombine.low %v14920_v60, %v14924_v44 }
 0x2be   :  { %v7536_v15 = vrot.slane %v6901_v17, %v15642_v40 }
 0x2c0   :  { %v14905_v28 = vpop.permute.xlu1 %6855 }
 0x2c3   :  { %v6907_v27 = vpop.permute.xlu0 %6906 }
 0x2c4   :  { %v7546_v9 = vrot.slane %v6907_v27, %v11012_v45 }
 0x2c5   :  { %v14915_v24 = vpop.permute.xlu1 %6861 }
 0x2c8   :  { %v6913_v35 = vpop.permute.xlu0 %6912 }
 0x2cb   :  { %v14928_v57 = vpop.permute.xlu1 %6867 }
 0x2ce   :  { %v6919_v61 = vpop.permute.xlu0 %6918 }
 0x2d0   :  { %v14930_v26 = vpop.permute.xlu1 %6873 }
 0x2d3   :  { %v6925_v36 = vpop.permute.xlu0 %6924 }
 0x2d4   :  { %v7576_v33 = vrot.slane %v6925_v36, %v15514_v10  ;;  %v7482_v36 = vrot.slane %v14928_v57, %v15657_v41  ;;  %v7487_v57 = vrot.slane %v14892_v29, %v11054_v63 }
 0x2d6   :  { %v6898_v49 = vpop.permute.xlu1 %6897 }
 0x2d7   :  { %v7532_v16 = vrot.slane %v6898_v49, %v15644_v47  ;;  %v7556_v49 = vrot.slane %v6913_v35, %v15651_v43  ;;  %v9976_v35 = vrot.slane %v9968_v20, %v11326_v13  ;;  %v7467_v20 = vrot.slane %v14844_v18, %v11012_v45 }
 0x2d9   :  { %v6928_v50 = vpop.permute.xlu0 %6927  ;;  %v7537_v22 = vsel %vm6955_vm1, %v7536_v15, %v7532_v16 }
 0x2dc   :  { %v6904_v38 = vpop.permute.xlu1 %6903 }
 0x2dd   :  { %v7541_v23 = vrot.slane %v6904_v38, %v15648_v55 }
 0x2de   :  { %v6931_v11 = vpop.permute.xlu0 %6930 }
 0x2df   :  { %v7542_v30 = vsel %vm6962_vm2, %v7541_v23, %v7537_v22  ;;  %v7453_v22 = vrot.slane %v14894_v19, %v15644_v47  ;;  %v7586_v45 = vrot.slane %v6931_v11, %v15519_v7 }
 0x2e0   :  { %v7547_v37 = vsel %vm6969_vm3, %v7546_v9, %v7542_v30 }
 0x2e1   :  { %v6910_v3 = vpop.permute.xlu1 %6909 }
 0x2e2   :  { %v7551_v2 = vrot.slane %v6910_v3, %v15653_v48 }
 0x2e4   :  { %v7552_v34 = vsel %vm6976_vm4, %v7551_v2, %v7547_v37  ;;  %v7462_v2 = vrot.slane %v14905_v28, %v15648_v55  ;;  %v7472_v55 = vrot.slane %v14915_v24, %v15653_v48  ;;  %v7477_v48 = vrot.slane %v14870_v53, %v15651_v43 }
 0x2e5   :  { %v7557_v27 = vsel %vm6983_vm5, %v7556_v49, %v7552_v34  ;;  %v7492_v49 = vrot.slane %v14930_v26, %v11071_v6 }
 0x2e6   :  { %v9873_v52 = vpop.f32.mrb[4].mxu1 }
 0x2e7   :  { %v6916_v46 = vpop.permute.xlu1 %6915  ;;  %v10223_v17 = vadd.f32 %v9873_v52, %v7901_v62  ;;  %v9875_v5 = vpop.f32.mrb[5].mxu1 }
 0x2e8   :  { %v7561_v4 = vrot.slane %v6916_v46, %v15657_v41  ;;  %v10224_v3 = vadd.f32 %v9875_v5, %v7905_v31  ;;  %v9877_v16 = vpop.f32.mrb[6].mxu1  ;;  %v7566_v46 = vrot.slane %v6919_v61, %v11054_v63  ;;  %v6934_v62 = vpop.permute.xlu0 %6933  ;;  %v7457_v31 = vrot.slane %v14827_v1, %v15642_v40 }
 0x2e9   :  { %v9878_v23 = vpop.f32.mrb[7].mxu1  ;;  %v7581_v1 = vrot.slane %v6928_v50, %v15518_v39 }
 0x2ea   :  { %v9969_v14 = vcombine.low %v10223_v17, %v10224_v3  ;;  %v7562_v15 = vsel %vm6990_vm6, %v7561_v4, %v7557_v27  ;;  %v7458_v61 = vsel %vm6955_vm1, %v7457_v31, %v7453_v22 }
 0x2eb   :  { %v7567_v37 = vsel %vm6997_vm7, %v7566_v46, %v7562_v15  ;;  %v7463_v42 = vsel %vm6962_vm2, %v7462_v2, %v7458_v61 }
 0x2ec   :  { %v9983_v30 = vrot.slane %v9969_v14, %v11326_v13  ;;  %v6937_v28 = vpop.permute.xlu0 %6936  ;;  %v7468_v34 = vsel %vm6969_vm3, %v7467_v20, %v7463_v42 }
 0x2ed   :  { %v6922_v38 = vpop.permute.xlu1 %6921  ;;  %v7473_v4 = vsel %vm6976_vm4, %v7472_v55, %v7468_v34  ;;  %v7596_v3 = vrot.slane %v6937_v28, %v15481_v51 }
 0x2ee   :  { %v7571_v8 = vrot.slane %v6922_v38, %v11071_v6  ;;  %v9984_v47 = vcombine.low %v9976_v35, %v9983_v30  ;;  %v7478_v24 = vsel %vm6983_vm5, %v7477_v48, %v7473_v4  ;;  %v7591_v38 = vrot.slane %v6934_v62, %v15474_v56 }
 0x2ef   :  { %v7483_v5 = vsel %vm6990_vm6, %v7482_v36, %v7478_v24  ;;  %v7497_v6 = vrot.slane %v14909_v25, %v15514_v10 }
 0x2f0   :  { %v7572_v19 = vsel %vm7004_vm8, %v7571_v8, %v7567_v37  ;;  %9995 = vst [vmem:[#allocation5] sm:$0xff] %v9984_v47  ;;  %v6940_v41 = vpop.permute.xlu0 %6939  ;;  %v7488_v11 = vsel %vm6997_vm7, %v7487_v57, %v7483_v5  ;;  %v7621_v47 = vrot.slane %v7613_v12, %v11326_v13 }
 0x2f1   :  { %v7577_v40 = vsel %vm7011_vm9, %v7576_v33, %v7572_v19  ;;  %v7493_v16 = vsel %vm7004_vm8, %v7492_v49, %v7488_v11  ;;  %v7601_v63 = vrot.slane %v6940_v41, %v15485_v59 }
 0x2f2   :  { %v6880_v9 = vpop.permute.xlu1 %6879  ;;  %v7582_v17 = vsel %vm7018_vm10, %v7581_v1, %v7577_v40  ;;  %v7498_v8 = vsel %vm7011_vm9, %v7497_v6, %v7493_v16 }
 0x2f3   :  { %v7587_v50 = vsel %vm7025_vm11, %v7586_v45, %v7582_v17  ;;  %v7502_v23 = vrot.slane %v6880_v9, %v15518_v39 }
 0x2f4   :  { %v7592_v43 = vsel %vm7032_vm12, %v7591_v38, %v7587_v50 }
 0x2f5   :  { %v7597_v26 = vsel %vm7039_vm13, %v7596_v3, %v7592_v43  ;;  %v6943_v29 = vpop.permute.xlu0 %6942  ;;  %v7503_v39 = vsel %vm7018_vm10, %v7502_v23, %v7498_v8 }
 0x2f6   :  { %v7602_v46 = vsel %vm7046_vm14, %v7601_v63, %v7597_v26  ;;  %v7606_v25 = vrot.slane %v6943_v29, %v15490_v32 }
 0x2f8   :  { %v6883_v52 = vpop.permute.xlu1 %6882 }
 0x2f9   :  { %v7507_v27 = vrot.slane %v6883_v52, %v15519_v7 }
 0x2fb   :  { %v7508_v7 = vsel %vm7025_vm11, %v7507_v27, %v7503_v39 }
 0x2fc   :  { %v6886_v18 = vpop.permute.xlu1 %6885 }
 0x2fd   :  { %v7512_v14 = vrot.slane %v6886_v18, %v15474_v56  ;;  %v7607_v56 = vsel %vm7053_vm15, %v7606_v25, %v7602_v46 }
 0x2ff   :  { %v7513_v35 = vsel %vm7032_vm12, %v7512_v14, %v7508_v7 }
 0x300   :  { %v6889_v53 = vpop.permute.xlu1 %6888 }
 0x301   :  { %v7517_v22 = vrot.slane %v6889_v53, %v15481_v51 }
 0x303   :  { %v7518_v2 = vsel %vm7039_vm13, %v7517_v22, %v7513_v35 }
 0x304   :  { %v6892_v15 = vpop.permute.xlu1 %6891 }
 0x305   :  { %v7522_v10 = vrot.slane %v6892_v15, %v15485_v59  ;;  %v7612_v59 = vsel %vm7608_vm0, %v7607_v56, %v14760_v21 }
 0x307   :  { %v7523_v51 = vsel %vm7046_vm14, %v7522_v10, %v7518_v2 }
 0x308   :  { %v6895_v30 = vpop.permute.xlu1 %6894 }
 0x309   :  { %v7527_v62 = vrot.slane %v6895_v30, %v15490_v32 }
 0x30b   :  { %v7528_v9 = vsel %vm7053_vm15, %v7527_v62, %v7523_v51 }
 0x30c   :  { %v7611_v31 = vsel %vm7608_vm0, %v7528_v9, %v14555_v58 }
 0x30d   :  { %v7614_v37 = vcombine.low %v7611_v31, %v7612_v59 }
 0x30f   :  { %v7628_v32 = vrot.slane %v7614_v37, %v11326_v13 }
 0x311   :  { %v7629_v19 = vcombine.low %v7621_v47, %v7628_v32 }
 0x313   :  { %7631 = vst [vmem:[#allocation6] sm:$0xff] %v7629_v19 }
 0x314   :  { %10567 = shalt.err (!%p10564_p12)
}
 0x315   :  { %s10568_s9 = scalar_lea.hbm %s15054_s4, 128 }
 0x316   :  { %p10569_p13 = scmp.ne.s32.totalorder %s15054_s4, %s10568_s9  ;;  %p10572_p0 = scmp.lt.u32.totalorder %s10568_s9, %s15054_s4 }
 0x318   :  { %p10574_p1 = pnand %p10572_p0, %p10569_p13 }
 0x31a   :  { %10577 = shalt.err (!%p10574_p1)
}
 0x31b   :  { %10016 = dma.vmem_to_hbm [thread:$0]  %s10014_s6, 128, %s15054_s4, [#allocation7]   ;;  %v7908_v13 = vsub.s32 4, %v15703_v0  ;;  %v7912_v58 = vsub.s32 5, %v15703_v0 }
 0x31c   :  { %s10614_s15 = smov [#allocation5]  }
 0x31d   :  { %v7909_v21 = vrot.slane %v14835_v54, %v7908_v13  ;;  %v7913_v60 = vrot.slane %v14835_v54, %v7912_v58  ;;  %s10003_s16 = sshll.u32 %s10614_s15, 4  ;;  %s10004_s16 = int_to_ptr.vmem [resolvable:$true] %s10003_s16 }
 0x31e   :  { %s10578_s4 = scalar_lea.vmem %s10004_s16, 192  ;;  %p10583_p3 = scmp.lt.s32.totalorder %s10004_s16, %s10004_s16 }
 0x31f   :  { %p10579_p2 = scmp.ne.s32.totalorder %s10004_s16, %s10578_s4  ;;  %p10584_p4 = scmp.lt.s32.totalorder %s10578_s4, %s10578_s4 }
 0x321   :  { %p10585_p5 = por %p10584_p4, %p10583_p3 }
 0x323   :  { %p10586_p6 = pnand %p10585_p5, %p10579_p2 }
 0x340   :  { %v9955_v44 = vpop.f32.mrb[4].mxu0 }
 0x341   :  { %v10225_v12 = vadd.f32 %v9955_v44, %v7909_v21  ;;  %v9957_v61 = vpop.f32.mrb[5].mxu0 }
 0x342   :  { %v10226_v33 = vadd.f32 %v9957_v61, %v7913_v60  ;;  %v9959_v42 = vpop.f32.mrb[6].mxu0 }
 0x343   :  { %v9960_v55 = vpop.f32.mrb[7].mxu0 }
 0x344   :  { %v9985_v20 = vcombine.low %v10225_v12, %v10226_v33 }
 0x346   :  { %10218 = vst.sshfl [vmem:[#allocation5 + $0x8] sm:$0x33 pattern:$0x76325410] %v9985_v20 }
 0x347   :  { %10589 = shalt.err (!%p10586_p6)
}
 0x348   :  { %s10590_s19 = scalar_lea.hbm %s15053_s3, 192 }
 0x349   :  { %p10591_p7 = scmp.ne.s32.totalorder %s15053_s3, %s10590_s19  ;;  %p10594_p8 = scmp.lt.u32.totalorder %s10590_s19, %s15053_s3 }
 0x34b   :  { %p10596_p9 = pnand %p10594_p8, %p10591_p7 }
 0x34d   :  { %10599 = shalt.err (!%p10596_p9)
}
 0x34e   :  { %10006 = dma.vmem_to_hbm [thread:$0]  %s10004_s16, 192, %s15053_s3, [#allocation4]  }
 0x34f   :  { %10602 = dma.done.wait [#allocation4], 192  }
 0x350   :  { %10603 = vsyncadd [#allocation4], 4294967104 }
 0x351   :  { %10604 = dma.done.wait [#allocation7], 128  }
 0x352   :  { %10605 = vsyncadd [#allocation7], 4294967168 }
 0x353   :  { %10023 = vsyncpa [#allocation3], 1 }
 0x354   :  { %10024 = vsyncpa [#allocation4], 1 }
 0x355   :  { %10025 = vsyncpa [#allocation7], 1 }

</bundles_post_ra>
